<compile_context>
chip_gen: v6e
topology: v6e:2x2x1
jax: 0.10.0
libtpu: 0.0.40
codegen_flags: <defaults>
</compile_context>

<pallas_src>
import functools
import math

import jax
import jax.numpy as jnp
from jax import lax
from jax.experimental import pallas as pl
from jax.experimental.pallas import tpu as pltpu


NUM_HEADS = 16            # nn.MultiheadAttention(nhf, 16) in the reference module
USE_BF16_MATMUL = True    # bf16 MXU operands; LN/softmax/mask math stays in f32
ROW_TILE = 512            # row tile for row-flattened (X-path) kernels
EDGE_STORE_DTYPE = jnp.bfloat16   # inter-kernel storage dtype for the A path

_PAR1 = pltpu.CompilerParams(dimension_semantics=("parallel",))


# ----------------------------------------------------------------------------
# helpers
# ----------------------------------------------------------------------------
def _mm_dtype(bf16):
    return jnp.bfloat16 if bf16 else jnp.float32


def _tpu_vmem_bytes():
    """Trace-time VMEM capacity; conservative fallback if the query fails."""
    try:
        info = pltpu.get_tpu_info()
        for attr in ("vmem_capacity_bytes", "vmem_size_bytes", "vmem_bytes"):
            v = getattr(info, attr, None)
            if v:
                return int(v)
    except Exception:
        pass
    return 64 << 20   # v7x per-core VMEM; safe lower bound for v5e/v6e too


def _row_tiles(m, target=ROW_TILE):
    """Row tile + grid steps for row-flattened kernels (no padding; cdiv grid)."""
    if m <= target:
        return m, 1                 # single block == full dim (always legal)
    return target, pl.cdiv(m, target)


def _choose_ti(n, bytes_per_i_row, vmem_budget, target=64):
    """i-tile for the edge kernel: divides N, keeps ti*N a multiple of 8, and
    the per-step VMEM estimate within ~60% of the budget."""
    cap = max(1, int(vmem_budget * 0.6) // max(int(bytes_per_i_row), 1))
    limit = min(target, cap)
    if limit >= n:
        return n
    best = None
    for cand in range(1, n):
        if n % cand != 0 or cand > limit:
            continue
        if (cand * n) % 8 != 0:
            continue
        best = cand
    # TODO(synk): if no divisor fits the budget, a j-chunk fori_loop inside the
    #   kernel would bound VMEM independent of N; fall back to full N for now.
    return best if best is not None else n


# ----------------------------------------------------------------------------
# Pallas kernels
# ----------------------------------------------------------------------------
def _mlp2_kernel(x_ref, w1_ref, b1_ref, w2_ref, b2_ref, o_ref, *, bf16):
    # Linear -> ReLU -> Linear (row tile)
    dt = _mm_dtype(bf16)
    h = jnp.dot(x_ref[...].astype(dt), w1_ref[...].astype(dt),
                preferred_element_type=jnp.float32) + b1_ref[...]
    h = jnp.maximum(h, 0.0)
    y = jnp.dot(h.astype(dt), w2_ref[...].astype(dt),
                preferred_element_type=jnp.float32) + b2_ref[...]
    o_ref[...] = y.astype(o_ref.dtype)


def _edge_layer_kernel(*refs, n, fuse_in, fuse_out, bf16):
    """Fused dense edge update for one (batch, i-tile) block.

    Optionally fuses the input projection (linear_in_e, first layer) and the
    output projection (linear_out_e, last layer).  Computes, per edge (i, j):
        a0   = A_raw @ W_in + b_in                       (if fuse_in, else A)
        upd  = (relu(a0@W1a + Xi@W1xi + Xj@W1xj + b1) @ W2 + b2) * m_i * m_j
        out  = (a0 + upd) @ W_out + b_out                (if fuse_out)
               a0 + upd                                  (otherwise, bf16)
        msg_i = sum_j upd                                (node message)
    """
    dt = _mm_dtype(bf16)
    it = iter(refs)
    a_ref = next(it); xi_ref = next(it); xall_ref = next(it)
    mi_ref = next(it); mall_ref = next(it)
    if fuse_in:
        win_ref = next(it); bin_ref = next(it)
    w1a_ref = next(it); w1xi_ref = next(it); w1xj_ref = next(it)
    b1_ref = next(it); w2_ref = next(it); b2_ref = next(it)
    if fuse_out:
        wout_ref = next(it); bout_ref = next(it)
    out_ref = next(it); msg_ref = next(it)

    a_in = a_ref[0]                                  # [ti*n, cin]
    ti = a_in.shape[0] // n
    if fuse_in:
        a0 = jnp.dot(a_in.astype(dt), win_ref[...].astype(dt),
                     preferred_element_type=jnp.float32) + bin_ref[...]
    else:
        a0 = a_in.astype(jnp.float32)                # bf16 storage -> f32 math
    de = a0.shape[-1]

    xi = xi_ref[0]                                   # [ti, nhf]
    xall = xall_ref[0]                               # [n, nhf]

    h = jnp.dot(a0.astype(dt), w1a_ref[...].astype(dt),
                preferred_element_type=jnp.float32)                  # [ti*n, H]
    hi = jnp.dot(xi.astype(dt), w1xi_ref[...].astype(dt),
                 preferred_element_type=jnp.float32)                  # [ti, H]
    hj = jnp.dot(xall.astype(dt), w1xj_ref[...].astype(dt),
                 preferred_element_type=jnp.float32)                  # [n, H]
    hd = h.shape[-1]

    h3 = h.reshape(ti, n, hd) + hi[:, None, :] + hj[None, :, :] + b1_ref[...]
    h3 = jnp.maximum(h3, 0.0)
    upd = jnp.dot(h3.reshape(ti * n, hd).astype(dt), w2_ref[...].astype(dt),
                  preferred_element_type=jnp.float32) + b2_ref[...]   # [ti*n, de]
    upd3 = upd.reshape(ti, n, de)

    pm = mi_ref[0][:, None, :] * mall_ref[0][None, :, :]              # [ti, n, 1]
    upd3 = upd3 * pm

    msg_ref[0] = jnp.sum(upd3, axis=1).astype(msg_ref.dtype)          # [ti, de]

    a_new = a0 + upd3.reshape(ti * n, de)                             # residual
    if fuse_out:
        y = jnp.dot(a_new.astype(dt), wout_ref[...].astype(dt),
                    preferred_element_type=jnp.float32) + bout_ref[...]
        out_ref[0] = y.astype(out_ref.dtype)
    else:
        out_ref[0] = a_new.astype(out_ref.dtype)                      # bf16 store


def _node_qkv_kernel(x_ref, m_ref, mk_ref, w1x_ref, w1m_ref, b1_ref,
                     w2_ref, b2_ref, wqkv_ref, bqkv_ref,
                     xo_ref, qkv_ref, *, bf16):
    # Fused node MLP + residual + mask gate, and the attention QKV projection
    # of the updated node features (saves one HBM round trip of X).
    dt = _mm_dtype(bf16)
    x = x_ref[...]
    h = (jnp.dot(x.astype(dt), w1x_ref[...].astype(dt),
                 preferred_element_type=jnp.float32)
         + jnp.dot(m_ref[...].astype(dt), w1m_ref[...].astype(dt),
                   preferred_element_type=jnp.float32)
         + b1_ref[...])
    h = jnp.maximum(h, 0.0)
    upd = jnp.dot(h.astype(dt), w2_ref[...].astype(dt),
                  preferred_element_type=jnp.float32) + b2_ref[...]
    xn = x + upd * mk_ref[...]
    xo_ref[...] = xn.astype(xo_ref.dtype)
    qkv = jnp.dot(xn.astype(dt), wqkv_ref[...].astype(dt),
                  preferred_element_type=jnp.float32) + bqkv_ref[...]
    qkv_ref[...] = qkv.astype(qkv_ref.dtype)


def _attn_kernel(q_ref, k_ref, v_ref, m_ref, o_ref, *, scale, bf16):
    # Head-batched attention for one batch element: q/k/v are [H, N, dh].
    # Scores / softmax / masking in f32; matmul operands in bf16.
    dt = _mm_dtype(bf16)
    q = q_ref[0].astype(dt)
    k = k_ref[0].astype(dt)
    v = v_ref[0].astype(dt)
    km = m_ref[0]                                    # [1, N], 1.0 = valid key
    s = jnp.einsum('hqd,hkd->hqk', q, k,
                   preferred_element_type=jnp.float32) * scale        # [H,N,N]
    s = jnp.where(km[None, :, :] > 0.5, s, -1e30)    # key_padding_mask
    s = s - jnp.max(s, axis=-1, keepdims=True)
    p = jnp.exp(s)
    p = p * pl.reciprocal(jnp.sum(p, axis=-1, keepdims=True), approx=True)
    ctx = jnp.einsum('hqk,hkd->hqd', p.astype(dt), v,
                     preferred_element_type=jnp.float32)              # [H,N,dh]
    o_ref[0] = ctx.astype(o_ref.dtype)
    # TODO(synk): for large N, add a query/key tile grid axis (flash-style
    #   running max/sum) so the [H,N,N] scores stay bounded on v7x's 64 MiB.


def _outproj_ln_kernel(x_ref, c_ref, wo_ref, bo_ref, g_ref, b_ref, o_ref,
                       *, eps, bf16):
    # Fused: attention output projection + residual + LayerNorm (f32 math).
    dt = _mm_dtype(bf16)
    att = jnp.dot(c_ref[...].astype(dt), wo_ref[...].astype(dt),
                  preferred_element_type=jnp.float32) + bo_ref[...]
    y = x_ref[...].astype(jnp.float32) + att
    mu = jnp.mean(y, axis=-1, keepdims=True)
    var = jnp.mean(jnp.square(y - mu), axis=-1, keepdims=True)
    yn = (y - mu) * lax.rsqrt(var + eps)
    o_ref[...] = (yn * g_ref[...] + b_ref[...]).astype(o_ref.dtype)


# ----------------------------------------------------------------------------
# Pallas wrappers
# ----------------------------------------------------------------------------
def pallas_mlp2(x2d, w1, b1, w2, b2, *, bf16=USE_BF16_MATMUL):
    m, k = x2d.shape
    h = w1.shape[1]
    nout = w2.shape[1]
    tm, steps = _row_tiles(m)
    return pl.pallas_call(
        functools.partial(_mlp2_kernel, bf16=bf16),
        out_shape=jax.ShapeDtypeStruct((m, nout), jnp.float32),
        grid=(steps,),
        in_specs=[pl.BlockSpec((tm, k), lambda i: (i, 0)),
                  pl.BlockSpec((k, h), lambda i: (0, 0)),
                  pl.BlockSpec((1, h), lambda i: (0, 0)),
                  pl.BlockSpec((h, nout), lambda i: (0, 0)),
                  pl.BlockSpec((1, nout), lambda i: (0, 0))],
        out_specs=pl.BlockSpec((tm, nout), lambda i: (i, 0)),
        compiler_params=_PAR1,
    )(x2d, w1, b1, w2, b2)


def pallas_edge_layer(A2, X, mask3, ep, *, n, fuse_in=False, fuse_out=False,
                      in_proj=None, out_proj=None, bf16=USE_BF16_MATMUL):
    """A2: [B, N*N, cin] (f32 raw for the first layer, bf16 afterwards),
    X: [B, N, nhf], mask3: [B, N, 1] float.
    Returns (A_out [B, N*N, cout] bf16, msg [B, N, de] f32)."""
    B = A2.shape[0]
    cin = A2.shape[-1]
    nhf = X.shape[-1]
    hd = ep["w2"].shape[0]
    de = ep["w2"].shape[1]
    cout = out_proj[0].shape[1] if fuse_out else de

    # VMEM-aware i-tile (double-buffered A in/out + f32 intermediates).
    in_b = jnp.dtype(A2.dtype).itemsize
    out_b = jnp.dtype(EDGE_STORE_DTYPE).itemsize
    bytes_per_i_row = n * (cin * in_b * 2 + cout * out_b * 2
                           + hd * 4 * 2 + de * 4 * 3) + nhf * 4 * 4
    budget = _tpu_vmem_bytes()
    ti = _choose_ti(n, bytes_per_i_row, budget)
    ni = n // ti

    in_specs = [
        pl.BlockSpec((1, ti * n, cin), lambda b, i: (b, i, 0)),   # A rows (i-tile x all j)
        pl.BlockSpec((1, ti, nhf), lambda b, i: (b, i, 0)),       # X_i tile
        pl.BlockSpec((1, n, nhf), lambda b, i: (b, 0, 0)),        # X_j (all nodes)
        pl.BlockSpec((1, ti, 1), lambda b, i: (b, i, 0)),         # mask_i
        pl.BlockSpec((1, n, 1), lambda b, i: (b, 0, 0)),          # mask_j
    ]
    args = [A2, X, X, mask3, mask3]
    if fuse_in:
        win, bin_ = in_proj
        in_specs += [pl.BlockSpec((cin, de), lambda b, i: (0, 0)),
                     pl.BlockSpec((1, de), lambda b, i: (0, 0))]
        args += [win, bin_]
    in_specs += [pl.BlockSpec((de, hd), lambda b, i: (0, 0)),
                 pl.BlockSpec((nhf, hd), lambda b, i: (0, 0)),
                 pl.BlockSpec((nhf, hd), lambda b, i: (0, 0)),
                 pl.BlockSpec((1, hd), lambda b, i: (0, 0)),
                 pl.BlockSpec((hd, de), lambda b, i: (0, 0)),
                 pl.BlockSpec((1, de), lambda b, i: (0, 0))]
    args += [ep["w1a"], ep["w1xi"], ep["w1xj"], ep["b1"], ep["w2"], ep["b2"]]
    if fuse_out:
        wout, bout = out_proj
        in_specs += [pl.BlockSpec((de, cout), lambda b, i: (0, 0)),
                     pl.BlockSpec((1, cout), lambda b, i: (0, 0))]
        args += [wout, bout]

    a_out, msg = pl.pallas_call(
        functools.partial(_edge_layer_kernel, n=n, fuse_in=fuse_in,
                          fuse_out=fuse_out, bf16=bf16),
        out_shape=(jax.ShapeDtypeStruct((B, n * n, cout), EDGE_STORE_DTYPE),
                   jax.ShapeDtypeStruct((B, n, de), jnp.float32)),
        grid=(B, ni),
        in_specs=in_specs,
        out_specs=(pl.BlockSpec((1, ti * n, cout), lambda b, i: (b, i, 0)),
                   pl.BlockSpec((1, ti, de), lambda b, i: (b, i, 0))),
        compiler_params=pltpu.CompilerParams(
            dimension_semantics=("parallel", "parallel"),
            vmem_limit_bytes=min(int(budget * 0.85), 100 << 20)),
    )(*args)
    return a_out, msg


def pallas_node_qkv(x2, msg2, mask2, nparams, aparams, *, bf16=USE_BF16_MATMUL):
    """x2: [B*N, nhf], msg2: [B*N, de], mask2: [B*N, 1].
    Returns (X_new [B*N, nhf] f32, QKV [B*N, 3*nhf] f32)."""
    m, nhf = x2.shape
    de = msg2.shape[1]
    hd = nparams["w2"].shape[0]
    e3 = aparams["wqkv"].shape[1]
    tm, steps = _row_tiles(m)
    return pl.pallas_call(
        functools.partial(_node_qkv_kernel, bf16=bf16),
        out_shape=(jax.ShapeDtypeStruct((m, nhf), jnp.float32),
                   jax.ShapeDtypeStruct((m, e3), jnp.float32)),
        grid=(steps,),
        in_specs=[pl.BlockSpec((tm, nhf), lambda i: (i, 0)),
                  pl.BlockSpec((tm, de), lambda i: (i, 0)),
                  pl.BlockSpec((tm, 1), lambda i: (i, 0)),
                  pl.BlockSpec((nhf, hd), lambda i: (0, 0)),
                  pl.BlockSpec((de, hd), lambda i: (0, 0)),
                  pl.BlockSpec((1, hd), lambda i: (0, 0)),
                  pl.BlockSpec((hd, nhf), lambda i: (0, 0)),
                  pl.BlockSpec((1, nhf), lambda i: (0, 0)),
                  pl.BlockSpec((nhf, e3), lambda i: (0, 0)),
                  pl.BlockSpec((1, e3), lambda i: (0, 0))],
        out_specs=(pl.BlockSpec((tm, nhf), lambda i: (i, 0)),
                   pl.BlockSpec((tm, e3), lambda i: (i, 0))),
        compiler_params=_PAR1,
    )(x2, msg2, mask2, nparams["w1x"], nparams["w1m"], nparams["b1"],
      nparams["w2"], nparams["b2"], aparams["wqkv"], aparams["bqkv"])


def pallas_attention(q, k, v, keymask, *, bf16=USE_BF16_MATMUL):
    """q/k/v: [B, H, N, dh]; keymask: [B, 1, N] float. Returns ctx [B,H,N,dh]."""
    B, H, N, dh = q.shape
    return pl.pallas_call(
        functools.partial(_attn_kernel, scale=dh ** -0.5, bf16=bf16),
        out_shape=jax.ShapeDtypeStruct((B, H, N, dh), jnp.float32),
        grid=(B,),
        in_specs=[pl.BlockSpec((1, H, N, dh), lambda b: (b, 0, 0, 0)),
                  pl.BlockSpec((1, H, N, dh), lambda b: (b, 0, 0, 0)),
                  pl.BlockSpec((1, H, N, dh), lambda b: (b, 0, 0, 0)),
                  pl.BlockSpec((1, 1, N), lambda b: (b, 0, 0))],
        out_specs=pl.BlockSpec((1, H, N, dh), lambda b: (b, 0, 0, 0)),
        compiler_params=_PAR1,
    )(q, k, v, keymask)


def pallas_outproj_ln(x2, ctx2, aparams, gamma, beta, *, eps=1e-5,
                      bf16=USE_BF16_MATMUL):
    """y = LayerNorm(x + ctx @ Wo + bo).  x2/ctx2: [B*N, E]."""
    m, e = x2.shape
    tm, steps = _row_tiles(m)
    return pl.pallas_call(
        functools.partial(_outproj_ln_kernel, eps=eps, bf16=bf16),
        out_shape=jax.ShapeDtypeStruct((m, e), jnp.float32),
        grid=(steps,),
        in_specs=[pl.BlockSpec((tm, e), lambda i: (i, 0)),
                  pl.BlockSpec((tm, e), lambda i: (i, 0)),
                  pl.BlockSpec((e, e), lambda i: (0, 0)),
                  pl.BlockSpec((1, e), lambda i: (0, 0)),
                  pl.BlockSpec((1, e), lambda i: (0, 0)),
                  pl.BlockSpec((1, e), lambda i: (0, 0))],
        out_specs=pl.BlockSpec((tm, e), lambda i: (i, 0)),
        compiler_params=_PAR1,
    )(x2, ctx2, aparams["wo"], aparams["bo"], gamma, beta)


# ----------------------------------------------------------------------------
# Model forward (glue in plain JAX, hot paths in Pallas)
# ----------------------------------------------------------------------------
def dense_gnn_forward(params, X, A, mask):
    B, N, _ = X.shape
    # Structural sizes derived from (static) weight shapes — no ints in params.
    nhf = params["lin_in_x"][2].shape[1]
    de = params["lin_in_e"][0].shape[1]
    nh = NUM_HEADS
    dh = nhf // nh
    n_layers = len(params["layers"])

    maskf = mask.astype(jnp.float32)
    mask3 = maskf[:, :, None]                  # [B, N, 1]
    mask_rows = maskf.reshape(B * N, 1)        # [B*N, 1]
    keymask = maskf.reshape(B, 1, N)           # [B, 1, N]

    # linear_in_x : Linear -> ReLU -> Linear
    X = pallas_mlp2(X.reshape(B * N, -1), *params["lin_in_x"]).reshape(B, N, nhf)

    # Edge tensor kept flat [B, N*N, c]; linear_in_e fused into the first
    # edge layer, linear_out_e fused into the last one; bf16 storage between.
    A2 = A.reshape(B, N * N, A.shape[-1])

    for li, (lp, ap) in enumerate(zip(params["layers"], params["attn"])):
        fuse_in = (li == 0)
        fuse_out = (li == n_layers - 1)
        A2, msg = pallas_edge_layer(
            A2, X, mask3, lp["edge"], n=N, fuse_in=fuse_in, fuse_out=fuse_out,
            in_proj=params["lin_in_e"] if fuse_in else None,
            out_proj=params["lin_out_e"] if fuse_out else None)

        # node MLP + residual + mask gate, fused with the attention QKV proj
        Xn, qkv = pallas_node_qkv(X.reshape(B * N, nhf), msg.reshape(B * N, de),
                                  mask_rows, lp["node"], ap)

        # head split: cheap XLA transposes on the small X-path tensor
        qkv5 = qkv.reshape(B, N, 3, nh, dh)
        q = jnp.transpose(qkv5[:, :, 0], (0, 2, 1, 3))   # [B, H, N, dh]
        k = jnp.transpose(qkv5[:, :, 1], (0, 2, 1, 3))
        v = jnp.transpose(qkv5[:, :, 2], (0, 2, 1, 3))
        ctx = pallas_attention(q, k, v, keymask)          # [B, H, N, dh]
        ctx2 = jnp.transpose(ctx, (0, 2, 1, 3)).reshape(B * N, nhf)

        # output projection + residual + shared LayerNorm fused
        X = pallas_outproj_ln(Xn, ctx2, ap, params["node_norm_g"],
                              params["node_norm_b"]).reshape(B, N, nhf)

    X = pallas_mlp2(X.reshape(B * N, nhf), *params["lin_out_x"]).reshape(B, N, -1)

    # A2 already holds linear_out_e(A) (bf16).  Symmetrize the small nef_out
    # tensor in XLA (linear_out_e commutes with the average).
    # TODO(synk): fusing the symmetrization in-kernel needs a (j,i) block read
    #   plus a major-dim transpose whose Mosaic lowering is not guaranteed.
    Y = A2.reshape(B, N, N, -1)
    A_out = ((Y + jnp.transpose(Y, (0, 2, 1, 3))) * 0.5).astype(jnp.float32)
    return X, A_out


# ----------------------------------------------------------------------------
# Deterministic parameter construction (arrays only — jit-safe pytree)
# ----------------------------------------------------------------------------
def _init_linear(key, fan_in, fan_out):
    kw, kb = jax.random.split(key)
    w = jax.random.normal(kw, (fan_in, fan_out), jnp.float32) / math.sqrt(fan_in)
    b = jax.random.normal(kb, (1, fan_out), jnp.float32) * 0.01
    return w, b


def _init_mlp2(key, fan_in, hidden, fan_out):
    k1, k2 = jax.random.split(key)
    w1, b1 = _init_linear(k1, fan_in, hidden)
    w2, b2 = _init_linear(k2, hidden, fan_out)
    return (w1, b1, w2, b2)


def _init_edge_layer(key, de, nhf, hidden):
    ka, ki, kj, k2 = jax.random.split(key, 4)
    s = 1.0 / math.sqrt(de + 2 * nhf)
    w1a = jax.random.normal(ka, (de, hidden), jnp.float32) * s
    w1xi = jax.random.normal(ki, (nhf, hidden), jnp.float32) * s
    w1xj = jax.random.normal(kj, (nhf, hidden), jnp.float32) * s
    b1 = jnp.zeros((1, hidden), jnp.float32)
    w2, b2 = _init_linear(k2, hidden, de)
    return dict(w1a=w1a, w1xi=w1xi, w1xj=w1xj, b1=b1, w2=w2, b2=b2)


def _init_node_layer(key, nhf, de, hidden):
    kx, km, k2 = jax.random.split(key, 3)
    s = 1.0 / math.sqrt(nhf + de)
    w1x = jax.random.normal(kx, (nhf, hidden), jnp.float32) * s
    w1m = jax.random.normal(km, (de, hidden), jnp.float32) * s
    b1 = jnp.zeros((1, hidden), jnp.float32)
    w2, b2 = _init_linear(k2, hidden, nhf)
    return dict(w1x=w1x, w1m=w1m, b1=b1, w2=w2, b2=b2)


def _init_mha(key, e):
    kq, ko = jax.random.split(key)
    wqkv = jax.random.normal(kq, (e, 3 * e), jnp.float32) / math.sqrt(e)
    bqkv = jnp.zeros((1, 3 * e), jnp.float32)
    wo = jax.random.normal(ko, (e, e), jnp.float32) / math.sqrt(e)
    bo = jnp.zeros((1, e), jnp.float32)
    return dict(wqkv=wqkv, bqkv=bqkv, wo=wo, bo=bo)


def make_params(key, nnf_in, nef_in, nnf_out, nef_out, nhf, fact, n_layers,
                mlp_hidden):
    de = nhf // fact
    keys = jax.random.split(key, 4 + 3 * n_layers)
    params = {
        "lin_in_x": _init_mlp2(keys[0], nnf_in, nhf, nhf),
        "lin_out_x": _init_mlp2(keys[1], nhf, nhf, nnf_out),
        "lin_in_e": _init_linear(keys[2], nef_in, de),
        "lin_out_e": _init_linear(keys[3], de, nef_out),
        "node_norm_g": jnp.ones((1, nhf), jnp.float32),   # shared across layers,
        "node_norm_b": jnp.zeros((1, nhf), jnp.float32),  # as in the reference
        "layers": [],
        "attn": [],
    }
    for l in range(n_layers):
        ke, kn, ka = keys[4 + 3 * l], keys[5 + 3 * l], keys[6 + 3 * l]
        params["layers"].append({
            "edge": _init_edge_layer(ke, de, nhf, mlp_hidden),
            "node": _init_node_layer(kn, nhf, de, mlp_hidden),
        })
        params["attn"].append(_init_mha(ka, nhf))
    return params


# ----------------------------------------------------------------------------
if __name__ == "__main__":
    # sizes
    B, N = 2, 8
    nnf_in, nef_in = 16, 8
    nnf_out, nef_out = 16, 8
    nhf = 64
    fact = 2
    n_layers = 2
    mlp_hidden = nhf

    key = jax.random.PRNGKey(0)
    kp, kx, ka = jax.random.split(key, 3)
    params = make_params(kp, nnf_in, nef_in, nnf_out, nef_out, nhf, fact,
                         n_layers, mlp_hidden)

    X = jax.random.normal(kx, (B, N, nnf_in), jnp.float32)
    A = jax.random.normal(ka, (B, N, N, nef_in), jnp.float32)
    mask = jnp.array([[True] * N,
                      [True] * (N - 2) + [False] * 2])

    fwd = jax.jit(dense_gnn_forward)
    X_out, A_out = fwd(params, X, A, mask)
    jax.block_until_ready((X_out, A_out))

    assert X_out.shape == (B, N, nnf_out)
    assert A_out.shape == (B, N, N, nef_out)
    assert bool(jnp.all(jnp.isfinite(X_out))) and bool(jnp.all(jnp.isfinite(A_out)))
    # A is symmetrized over the two node axes
    assert bool(jnp.allclose(A_out, jnp.transpose(A_out, (0, 2, 1, 3)), atol=1e-5))
    print("KERNEL_OK")
</pallas_src>

<mosaic_0001>
module attributes {stable_mosaic.version = 11 : i64} {
  func.func @_mlp2_kernel(%arg0: i32, %arg1: memref<16x16xf32, #tpu.memory_space<vmem>>, %arg2: memref<16x64xf32, #tpu.memory_space<vmem>>, %arg3: memref<1x64xf32, #tpu.memory_space<vmem>>, %arg4: memref<64x64xf32, #tpu.memory_space<vmem>>, %arg5: memref<1x64xf32, #tpu.memory_space<vmem>>, %arg6: memref<16x64xf32, #tpu.memory_space<vmem>>) attributes {dimension_semantics = [#tpu.dimension_semantics<parallel>], iteration_bounds = array<i64: 1>, scalar_prefetch = 0 : i64, scratch_operands = 0 : i64, tpu.core_type = #tpu.core_type<tc>, window_params = [{transform_indices = @transform_0, window_bounds = array<i64: 16, 16>}, {pipeline_mode = #tpu.pipeline_mode<synchronous>, transform_indices = @transform_1, window_bounds = array<i64: 16, 64>}, {pipeline_mode = #tpu.pipeline_mode<synchronous>, transform_indices = @transform_2, window_bounds = array<i64: 1, 64>}, {pipeline_mode = #tpu.pipeline_mode<synchronous>, transform_indices = @transform_3, window_bounds = array<i64: 64, 64>}, {pipeline_mode = #tpu.pipeline_mode<synchronous>, transform_indices = @transform_4, window_bounds = array<i64: 1, 64>}, {transform_indices = @transform_5, window_bounds = array<i64: 16, 64>}]} {
    %c0 = arith.constant 0 : index
    %c0_0 = arith.constant 0 : index
    %0 = vector.load %arg1[%c0, %c0_0] : memref<16x16xf32, #tpu.memory_space<vmem>>, vector<16x16xf32>
    %1 = arith.truncf %0 : vector<16x16xf32> to vector<16x16xbf16>
    %c0_1 = arith.constant 0 : index
    %c0_2 = arith.constant 0 : index
    %2 = vector.load %arg2[%c0_1, %c0_2] : memref<16x64xf32, #tpu.memory_space<vmem>>, vector<16x64xf32>
    %3 = arith.truncf %2 : vector<16x64xf32> to vector<16x64xbf16>
    %cst = arith.constant dense<0.000000e+00> : vector<16x64xf32>
    %4 = tpu.matmul %1, %3, %cst {dimension_numbers = #tpu.dot_dimension_numbers<[1], [0], [0], [1], [0, 0, 1, 1], [], []>} : vector<16x16xbf16>, vector<16x64xbf16>, vector<16x64xf32> -> vector<16x64xf32>
    %c0_3 = arith.constant 0 : index
    %c0_4 = arith.constant 0 : index
    %5 = vector.load %arg3[%c0_3, %c0_4] : memref<1x64xf32, #tpu.memory_space<vmem>>, vector<1x64xf32>
    %6 = vector.broadcast %5 : vector<1x64xf32> to vector<16x64xf32>
    %7 = arith.addf %4, %6 : vector<16x64xf32>
    %cst_5 = arith.constant 0.000000e+00 : f32
    %8 = vector.broadcast %cst_5 : f32 to vector<16x64xf32>
    %9 = arith.maximumf %7, %8 : vector<16x64xf32>
    %10 = arith.truncf %9 : vector<16x64xf32> to vector<16x64xbf16>
    %c0_6 = arith.constant 0 : index
    %c0_7 = arith.constant 0 : index
    %11 = vector.load %arg4[%c0_6, %c0_7] : memref<64x64xf32, #tpu.memory_space<vmem>>, vector<64x64xf32>
    %12 = arith.truncf %11 : vector<64x64xf32> to vector<64x64xbf16>
    %cst_8 = arith.constant dense<0.000000e+00> : vector<16x64xf32>
    %13 = tpu.matmul %10, %12, %cst_8 {dimension_numbers = #tpu.dot_dimension_numbers<[1], [0], [0], [1], [0, 0, 1, 1], [], []>} : vector<16x64xbf16>, vector<64x64xbf16>, vector<16x64xf32> -> vector<16x64xf32>
    %c0_9 = arith.constant 0 : index
    %c0_10 = arith.constant 0 : index
    %14 = vector.load %arg5[%c0_9, %c0_10] : memref<1x64xf32, #tpu.memory_space<vmem>>, vector<1x64xf32>
    %15 = vector.broadcast %14 : vector<1x64xf32> to vector<16x64xf32>
    %16 = arith.addf %13, %15 : vector<16x64xf32>
    %c0_11 = arith.constant 0 : index
    %c0_12 = arith.constant 0 : index
    %17 = vector.load %arg6[%c0_11, %c0_12] : memref<16x64xf32, #tpu.memory_space<vmem>>, vector<16x64xf32>
    tpu.vector_store %arg6[%c0_11, %c0_12], %16 {strides = array<i32>} : memref<16x64xf32, #tpu.memory_space<vmem>>, vector<16x64xf32>,
    return
  }
  func.func @transform_0(%arg0: i32) -> (i32, i32) {
    %c0_i32 = arith.constant 0 : i32
    %c0_i32_0 = arith.constant 0 : i32
    return %arg0, %c0_i32 : i32, i32
  }
  func.func @transform_1(%arg0: i32) -> (i32, i32) {
    %c0_i32 = arith.constant 0 : i32
    %c0_i32_0 = arith.constant 0 : i32
    %c0_i32_1 = arith.constant 0 : i32
    return %c0_i32, %c0_i32_0 : i32, i32
  }
  func.func @transform_2(%arg0: i32) -> (i32, i32) {
    %c0_i32 = arith.constant 0 : i32
    %c0_i32_0 = arith.constant 0 : i32
    %c0_i32_1 = arith.constant 0 : i32
    return %c0_i32, %c0_i32_0 : i32, i32
  }
  func.func @transform_3(%arg0: i32) -> (i32, i32) {
    %c0_i32 = arith.constant 0 : i32
    %c0_i32_0 = arith.constant 0 : i32
    %c0_i32_1 = arith.constant 0 : i32
    return %c0_i32, %c0_i32_0 : i32, i32
  }
  func.func @transform_4(%arg0: i32) -> (i32, i32) {
    %c0_i32 = arith.constant 0 : i32
    %c0_i32_0 = arith.constant 0 : i32
    %c0_i32_1 = arith.constant 0 : i32
    return %c0_i32, %c0_i32_0 : i32, i32
  }
  func.func @transform_5(%arg0: i32) -> (i32, i32) {
    %c0_i32 = arith.constant 0 : i32
    %c0_i32_0 = arith.constant 0 : i32
    return %arg0, %c0_i32 : i32, i32
  }
}

module attributes {stable_mosaic.version = 11 : i64} {
  func.func @_node_qkv_kernel(%arg0: i32, %arg1: memref<16x64xf32, #tpu.memory_space<vmem>>, %arg2: memref<16x32xf32, #tpu.memory_space<vmem>>, %arg3: memref<16x1xf32, #tpu.memory_space<vmem>>, %arg4: memref<64x64xf32, #tpu.memory_space<vmem>>, %arg5: memref<32x64xf32, #tpu.memory_space<vmem>>, %arg6: memref<1x64xf32, #tpu.memory_space<vmem>>, %arg7: memref<64x64xf32, #tpu.memory_space<vmem>>, %arg8: memref<1x64xf32, #tpu.memory_space<vmem>>, %arg9: memref<64x192xf32, #tpu.memory_space<vmem>>, %arg10: memref<1x192xf32, #tpu.memory_space<vmem>>, %arg11: memref<16x64xf32, #tpu.memory_space<vmem>>, %arg12: memref<16x192xf32, #tpu.memory_space<vmem>>) attributes {dimension_semantics = [#tpu.dimension_semantics<parallel>], iteration_bounds = array<i64: 1>, scalar_prefetch = 0 : i64, scratch_operands = 0 : i64, tpu.core_type = #tpu.core_type<tc>, window_params = [{transform_indices = @transform_0, window_bounds = array<i64: 16, 64>}, {transform_indices = @transform_1, window_bounds = array<i64: 16, 32>}, {transform_indices = @transform_2, window_bounds = array<i64: 16, 1>}, {pipeline_mode = #tpu.pipeline_mode<synchronous>, transform_indices = @transform_3, window_bounds = array<i64: 64, 64>}, {pipeline_mode = #tpu.pipeline_mode<synchronous>, transform_indices = @transform_4, window_bounds = array<i64: 32, 64>}, {pipeline_mode = #tpu.pipeline_mode<synchronous>, transform_indices = @transform_5, window_bounds = array<i64: 1, 64>}, {pipeline_mode = #tpu.pipeline_mode<synchronous>, transform_indices = @transform_6, window_bounds = array<i64: 64, 64>}, {pipeline_mode = #tpu.pipeline_mode<synchronous>, transform_indices = @transform_7, window_bounds = array<i64: 1, 64>}, {pipeline_mode = #tpu.pipeline_mode<synchronous>, transform_indices = @transform_8, window_bounds = array<i64: 64, 192>}, {pipeline_mode = #tpu.pipeline_mode<synchronous>, transform_indices = @transform_9, window_bounds = array<i64: 1, 192>}, {transform_indices = @transform_10, window_bounds = array<i64: 16, 64>}, {transform_indices = @transform_11, window_bounds = array<i64: 16, 192>}]} {
    %c0 = arith.constant 0 : index
    %c0_0 = arith.constant 0 : index
    %0 = vector.load %arg1[%c0, %c0_0] : memref<16x64xf32, #tpu.memory_space<vmem>>, vector<16x64xf32>
    %1 = arith.truncf %0 : vector<16x64xf32> to vector<16x64xbf16>
    %c0_1 = arith.constant 0 : index
    %c0_2 = arith.constant 0 : index
    %2 = vector.load %arg4[%c0_1, %c0_2] : memref<64x64xf32, #tpu.memory_space<vmem>>, vector<64x64xf32>
    %3 = arith.truncf %2 : vector<64x64xf32> to vector<64x64xbf16>
    %cst = arith.constant dense<0.000000e+00> : vector<16x64xf32>
    %4 = tpu.matmul %1, %3, %cst {dimension_numbers = #tpu.dot_dimension_numbers<[1], [0], [0], [1], [0, 0, 1, 1], [], []>} : vector<16x64xbf16>, vector<64x64xbf16>, vector<16x64xf32> -> vector<16x64xf32>
    %c0_3 = arith.constant 0 : index
    %c0_4 = arith.constant 0 : index
    %5 = vector.load %arg2[%c0_3, %c0_4] : memref<16x32xf32, #tpu.memory_space<vmem>>, vector<16x32xf32>
    %6 = arith.truncf %5 : vector<16x32xf32> to vector<16x32xbf16>
    %c0_5 = arith.constant 0 : index
    %c0_6 = arith.constant 0 : index
    %7 = vector.load %arg5[%c0_5, %c0_6] : memref<32x64xf32, #tpu.memory_space<vmem>>, vector<32x64xf32>
    %8 = arith.truncf %7 : vector<32x64xf32> to vector<32x64xbf16>
    %cst_7 = arith.constant dense<0.000000e+00> : vector<16x64xf32>
    %9 = tpu.matmul %6, %8, %cst_7 {dimension_numbers = #tpu.dot_dimension_numbers<[1], [0], [0], [1], [0, 0, 1, 1], [], []>} : vector<16x32xbf16>, vector<32x64xbf16>, vector<16x64xf32> -> vector<16x64xf32>
    %10 = arith.addf %4, %9 : vector<16x64xf32>
    %c0_8 = arith.constant 0 : index
    %c0_9 = arith.constant 0 : index
    %11 = vector.load %arg6[%c0_8, %c0_9] : memref<1x64xf32, #tpu.memory_space<vmem>>, vector<1x64xf32>
    %12 = vector.broadcast %11 : vector<1x64xf32> to vector<16x64xf32>
    %13 = arith.addf %10, %12 : vector<16x64xf32>
    %cst_10 = arith.constant 0.000000e+00 : f32
    %14 = vector.broadcast %cst_10 : f32 to vector<16x64xf32>
    %15 = arith.maximumf %13, %14 : vector<16x64xf32>
    %16 = arith.truncf %15 : vector<16x64xf32> to vector<16x64xbf16>
    %c0_11 = arith.constant 0 : index
    %c0_12 = arith.constant 0 : index
    %17 = vector.load %arg7[%c0_11, %c0_12] : memref<64x64xf32, #tpu.memory_space<vmem>>, vector<64x64xf32>
    %18 = arith.truncf %17 : vector<64x64xf32> to vector<64x64xbf16>
    %cst_13 = arith.constant dense<0.000000e+00> : vector<16x64xf32>
    %19 = tpu.matmul %16, %18, %cst_13 {dimension_numbers = #tpu.dot_dimension_numbers<[1], [0], [0], [1], [0, 0, 1, 1], [], []>} : vector<16x64xbf16>, vector<64x64xbf16>, vector<16x64xf32> -> vector<16x64xf32>
    %c0_14 = arith.constant 0 : index
    %c0_15 = arith.constant 0 : index
    %20 = vector.load %arg8[%c0_14, %c0_15] : memref<1x64xf32, #tpu.memory_space<vmem>>, vector<1x64xf32>
    %21 = vector.broadcast %20 : vector<1x64xf32> to vector<16x64xf32>
    %22 = arith.addf %19, %21 : vector<16x64xf32>
    %c0_16 = arith.constant 0 : index
    %c0_17 = arith.constant 0 : index
    %23 = vector.load %arg3[%c0_16, %c0_17] : memref<16x1xf32, #tpu.memory_space<vmem>>, vector<16x1xf32>
    %24 = vector.broadcast %23 : vector<16x1xf32> to vector<16x64xf32>
    %25 = arith.mulf %22, %24 : vector<16x64xf32>
    %26 = arith.addf %0, %25 : vector<16x64xf32>
    %c0_18 = arith.constant 0 : index
    %c0_19 = arith.constant 0 : index
    %27 = vector.load %arg11[%c0_18, %c0_19] : memref<16x64xf32, #tpu.memory_space<vmem>>, vector<16x64xf32>
    tpu.vector_store %arg11[%c0_18, %c0_19], %26 {strides = array<i32>} : memref<16x64xf32, #tpu.memory_space<vmem>>, vector<16x64xf32>,
    %28 = arith.truncf %26 : vector<16x64xf32> to vector<16x64xbf16>
    %c0_20 = arith.constant 0 : index
    %c0_21 = arith.constant 0 : index
    %29 = vector.load %arg9[%c0_20, %c0_21] : memref<64x192xf32, #tpu.memory_space<vmem>>, vector<64x192xf32>
    %30 = arith.truncf %29 : vector<64x192xf32> to vector<64x192xbf16>
    %cst_22 = arith.constant dense<0.000000e+00> : vector<16x192xf32>
    %31 = tpu.matmul %28, %30, %cst_22 {dimension_numbers = #tpu.dot_dimension_numbers<[1], [0], [0], [1], [0, 0, 1, 1], [], []>} : vector<16x64xbf16>, vector<64x192xbf16>, vector<16x192xf32> -> vector<16x192xf32>
    %c0_23 = arith.constant 0 : index
    %c0_24 = arith.constant 0 : index
    %32 = vector.load %arg10[%c0_23, %c0_24] : memref<1x192xf32, #tpu.memory_space<vmem>>, vector<1x192xf32>
    %33 = vector.broadcast %32 : vector<1x192xf32> to vector<16x192xf32>
    %34 = arith.addf %31, %33 : vector<16x192xf32>
    %c0_25 = arith.constant 0 : index
    %c0_26 = arith.constant 0 : index
    %35 = vector.load %arg12[%c0_25, %c0_26] : memref<16x192xf32, #tpu.memory_space<vmem>>, vector<16x192xf32>
    tpu.vector_store %arg12[%c0_25, %c0_26], %34 {strides = array<i32>} : memref<16x192xf32, #tpu.memory_space<vmem>>, vector<16x192xf32>,
    return
  }
  func.func @transform_0(%arg0: i32) -> (i32, i32) {
    %c0_i32 = arith.constant 0 : i32
    %c0_i32_0 = arith.constant 0 : i32
    return %arg0, %c0_i32 : i32, i32
  }
  func.func @transform_1(%arg0: i32) -> (i32, i32) {
    %c0_i32 = arith.constant 0 : i32
    %c0_i32_0 = arith.constant 0 : i32
    return %arg0, %c0_i32 : i32, i32
  }
  func.func @transform_2(%arg0: i32) -> (i32, i32) {
    %c0_i32 = arith.constant 0 : i32
    %c0_i32_0 = arith.constant 0 : i32
    return %arg0, %c0_i32 : i32, i32
  }
  func.func @transform_3(%arg0: i32) -> (i32, i32) {
    %c0_i32 = arith.constant 0 : i32
    %c0_i32_0 = arith.constant 0 : i32
    %c0_i32_1 = arith.constant 0 : i32
    return %c0_i32, %c0_i32_0 : i32, i32
  }
  func.func @transform_4(%arg0: i32) -> (i32, i32) {
    %c0_i32 = arith.constant 0 : i32
    %c0_i32_0 = arith.constant 0 : i32
    %c0_i32_1 = arith.constant 0 : i32
    return %c0_i32, %c0_i32_0 : i32, i32
  }
  func.func @transform_5(%arg0: i32) -> (i32, i32) {
    %c0_i32 = arith.constant 0 : i32
    %c0_i32_0 = arith.constant 0 : i32
    %c0_i32_1 = arith.constant 0 : i32
    return %c0_i32, %c0_i32_0 : i32, i32
  }
  func.func @transform_6(%arg0: i32) -> (i32, i32) {
    %c0_i32 = arith.constant 0 : i32
    %c0_i32_0 = arith.constant 0 : i32
    %c0_i32_1 = arith.constant 0 : i32
    return %c0_i32, %c0_i32_0 : i32, i32
  }
  func.func @transform_7(%arg0: i32) -> (i32, i32) {
    %c0_i32 = arith.constant 0 : i32
    %c0_i32_0 = arith.constant 0 : i32
    %c0_i32_1 = arith.constant 0 : i32
    return %c0_i32, %c0_i32_0 : i32, i32
  }
  func.func @transform_8(%arg0: i32) -> (i32, i32) {
    %c0_i32 = arith.constant 0 : i32
    %c0_i32_0 = arith.constant 0 : i32
    %c0_i32_1 = arith.constant 0 : i32
    return %c0_i32, %c0_i32_0 : i32, i32
  }
  func.func @transform_9(%arg0: i32) -> (i32, i32) {
    %c0_i32 = arith.constant 0 : i32
    %c0_i32_0 = arith.constant 0 : i32
    %c0_i32_1 = arith.constant 0 : i32
    return %c0_i32, %c0_i32_0 : i32, i32
  }
  func.func @transform_10(%arg0: i32) -> (i32, i32) {
    %c0_i32 = arith.constant 0 : i32
    %c0_i32_0 = arith.constant 0 : i32
    return %arg0, %c0_i32 : i32, i32
  }
  func.func @transform_11(%arg0: i32) -> (i32, i32) {
    %c0_i32 = arith.constant 0 : i32
    %c0_i32_0 = arith.constant 0 : i32
    return %arg0, %c0_i32 : i32, i32
  }
}

module attributes {stable_mosaic.version = 11 : i64} {
  func.func @_edge_layer_kernel(%arg0: i32, %arg1: i32, %arg2: memref<1x64x8xf32, #tpu.memory_space<vmem>>, %arg3: memref<1x8x64xf32, #tpu.memory_space<vmem>>, %arg4: memref<1x8x64xf32, #tpu.memory_space<vmem>>, %arg5: memref<1x8x1xf32, #tpu.memory_space<vmem>>, %arg6: memref<1x8x1xf32, #tpu.memory_space<vmem>>, %arg7: memref<8x32xf32, #tpu.memory_space<vmem>>, %arg8: memref<1x32xf32, #tpu.memory_space<vmem>>, %arg9: memref<32x64xf32, #tpu.memory_space<vmem>>, %arg10: memref<64x64xf32, #tpu.memory_space<vmem>>, %arg11: memref<64x64xf32, #tpu.memory_space<vmem>>, %arg12: memref<1x64xf32, #tpu.memory_space<vmem>>, %arg13: memref<64x32xf32, #tpu.memory_space<vmem>>, %arg14: memref<1x32xf32, #tpu.memory_space<vmem>>, %arg15: memref<1x64x32xbf16, #tpu.memory_space<vmem>>, %arg16: memref<1x8x32xf32, #tpu.memory_space<vmem>>) attributes {dimension_semantics = [#tpu.dimension_semantics<parallel>, #tpu.dimension_semantics<parallel>], iteration_bounds = array<i64: 2, 1>, scalar_prefetch = 0 : i64, scratch_operands = 0 : i64, tpu.core_type = #tpu.core_type<tc>, window_params = [{transform_indices = @transform_0, window_bounds = array<i64: 1, 64, 8>}, {transform_indices = @transform_1, window_bounds = array<i64: 1, 8, 64>}, {transform_indices = @transform_2, window_bounds = array<i64: 1, 8, 64>}, {transform_indices = @transform_3, window_bounds = array<i64: 1, 8, 1>}, {transform_indices = @transform_4, window_bounds = array<i64: 1, 8, 1>}, {pipeline_mode = #tpu.pipeline_mode<synchronous>, transform_indices = @transform_5, window_bounds = array<i64: 8, 32>}, {pipeline_mode = #tpu.pipeline_mode<synchronous>, transform_indices = @transform_6, window_bounds = array<i64: 1, 32>}, {pipeline_mode = #tpu.pipeline_mode<synchronous>, transform_indices = @transform_7, window_bounds = array<i64: 32, 64>}, {pipeline_mode = #tpu.pipeline_mode<synchronous>, transform_indices = @transform_8, window_bounds = array<i64: 64, 64>}, {pipeline_mode = #tpu.pipeline_mode<synchronous>, transform_indices = @transform_9, window_bounds = array<i64: 64, 64>}, {pipeline_mode = #tpu.pipeline_mode<synchronous>, transform_indices = @transform_10, window_bounds = array<i64: 1, 64>}, {pipeline_mode = #tpu.pipeline_mode<synchronous>, transform_indices = @transform_11, window_bounds = array<i64: 64, 32>}, {pipeline_mode = #tpu.pipeline_mode<synchronous>, transform_indices = @transform_12, window_bounds = array<i64: 1, 32>}, {transform_indices = @transform_13, window_bounds = array<i64: 1, 64, 32>}, {transform_indices = @transform_14, window_bounds = array<i64: 1, 8, 32>}]} {
    %c0 = arith.constant 0 : index
    %c0_0 = arith.constant 0 : index
    %c0_1 = arith.constant 0 : index
    %0 = vector.load %arg2[%c0, %c0_0, %c0_1] : memref<1x64x8xf32, #tpu.memory_space<vmem>>, vector<1x64x8xf32>
    %1 = vector.shape_cast %0 : vector<1x64x8xf32> to vector<64x8xf32>
    %2 = arith.truncf %1 : vector<64x8xf32> to vector<64x8xbf16>
    %c0_2 = arith.constant 0 : index
    %c0_3 = arith.constant 0 : index
    %3 = vector.load %arg7[%c0_2, %c0_3] : memref<8x32xf32, #tpu.memory_space<vmem>>, vector<8x32xf32>
    %4 = arith.truncf %3 : vector<8x32xf32> to vector<8x32xbf16>
    %cst = arith.constant dense<0.000000e+00> : vector<64x32xf32>
    %5 = tpu.matmul %2, %4, %cst {dimension_numbers = #tpu.dot_dimension_numbers<[1], [0], [0], [1], [0, 0, 1, 1], [], []>} : vector<64x8xbf16>, vector<8x32xbf16>, vector<64x32xf32> -> vector<64x32xf32>
    %c0_4 = arith.constant 0 : index
    %c0_5 = arith.constant 0 : index
    %6 = vector.load %arg8[%c0_4, %c0_5] : memref<1x32xf32, #tpu.memory_space<vmem>>, vector<1x32xf32>
    %7 = vector.broadcast %6 : vector<1x32xf32> to vector<64x32xf32>
    %8 = arith.addf %5, %7 : vector<64x32xf32>
    %c0_6 = arith.constant 0 : index
    %c0_7 = arith.constant 0 : index
    %c0_8 = arith.constant 0 : index
    %9 = vector.load %arg3[%c0_6, %c0_7, %c0_8] : memref<1x8x64xf32, #tpu.memory_space<vmem>>, vector<1x8x64xf32>
    %10 = vector.shape_cast %9 : vector<1x8x64xf32> to vector<8x64xf32>
    %c0_9 = arith.constant 0 : index
    %c0_10 = arith.constant 0 : index
    %c0_11 = arith.constant 0 : index
    %11 = vector.load %arg4[%c0_9, %c0_10, %c0_11] : memref<1x8x64xf32, #tpu.memory_space<vmem>>, vector<1x8x64xf32>
    %12 = vector.shape_cast %11 : vector<1x8x64xf32> to vector<8x64xf32>
    %13 = arith.truncf %8 : vector<64x32xf32> to vector<64x32xbf16>
    %c0_12 = arith.constant 0 : index
    %c0_13 = arith.constant 0 : index
    %14 = vector.load %arg9[%c0_12, %c0_13] : memref<32x64xf32, #tpu.memory_space<vmem>>, vector<32x64xf32>
    %15 = arith.truncf %14 : vector<32x64xf32> to vector<32x64xbf16>
    %cst_14 = arith.constant dense<0.000000e+00> : vector<64x64xf32>
    %16 = tpu.matmul %13, %15, %cst_14 {dimension_numbers = #tpu.dot_dimension_numbers<[1], [0], [0], [1], [0, 0, 1, 1], [], []>} : vector<64x32xbf16>, vector<32x64xbf16>, vector<64x64xf32> -> vector<64x64xf32>
    %17 = arith.truncf %10 : vector<8x64xf32> to vector<8x64xbf16>
    %c0_15 = arith.constant 0 : index
    %c0_16 = arith.constant 0 : index
    %18 = vector.load %arg10[%c0_15, %c0_16] : memref<64x64xf32, #tpu.memory_space<vmem>>, vector<64x64xf32>
    %19 = arith.truncf %18 : vector<64x64xf32> to vector<64x64xbf16>
    %cst_17 = arith.constant dense<0.000000e+00> : vector<8x64xf32>
    %20 = tpu.matmul %17, %19, %cst_17 {dimension_numbers = #tpu.dot_dimension_numbers<[1], [0], [0], [1], [0, 0, 1, 1], [], []>} : vector<8x64xbf16>, vector<64x64xbf16>, vector<8x64xf32> -> vector<8x64xf32>
    %21 = arith.truncf %12 : vector<8x64xf32> to vector<8x64xbf16>
    %c0_18 = arith.constant 0 : index
    %c0_19 = arith.constant 0 : index
    %22 = vector.load %arg11[%c0_18, %c0_19] : memref<64x64xf32, #tpu.memory_space<vmem>>, vector<64x64xf32>
    %23 = arith.truncf %22 : vector<64x64xf32> to vector<64x64xbf16>
    %cst_20 = arith.constant dense<0.000000e+00> : vector<8x64xf32>
    %24 = tpu.matmul %21, %23, %cst_20 {dimension_numbers = #tpu.dot_dimension_numbers<[1], [0], [0], [1], [0, 0, 1, 1], [], []>} : vector<8x64xbf16>, vector<64x64xbf16>, vector<8x64xf32> -> vector<8x64xf32>
    %25 = vector.shape_cast %16 : vector<64x64xf32> to vector<8x8x64xf32>
    %26 = vector.shape_cast %20 : vector<8x64xf32> to vector<8x1x64xf32>
    %27 = vector.broadcast %26 : vector<8x1x64xf32> to vector<8x8x64xf32>
    %28 = arith.addf %25, %27 : vector<8x8x64xf32>
    %29 = vector.shape_cast %24 : vector<8x64xf32> to vector<1x8x64xf32>
    %30 = vector.broadcast %29 : vector<1x8x64xf32> to vector<8x8x64xf32>
    %31 = arith.addf %28, %30 : vector<8x8x64xf32>
    %c0_21 = arith.constant 0 : index
    %c0_22 = arith.constant 0 : index
    %32 = vector.load %arg12[%c0_21, %c0_22] : memref<1x64xf32, #tpu.memory_space<vmem>>, vector<1x64xf32>
    %33 = vector.shape_cast %32 : vector<1x64xf32> to vector<1x1x64xf32>
    %34 = vector.broadcast %33 : vector<1x1x64xf32> to vector<8x8x64xf32>
    %35 = arith.addf %31, %34 : vector<8x8x64xf32>
    %cst_23 = arith.constant 0.000000e+00 : f32
    %36 = vector.broadcast %cst_23 : f32 to vector<8x8x64xf32>
    %37 = arith.maximumf %35, %36 : vector<8x8x64xf32>
    %38 = vector.shape_cast %37 : vector<8x8x64xf32> to vector<64x64xf32>
    %39 = arith.truncf %38 : vector<64x64xf32> to vector<64x64xbf16>
    %c0_24 = arith.constant 0 : index
    %c0_25 = arith.constant 0 : index
    %40 = vector.load %arg13[%c0_24, %c0_25] : memref<64x32xf32, #tpu.memory_space<vmem>>, vector<64x32xf32>
    %41 = arith.truncf %40 : vector<64x32xf32> to vector<64x32xbf16>
    %cst_26 = arith.constant dense<0.000000e+00> : vector<64x32xf32>
    %42 = tpu.matmul %39, %41, %cst_26 {dimension_numbers = #tpu.dot_dimension_numbers<[1], [0], [0], [1], [0, 0, 1, 1], [], []>} : vector<64x64xbf16>, vector<64x32xbf16>, vector<64x32xf32> -> vector<64x32xf32>
    %c0_27 = arith.constant 0 : index
    %c0_28 = arith.constant 0 : index
    %43 = vector.load %arg14[%c0_27, %c0_28] : memref<1x32xf32, #tpu.memory_space<vmem>>, vector<1x32xf32>
    %44 = vector.broadcast %43 : vector<1x32xf32> to vector<64x32xf32>
    %45 = arith.addf %42, %44 : vector<64x32xf32>
    %46 = vector.shape_cast %45 : vector<64x32xf32> to vector<8x8x32xf32>
    %c0_29 = arith.constant 0 : index
    %c0_30 = arith.constant 0 : index
    %c0_31 = arith.constant 0 : index
    %47 = vector.load %arg5[%c0_29, %c0_30, %c0_31] : memref<1x8x1xf32, #tpu.memory_space<vmem>>, vector<1x8x1xf32>
    %48 = vector.shape_cast %47 : vector<1x8x1xf32> to vector<8x1xf32>
    %49 = vector.shape_cast %48 : vector<8x1xf32> to vector<8x1x1xf32>
    %c0_32 = arith.constant 0 : index
    %c0_33 = arith.constant 0 : index
    %c0_34 = arith.constant 0 : index
    %50 = vector.load %arg6[%c0_32, %c0_33, %c0_34] : memref<1x8x1xf32, #tpu.memory_space<vmem>>, vector<1x8x1xf32>
    %51 = vector.shape_cast %50 : vector<1x8x1xf32> to vector<8x1xf32>
    %52 = vector.shape_cast %51 : vector<8x1xf32> to vector<1x8x1xf32>
    %53 = vector.broadcast %49 : vector<8x1x1xf32> to vector<8x8x1xf32>
    %54 = vector.broadcast %52 : vector<1x8x1xf32> to vector<8x8x1xf32>
    %55 = arith.mulf %53, %54 : vector<8x8x1xf32>
    %56 = vector.broadcast %55 : vector<8x8x1xf32> to vector<8x8x32xf32>
    %57 = arith.mulf %46, %56 : vector<8x8x32xf32>
    %cst_35 = arith.constant dense<0.000000e+00> : vector<8x32xf32>
    %58 = vector.multi_reduction <add>, %57, %cst_35 [1] : vector<8x8x32xf32> to vector<8x32xf32>
    %c0_36 = arith.constant 0 : index
    %c0_37 = arith.constant 0 : index
    %c0_38 = arith.constant 0 : index
    %59 = vector.load %arg16[%c0_36, %c0_37, %c0_38] : memref<1x8x32xf32, #tpu.memory_space<vmem>>, vector<1x8x32xf32>
    %60 = vector.shape_cast %59 : vector<1x8x32xf32> to vector<8x32xf32>
    %61 = vector.shape_cast %58 : vector<8x32xf32> to vector<1x8x32xf32>
    tpu.vector_store %arg16[%c0_36, %c0_37, %c0_38], %61 {strides = array<i32>} : memref<1x8x32xf32, #tpu.memory_space<vmem>>, vector<1x8x32xf32>,
    %62 = vector.shape_cast %57 : vector<8x8x32xf32> to vector<64x32xf32>
    %63 = arith.addf %8, %62 : vector<64x32xf32>
    %64 = arith.truncf %63 : vector<64x32xf32> to vector<64x32xbf16>
    %c0_39 = arith.constant 0 : index
    %c0_40 = arith.constant 0 : index
    %c0_41 = arith.constant 0 : index
    %65 = vector.load %arg15[%c0_39, %c0_40, %c0_41] : memref<1x64x32xbf16, #tpu.memory_space<vmem>>, vector<1x64x32xbf16>
    %66 = vector.shape_cast %65 : vector<1x64x32xbf16> to vector<64x32xbf16>
    %67 = vector.shape_cast %64 : vector<64x32xbf16> to vector<1x64x32xbf16>
    tpu.vector_store %arg15[%c0_39, %c0_40, %c0_41], %67 {strides = array<i32>} : memref<1x64x32xbf16, #tpu.memory_space<vmem>>, vector<1x64x32xbf16>,
    return
  }
  func.func @transform_0(%arg0: i32, %arg1: i32) -> (i32, i32, i32) {
    %c0_i32 = arith.constant 0 : i32
    %c0_i32_0 = arith.constant 0 : i32
    return %arg0, %arg1, %c0_i32 : i32, i32, i32
  }
  func.func @transform_1(%arg0: i32, %arg1: i32) -> (i32, i32, i32) {
    %c0_i32 = arith.constant 0 : i32
    %c0_i32_0 = arith.constant 0 : i32
    return %arg0, %arg1, %c0_i32 : i32, i32, i32
  }
  func.func @transform_2(%arg0: i32, %arg1: i32) -> (i32, i32, i32) {
    %c0_i32 = arith.constant 0 : i32
    %c0_i32_0 = arith.constant 0 : i32
    %c0_i32_1 = arith.constant 0 : i32
    return %arg0, %c0_i32, %c0_i32_0 : i32, i32, i32
  }
  func.func @transform_3(%arg0: i32, %arg1: i32) -> (i32, i32, i32) {
    %c0_i32 = arith.constant 0 : i32
    %c0_i32_0 = arith.constant 0 : i32
    return %arg0, %arg1, %c0_i32 : i32, i32, i32
  }
  func.func @transform_4(%arg0: i32, %arg1: i32) -> (i32, i32, i32) {
    %c0_i32 = arith.constant 0 : i32
    %c0_i32_0 = arith.constant 0 : i32
    %c0_i32_1 = arith.constant 0 : i32
    return %arg0, %c0_i32, %c0_i32_0 : i32, i32, i32
  }
  func.func @transform_5(%arg0: i32, %arg1: i32) -> (i32, i32) {
    %c0_i32 = arith.constant 0 : i32
    %c0_i32_0 = arith.constant 0 : i32
    %c0_i32_1 = arith.constant 0 : i32
    return %c0_i32, %c0_i32_0 : i32, i32
  }
  func.func @transform_6(%arg0: i32, %arg1: i32) -> (i32, i32) {
    %c0_i32 = arith.constant 0 : i32
    %c0_i32_0 = arith.constant 0 : i32
    %c0_i32_1 = arith.constant 0 : i32
    return %c0_i32, %c0_i32_0 : i32, i32
  }
  func.func @transform_7(%arg0: i32, %arg1: i32) -> (i32, i32) {
    %c0_i32 = arith.constant 0 : i32
    %c0_i32_0 = arith.constant 0 : i32
    %c0_i32_1 = arith.constant 0 : i32
    return %c0_i32, %c0_i32_0 : i32, i32
  }
  func.func @transform_8(%arg0: i32, %arg1: i32) -> (i32, i32) {
    %c0_i32 = arith.constant 0 : i32
    %c0_i32_0 = arith.constant 0 : i32
    %c0_i32_1 = arith.constant 0 : i32
    return %c0_i32, %c0_i32_0 : i32, i32
  }
  func.func @transform_9(%arg0: i32, %arg1: i32) -> (i32, i32) {
    %c0_i32 = arith.constant 0 : i32
    %c0_i32_0 = arith.constant 0 : i32
    %c0_i32_1 = arith.constant 0 : i32
    return %c0_i32, %c0_i32_0 : i32, i32
  }
  func.func @transform_10(%arg0: i32, %arg1: i32) -> (i32, i32) {
    %c0_i32 = arith.constant 0 : i32
    %c0_i32_0 = arith.constant 0 : i32
    %c0_i32_1 = arith.constant 0 : i32
    return %c0_i32, %c0_i32_0 : i32, i32
  }
  func.func @transform_11(%arg0: i32, %arg1: i32) -> (i32, i32) {
    %c0_i32 = arith.constant 0 : i32
    %c0_i32_0 = arith.constant 0 : i32
    %c0_i32_1 = arith.constant 0 : i32
    return %c0_i32, %c0_i32_0 : i32, i32
  }
  func.func @transform_12(%arg0: i32, %arg1: i32) -> (i32, i32) {
    %c0_i32 = arith.constant 0 : i32
    %c0_i32_0 = arith.constant 0 : i32
    %c0_i32_1 = arith.constant 0 : i32
    return %c0_i32, %c0_i32_0 : i32, i32
  }
  func.func @transform_13(%arg0: i32, %arg1: i32) -> (i32, i32, i32) {
    %c0_i32 = arith.constant 0 : i32
    %c0_i32_0 = arith.constant 0 : i32
    return %arg0, %arg1, %c0_i32 : i32, i32, i32
  }
  func.func @transform_14(%arg0: i32, %arg1: i32) -> (i32, i32, i32) {
    %c0_i32 = arith.constant 0 : i32
    %c0_i32_0 = arith.constant 0 : i32
    return %arg0, %arg1, %c0_i32 : i32, i32, i32
  }
}

module attributes {stable_mosaic.version = 11 : i64} {
  func.func @_attn_kernel(%arg0: i32, %arg1: memref<1x16x8x4xf32, #tpu.memory_space<vmem>>, %arg2: memref<1x16x8x4xf32, #tpu.memory_space<vmem>>, %arg3: memref<1x16x8x4xf32, #tpu.memory_space<vmem>>, %arg4: memref<1x1x8xf32, #tpu.memory_space<vmem>>, %arg5: memref<1x16x8x4xf32, #tpu.memory_space<vmem>>) attributes {dimension_semantics = [#tpu.dimension_semantics<parallel>], iteration_bounds = array<i64: 2>, scalar_prefetch = 0 : i64, scratch_operands = 0 : i64, tpu.core_type = #tpu.core_type<tc>, window_params = [{transform_indices = @transform_0, window_bounds = array<i64: 1, 16, 8, 4>}, {transform_indices = @transform_1, window_bounds = array<i64: 1, 16, 8, 4>}, {transform_indices = @transform_2, window_bounds = array<i64: 1, 16, 8, 4>}, {transform_indices = @transform_3, window_bounds = array<i64: 1, 1, 8>}, {transform_indices = @transform_4, window_bounds = array<i64: 1, 16, 8, 4>}]} {
    %c0 = arith.constant 0 : index
    %c0_0 = arith.constant 0 : index
    %c0_1 = arith.constant 0 : index
    %c0_2 = arith.constant 0 : index
    %0 = vector.load %arg1[%c0, %c0_0, %c0_1, %c0_2] : memref<1x16x8x4xf32, #tpu.memory_space<vmem>>, vector<1x16x8x4xf32>
    %1 = vector.shape_cast %0 : vector<1x16x8x4xf32> to vector<16x8x4xf32>
    %2 = arith.truncf %1 : vector<16x8x4xf32> to vector<16x8x4xbf16>
    %c0_3 = arith.constant 0 : index
    %c0_4 = arith.constant 0 : index
    %c0_5 = arith.constant 0 : index
    %c0_6 = arith.constant 0 : index
    %3 = vector.load %arg2[%c0_3, %c0_4, %c0_5, %c0_6] : memref<1x16x8x4xf32, #tpu.memory_space<vmem>>, vector<1x16x8x4xf32>
    %4 = vector.shape_cast %3 : vector<1x16x8x4xf32> to vector<16x8x4xf32>
    %5 = arith.truncf %4 : vector<16x8x4xf32> to vector<16x8x4xbf16>
    %c0_7 = arith.constant 0 : index
    %c0_8 = arith.constant 0 : index
    %c0_9 = arith.constant 0 : index
    %c0_10 = arith.constant 0 : index
    %6 = vector.load %arg3[%c0_7, %c0_8, %c0_9, %c0_10] : memref<1x16x8x4xf32, #tpu.memory_space<vmem>>, vector<1x16x8x4xf32>
    %7 = vector.shape_cast %6 : vector<1x16x8x4xf32> to vector<16x8x4xf32>
    %8 = arith.truncf %7 : vector<16x8x4xf32> to vector<16x8x4xbf16>
    %c0_11 = arith.constant 0 : index
    %c0_12 = arith.constant 0 : index
    %c0_13 = arith.constant 0 : index
    %9 = vector.load %arg4[%c0_11, %c0_12, %c0_13] : memref<1x1x8xf32, #tpu.memory_space<vmem>>, vector<1x1x8xf32>
    %10 = vector.shape_cast %9 : vector<1x1x8xf32> to vector<1x8xf32>
    "tpu.trace_start"() <{level = 10 : i32, message = "hqd,hkd->hqk"}> : () -> ()
    %cst = arith.constant dense<0.000000e+00> : vector<16x8x8xf32>
    %11 = tpu.matmul %2, %5, %cst {dimension_numbers = #tpu.dot_dimension_numbers<[2], [2], [1], [1], [0, 0, 0, 1, 1, 1], [0], [0]>} : vector<16x8x4xbf16>, vector<16x8x4xbf16>, vector<16x8x8xf32> -> vector<16x8x8xf32>
    "tpu.trace_stop"() : () -> ()
    %cst_14 = arith.constant 5.000000e-01 : f32
    %12 = vector.broadcast %cst_14 : f32 to vector<16x8x8xf32>
    %13 = arith.mulf %11, %12 : vector<16x8x8xf32>
    %14 = vector.shape_cast %10 : vector<1x8xf32> to vector<1x1x8xf32>
    %cst_15 = arith.constant 5.000000e-01 : f32
    %15 = vector.broadcast %cst_15 : f32 to vector<1x1x8xf32>
    %16 = arith.cmpf ogt, %14, %15 : vector<1x1x8xf32>
    %cst_16 = arith.constant -1.000000e+30 : f32
    %17 = vector.shape_cast %16 : vector<1x1x8xi1> to vector<1x1x8xi1>
    %18 = vector.broadcast %17 : vector<1x1x8xi1> to vector<16x8x8xi1>
    %19 = vector.broadcast %cst_16 : f32 to vector<16x8x8xf32>
    %20 = arith.select %18, %13, %19 : vector<16x8x8xi1>, vector<16x8x8xf32>
    %cst_17 = arith.constant dense<0xFF800000> : vector<16x8xf32>
    %21 = vector.multi_reduction <maximumf>, %20, %cst_17 [2] : vector<16x8x8xf32> to vector<16x8xf32>
    %22 = vector.shape_cast %21 : vector<16x8xf32> to vector<16x8x1xf32>
    %23 = vector.broadcast %22 : vector<16x8x1xf32> to vector<16x8x8xf32>
    %24 = arith.subf %20, %23 : vector<16x8x8xf32>
    %25 = math.exp %24 : vector<16x8x8xf32>
    %cst_18 = arith.constant dense<0.000000e+00> : vector<16x8xf32>
    %26 = vector.multi_reduction <add>, %25, %cst_18 [2] : vector<16x8x8xf32> to vector<16x8xf32>
    %27 = vector.shape_cast %26 : vector<16x8xf32> to vector<16x8x1xf32>
    %28 = tpu.reciprocal %27 {approx = true} : vector<16x8x1xf32> -> vector<16x8x1xf32>
    %29 = vector.broadcast %28 : vector<16x8x1xf32> to vector<16x8x8xf32>
    %30 = arith.mulf %25, %29 : vector<16x8x8xf32>
    %31 = arith.truncf %30 : vector<16x8x8xf32> to vector<16x8x8xbf16>
    "tpu.trace_start"() <{level = 10 : i32, message = "hqk,hkd->hqd"}> : () -> ()
    %cst_19 = arith.constant dense<0.000000e+00> : vector<16x8x4xf32>
    %32 = tpu.matmul %31, %8, %cst_19 {dimension_numbers = #tpu.dot_dimension_numbers<[2], [1], [1], [2], [0, 0, 0, 1, 1, 2], [0], [0]>} : vector<16x8x8xbf16>, vector<16x8x4xbf16>, vector<16x8x4xf32> -> vector<16x8x4xf32>
    "tpu.trace_stop"() : () -> ()
    %c0_20 = arith.constant 0 : index
    %c0_21 = arith.constant 0 : index
    %c0_22 = arith.constant 0 : index
    %c0_23 = arith.constant 0 : index
    %33 = vector.load %arg5[%c0_20, %c0_21, %c0_22, %c0_23] : memref<1x16x8x4xf32, #tpu.memory_space<vmem>>, vector<1x16x8x4xf32>
    %34 = vector.shape_cast %33 : vector<1x16x8x4xf32> to vector<16x8x4xf32>
    %35 = vector.shape_cast %32 : vector<16x8x4xf32> to vector<1x16x8x4xf32>
    tpu.vector_store %arg5[%c0_20, %c0_21, %c0_22, %c0_23], %35 {strides = array<i32>} : memref<1x16x8x4xf32, #tpu.memory_space<vmem>>, vector<1x16x8x4xf32>,
    return
  }
  func.func @transform_0(%arg0: i32) -> (i32, i32, i32, i32) {
    %c0_i32 = arith.constant 0 : i32
    %c0_i32_0 = arith.constant 0 : i32
    %c0_i32_1 = arith.constant 0 : i32
    %c0_i32_2 = arith.constant 0 : i32
    return %arg0, %c0_i32, %c0_i32_0, %c0_i32_1 : i32, i32, i32, i32
  }
  func.func @transform_1(%arg0: i32) -> (i32, i32, i32, i32) {
    %c0_i32 = arith.constant 0 : i32
    %c0_i32_0 = arith.constant 0 : i32
    %c0_i32_1 = arith.constant 0 : i32
    %c0_i32_2 = arith.constant 0 : i32
    return %arg0, %c0_i32, %c0_i32_0, %c0_i32_1 : i32, i32, i32, i32
  }
  func.func @transform_2(%arg0: i32) -> (i32, i32, i32, i32) {
    %c0_i32 = arith.constant 0 : i32
    %c0_i32_0 = arith.constant 0 : i32
    %c0_i32_1 = arith.constant 0 : i32
    %c0_i32_2 = arith.constant 0 : i32
    return %arg0, %c0_i32, %c0_i32_0, %c0_i32_1 : i32, i32, i32, i32
  }
  func.func @transform_3(%arg0: i32) -> (i32, i32, i32) {
    %c0_i32 = arith.constant 0 : i32
    %c0_i32_0 = arith.constant 0 : i32
    %c0_i32_1 = arith.constant 0 : i32
    return %arg0, %c0_i32, %c0_i32_0 : i32, i32, i32
  }
  func.func @transform_4(%arg0: i32) -> (i32, i32, i32, i32) {
    %c0_i32 = arith.constant 0 : i32
    %c0_i32_0 = arith.constant 0 : i32
    %c0_i32_1 = arith.constant 0 : i32
    %c0_i32_2 = arith.constant 0 : i32
    return %arg0, %c0_i32, %c0_i32_0, %c0_i32_1 : i32, i32, i32, i32
  }
}

module attributes {stable_mosaic.version = 11 : i64} {
  func.func @_outproj_ln_kernel(%arg0: i32, %arg1: memref<16x64xf32, #tpu.memory_space<vmem>>, %arg2: memref<16x64xf32, #tpu.memory_space<vmem>>, %arg3: memref<64x64xf32, #tpu.memory_space<vmem>>, %arg4: memref<1x64xf32, #tpu.memory_space<vmem>>, %arg5: memref<1x64xf32, #tpu.memory_space<vmem>>, %arg6: memref<1x64xf32, #tpu.memory_space<vmem>>, %arg7: memref<16x64xf32, #tpu.memory_space<vmem>>) attributes {dimension_semantics = [#tpu.dimension_semantics<parallel>], iteration_bounds = array<i64: 1>, scalar_prefetch = 0 : i64, scratch_operands = 0 : i64, tpu.core_type = #tpu.core_type<tc>, window_params = [{transform_indices = @transform_0, window_bounds = array<i64: 16, 64>}, {transform_indices = @transform_1, window_bounds = array<i64: 16, 64>}, {pipeline_mode = #tpu.pipeline_mode<synchronous>, transform_indices = @transform_2, window_bounds = array<i64: 64, 64>}, {pipeline_mode = #tpu.pipeline_mode<synchronous>, transform_indices = @transform_3, window_bounds = array<i64: 1, 64>}, {pipeline_mode = #tpu.pipeline_mode<synchronous>, transform_indices = @transform_4, window_bounds = array<i64: 1, 64>}, {pipeline_mode = #tpu.pipeline_mode<synchronous>, transform_indices = @transform_5, window_bounds = array<i64: 1, 64>}, {transform_indices = @transform_6, window_bounds = array<i64: 16, 64>}]} {
    %c0 = arith.constant 0 : index
    %c0_0 = arith.constant 0 : index
    %0 = vector.load %arg2[%c0, %c0_0] : memref<16x64xf32, #tpu.memory_space<vmem>>, vector<16x64xf32>
    %1 = arith.truncf %0 : vector<16x64xf32> to vector<16x64xbf16>
    %c0_1 = arith.constant 0 : index
    %c0_2 = arith.constant 0 : index
    %2 = vector.load %arg3[%c0_1, %c0_2] : memref<64x64xf32, #tpu.memory_space<vmem>>, vector<64x64xf32>
    %3 = arith.truncf %2 : vector<64x64xf32> to vector<64x64xbf16>
    %cst = arith.constant dense<0.000000e+00> : vector<16x64xf32>
    %4 = tpu.matmul %1, %3, %cst {dimension_numbers = #tpu.dot_dimension_numbers<[1], [0], [0], [1], [0, 0, 1, 1], [], []>} : vector<16x64xbf16>, vector<64x64xbf16>, vector<16x64xf32> -> vector<16x64xf32>
    %c0_3 = arith.constant 0 : index
    %c0_4 = arith.constant 0 : index
    %5 = vector.load %arg4[%c0_3, %c0_4] : memref<1x64xf32, #tpu.memory_space<vmem>>, vector<1x64xf32>
    %6 = vector.broadcast %5 : vector<1x64xf32> to vector<16x64xf32>
    %7 = arith.addf %4, %6 : vector<16x64xf32>
    %c0_5 = arith.constant 0 : index
    %c0_6 = arith.constant 0 : index
    %8 = vector.load %arg1[%c0_5, %c0_6] : memref<16x64xf32, #tpu.memory_space<vmem>>, vector<16x64xf32>
    %9 = arith.addf %8, %7 : vector<16x64xf32>
    %cst_7 = arith.constant dense<0.000000e+00> : vector<16xf32>
    %10 = vector.multi_reduction <add>, %9, %cst_7 [1] : vector<16x64xf32> to vector<16xf32>
    %11 = vector.shape_cast %10 : vector<16xf32> to vector<16x1xf32>
    %cst_8 = arith.constant 6.400000e+01 : f32
    %12 = vector.broadcast %cst_8 : f32 to vector<16x1xf32>
    %13 = arith.divf %11, %12 : vector<16x1xf32>
    %14 = vector.broadcast %13 : vector<16x1xf32> to vector<16x64xf32>
    %15 = arith.subf %9, %14 : vector<16x64xf32>
    %16 = arith.mulf %15, %15 : vector<16x64xf32>
    %cst_9 = arith.constant dense<0.000000e+00> : vector<16xf32>
    %17 = vector.multi_reduction <add>, %16, %cst_9 [1] : vector<16x64xf32> to vector<16xf32>
    %18 = vector.shape_cast %17 : vector<16xf32> to vector<16x1xf32>
    %cst_10 = arith.constant 6.400000e+01 : f32
    %19 = vector.broadcast %cst_10 : f32 to vector<16x1xf32>
    %20 = arith.divf %18, %19 : vector<16x1xf32>
    %21 = vector.broadcast %13 : vector<16x1xf32> to vector<16x64xf32>
    %22 = arith.subf %9, %21 : vector<16x64xf32>
    %cst_11 = arith.constant 9.99999974E-6 : f32
    %23 = vector.broadcast %cst_11 : f32 to vector<16x1xf32>
    %24 = arith.addf %20, %23 : vector<16x1xf32>
    %25 = math.rsqrt %24 : vector<16x1xf32>
    %26 = vector.broadcast %25 : vector<16x1xf32> to vector<16x64xf32>
    %27 = arith.mulf %22, %26 : vector<16x64xf32>
    %c0_12 = arith.constant 0 : index
    %c0_13 = arith.constant 0 : index
    %28 = vector.load %arg5[%c0_12, %c0_13] : memref<1x64xf32, #tpu.memory_space<vmem>>, vector<1x64xf32>
    %29 = vector.broadcast %28 : vector<1x64xf32> to vector<16x64xf32>
    %30 = arith.mulf %27, %29 : vector<16x64xf32>
    %c0_14 = arith.constant 0 : index
    %c0_15 = arith.constant 0 : index
    %31 = vector.load %arg6[%c0_14, %c0_15] : memref<1x64xf32, #tpu.memory_space<vmem>>, vector<1x64xf32>
    %32 = vector.broadcast %31 : vector<1x64xf32> to vector<16x64xf32>
    %33 = arith.addf %30, %32 : vector<16x64xf32>
    %c0_16 = arith.constant 0 : index
    %c0_17 = arith.constant 0 : index
    %34 = vector.load %arg7[%c0_16, %c0_17] : memref<16x64xf32, #tpu.memory_space<vmem>>, vector<16x64xf32>
    tpu.vector_store %arg7[%c0_16, %c0_17], %33 {strides = array<i32>} : memref<16x64xf32, #tpu.memory_space<vmem>>, vector<16x64xf32>,
    return
  }
  func.func @transform_0(%arg0: i32) -> (i32, i32) {
    %c0_i32 = arith.constant 0 : i32
    %c0_i32_0 = arith.constant 0 : i32
    return %arg0, %c0_i32 : i32, i32
  }
  func.func @transform_1(%arg0: i32) -> (i32, i32) {
    %c0_i32 = arith.constant 0 : i32
    %c0_i32_0 = arith.constant 0 : i32
    return %arg0, %c0_i32 : i32, i32
  }
  func.func @transform_2(%arg0: i32) -> (i32, i32) {
    %c0_i32 = arith.constant 0 : i32
    %c0_i32_0 = arith.constant 0 : i32
    %c0_i32_1 = arith.constant 0 : i32
    return %c0_i32, %c0_i32_0 : i32, i32
  }
  func.func @transform_3(%arg0: i32) -> (i32, i32) {
    %c0_i32 = arith.constant 0 : i32
    %c0_i32_0 = arith.constant 0 : i32
    %c0_i32_1 = arith.constant 0 : i32
    return %c0_i32, %c0_i32_0 : i32, i32
  }
  func.func @transform_4(%arg0: i32) -> (i32, i32) {
    %c0_i32 = arith.constant 0 : i32
    %c0_i32_0 = arith.constant 0 : i32
    %c0_i32_1 = arith.constant 0 : i32
    return %c0_i32, %c0_i32_0 : i32, i32
  }
  func.func @transform_5(%arg0: i32) -> (i32, i32) {
    %c0_i32 = arith.constant 0 : i32
    %c0_i32_0 = arith.constant 0 : i32
    %c0_i32_1 = arith.constant 0 : i32
    return %c0_i32, %c0_i32_0 : i32, i32
  }
  func.func @transform_6(%arg0: i32) -> (i32, i32) {
    %c0_i32 = arith.constant 0 : i32
    %c0_i32_0 = arith.constant 0 : i32
    return %arg0, %c0_i32 : i32, i32
  }
}

module attributes {stable_mosaic.version = 11 : i64} {
  func.func @_mlp2_kernel(%arg0: i32, %arg1: memref<16x64xf32, #tpu.memory_space<vmem>>, %arg2: memref<64x64xf32, #tpu.memory_space<vmem>>, %arg3: memref<1x64xf32, #tpu.memory_space<vmem>>, %arg4: memref<64x16xf32, #tpu.memory_space<vmem>>, %arg5: memref<1x16xf32, #tpu.memory_space<vmem>>, %arg6: memref<16x16xf32, #tpu.memory_space<vmem>>) attributes {dimension_semantics = [#tpu.dimension_semantics<parallel>], iteration_bounds = array<i64: 1>, scalar_prefetch = 0 : i64, scratch_operands = 0 : i64, tpu.core_type = #tpu.core_type<tc>, window_params = [{transform_indices = @transform_0, window_bounds = array<i64: 16, 64>}, {pipeline_mode = #tpu.pipeline_mode<synchronous>, transform_indices = @transform_1, window_bounds = array<i64: 64, 64>}, {pipeline_mode = #tpu.pipeline_mode<synchronous>, transform_indices = @transform_2, window_bounds = array<i64: 1, 64>}, {pipeline_mode = #tpu.pipeline_mode<synchronous>, transform_indices = @transform_3, window_bounds = array<i64: 64, 16>}, {pipeline_mode = #tpu.pipeline_mode<synchronous>, transform_indices = @transform_4, window_bounds = array<i64: 1, 16>}, {transform_indices = @transform_5, window_bounds = array<i64: 16, 16>}]} {
    %c0 = arith.constant 0 : index
    %c0_0 = arith.constant 0 : index
    %0 = vector.load %arg1[%c0, %c0_0] : memref<16x64xf32, #tpu.memory_space<vmem>>, vector<16x64xf32>
    %1 = arith.truncf %0 : vector<16x64xf32> to vector<16x64xbf16>
    %c0_1 = arith.constant 0 : index
    %c0_2 = arith.constant 0 : index
    %2 = vector.load %arg2[%c0_1, %c0_2] : memref<64x64xf32, #tpu.memory_space<vmem>>, vector<64x64xf32>
    %3 = arith.truncf %2 : vector<64x64xf32> to vector<64x64xbf16>
    %cst = arith.constant dense<0.000000e+00> : vector<16x64xf32>
    %4 = tpu.matmul %1, %3, %cst {dimension_numbers = #tpu.dot_dimension_numbers<[1], [0], [0], [1], [0, 0, 1, 1], [], []>} : vector<16x64xbf16>, vector<64x64xbf16>, vector<16x64xf32> -> vector<16x64xf32>
    %c0_3 = arith.constant 0 : index
    %c0_4 = arith.constant 0 : index
    %5 = vector.load %arg3[%c0_3, %c0_4] : memref<1x64xf32, #tpu.memory_space<vmem>>, vector<1x64xf32>
    %6 = vector.broadcast %5 : vector<1x64xf32> to vector<16x64xf32>
    %7 = arith.addf %4, %6 : vector<16x64xf32>
    %cst_5 = arith.constant 0.000000e+00 : f32
    %8 = vector.broadcast %cst_5 : f32 to vector<16x64xf32>
    %9 = arith.maximumf %7, %8 : vector<16x64xf32>
    %10 = arith.truncf %9 : vector<16x64xf32> to vector<16x64xbf16>
    %c0_6 = arith.constant 0 : index
    %c0_7 = arith.constant 0 : index
    %11 = vector.load %arg4[%c0_6, %c0_7] : memref<64x16xf32, #tpu.memory_space<vmem>>, vector<64x16xf32>
    %12 = arith.truncf %11 : vector<64x16xf32> to vector<64x16xbf16>
    %cst_8 = arith.constant dense<0.000000e+00> : vector<16x16xf32>
    %13 = tpu.matmul %10, %12, %cst_8 {dimension_numbers = #tpu.dot_dimension_numbers<[1], [0], [0], [1], [0, 0, 1, 1], [], []>} : vector<16x64xbf16>, vector<64x16xbf16>, vector<16x16xf32> -> vector<16x16xf32>
    %c0_9 = arith.constant 0 : index
    %c0_10 = arith.constant 0 : index
    %14 = vector.load %arg5[%c0_9, %c0_10] : memref<1x16xf32, #tpu.memory_space<vmem>>, vector<1x16xf32>
    %15 = vector.broadcast %14 : vector<1x16xf32> to vector<16x16xf32>
    %16 = arith.addf %13, %15 : vector<16x16xf32>
    %c0_11 = arith.constant 0 : index
    %c0_12 = arith.constant 0 : index
    %17 = vector.load %arg6[%c0_11, %c0_12] : memref<16x16xf32, #tpu.memory_space<vmem>>, vector<16x16xf32>
    tpu.vector_store %arg6[%c0_11, %c0_12], %16 {strides = array<i32>} : memref<16x16xf32, #tpu.memory_space<vmem>>, vector<16x16xf32>,
    return
  }
  func.func @transform_0(%arg0: i32) -> (i32, i32) {
    %c0_i32 = arith.constant 0 : i32
    %c0_i32_0 = arith.constant 0 : i32
    return %arg0, %c0_i32 : i32, i32
  }
  func.func @transform_1(%arg0: i32) -> (i32, i32) {
    %c0_i32 = arith.constant 0 : i32
    %c0_i32_0 = arith.constant 0 : i32
    %c0_i32_1 = arith.constant 0 : i32
    return %c0_i32, %c0_i32_0 : i32, i32
  }
  func.func @transform_2(%arg0: i32) -> (i32, i32) {
    %c0_i32 = arith.constant 0 : i32
    %c0_i32_0 = arith.constant 0 : i32
    %c0_i32_1 = arith.constant 0 : i32
    return %c0_i32, %c0_i32_0 : i32, i32
  }
  func.func @transform_3(%arg0: i32) -> (i32, i32) {
    %c0_i32 = arith.constant 0 : i32
    %c0_i32_0 = arith.constant 0 : i32
    %c0_i32_1 = arith.constant 0 : i32
    return %c0_i32, %c0_i32_0 : i32, i32
  }
  func.func @transform_4(%arg0: i32) -> (i32, i32) {
    %c0_i32 = arith.constant 0 : i32
    %c0_i32_0 = arith.constant 0 : i32
    %c0_i32_1 = arith.constant 0 : i32
    return %c0_i32, %c0_i32_0 : i32, i32
  }
  func.func @transform_5(%arg0: i32) -> (i32, i32) {
    %c0_i32 = arith.constant 0 : i32
    %c0_i32_0 = arith.constant 0 : i32
    return %arg0, %c0_i32 : i32, i32
  }
}

module attributes {stable_mosaic.version = 11 : i64} {
  func.func @_edge_layer_kernel(%arg0: i32, %arg1: i32, %arg2: memref<1x64x32xbf16, #tpu.memory_space<vmem>>, %arg3: memref<1x8x64xf32, #tpu.memory_space<vmem>>, %arg4: memref<1x8x64xf32, #tpu.memory_space<vmem>>, %arg5: memref<1x8x1xf32, #tpu.memory_space<vmem>>, %arg6: memref<1x8x1xf32, #tpu.memory_space<vmem>>, %arg7: memref<32x64xf32, #tpu.memory_space<vmem>>, %arg8: memref<64x64xf32, #tpu.memory_space<vmem>>, %arg9: memref<64x64xf32, #tpu.memory_space<vmem>>, %arg10: memref<1x64xf32, #tpu.memory_space<vmem>>, %arg11: memref<64x32xf32, #tpu.memory_space<vmem>>, %arg12: memref<1x32xf32, #tpu.memory_space<vmem>>, %arg13: memref<32x8xf32, #tpu.memory_space<vmem>>, %arg14: memref<1x8xf32, #tpu.memory_space<vmem>>, %arg15: memref<1x64x8xbf16, #tpu.memory_space<vmem>>, %arg16: memref<1x8x32xf32, #tpu.memory_space<vmem>>) attributes {dimension_semantics = [#tpu.dimension_semantics<parallel>, #tpu.dimension_semantics<parallel>], iteration_bounds = array<i64: 2, 1>, scalar_prefetch = 0 : i64, scratch_operands = 0 : i64, tpu.core_type = #tpu.core_type<tc>, window_params = [{transform_indices = @transform_0, window_bounds = array<i64: 1, 64, 32>}, {transform_indices = @transform_1, window_bounds = array<i64: 1, 8, 64>}, {transform_indices = @transform_2, window_bounds = array<i64: 1, 8, 64>}, {transform_indices = @transform_3, window_bounds = array<i64: 1, 8, 1>}, {transform_indices = @transform_4, window_bounds = array<i64: 1, 8, 1>}, {pipeline_mode = #tpu.pipeline_mode<synchronous>, transform_indices = @transform_5, window_bounds = array<i64: 32, 64>}, {pipeline_mode = #tpu.pipeline_mode<synchronous>, transform_indices = @transform_6, window_bounds = array<i64: 64, 64>}, {pipeline_mode = #tpu.pipeline_mode<synchronous>, transform_indices = @transform_7, window_bounds = array<i64: 64, 64>}, {pipeline_mode = #tpu.pipeline_mode<synchronous>, transform_indices = @transform_8, window_bounds = array<i64: 1, 64>}, {pipeline_mode = #tpu.pipeline_mode<synchronous>, transform_indices = @transform_9, window_bounds = array<i64: 64, 32>}, {pipeline_mode = #tpu.pipeline_mode<synchronous>, transform_indices = @transform_10, window_bounds = array<i64: 1, 32>}, {pipeline_mode = #tpu.pipeline_mode<synchronous>, transform_indices = @transform_11, window_bounds = array<i64: 32, 8>}, {pipeline_mode = #tpu.pipeline_mode<synchronous>, transform_indices = @transform_12, window_bounds = array<i64: 1, 8>}, {transform_indices = @transform_13, window_bounds = array<i64: 1, 64, 8>}, {transform_indices = @transform_14, window_bounds = array<i64: 1, 8, 32>}]} {
    %c0 = arith.constant 0 : index
    %c0_0 = arith.constant 0 : index
    %c0_1 = arith.constant 0 : index
    %0 = vector.load %arg2[%c0, %c0_0, %c0_1] : memref<1x64x32xbf16, #tpu.memory_space<vmem>>, vector<1x64x32xbf16>
    %1 = vector.shape_cast %0 : vector<1x64x32xbf16> to vector<64x32xbf16>
    %2 = arith.extf %1 : vector<64x32xbf16> to vector<64x32xf32>
    %c0_2 = arith.constant 0 : index
    %c0_3 = arith.constant 0 : index
    %c0_4 = arith.constant 0 : index
    %3 = vector.load %arg3[%c0_2, %c0_3, %c0_4] : memref<1x8x64xf32, #tpu.memory_space<vmem>>, vector<1x8x64xf32>
    %4 = vector.shape_cast %3 : vector<1x8x64xf32> to vector<8x64xf32>
    %c0_5 = arith.constant 0 : index
    %c0_6 = arith.constant 0 : index
    %c0_7 = arith.constant 0 : index
    %5 = vector.load %arg4[%c0_5, %c0_6, %c0_7] : memref<1x8x64xf32, #tpu.memory_space<vmem>>, vector<1x8x64xf32>
    %6 = vector.shape_cast %5 : vector<1x8x64xf32> to vector<8x64xf32>
    %7 = arith.truncf %2 : vector<64x32xf32> to vector<64x32xbf16>
    %c0_8 = arith.constant 0 : index
    %c0_9 = arith.constant 0 : index
    %8 = vector.load %arg7[%c0_8, %c0_9] : memref<32x64xf32, #tpu.memory_space<vmem>>, vector<32x64xf32>
    %9 = arith.truncf %8 : vector<32x64xf32> to vector<32x64xbf16>
    %cst = arith.constant dense<0.000000e+00> : vector<64x64xf32>
    %10 = tpu.matmul %7, %9, %cst {dimension_numbers = #tpu.dot_dimension_numbers<[1], [0], [0], [1], [0, 0, 1, 1], [], []>} : vector<64x32xbf16>, vector<32x64xbf16>, vector<64x64xf32> -> vector<64x64xf32>
    %11 = arith.truncf %4 : vector<8x64xf32> to vector<8x64xbf16>
    %c0_10 = arith.constant 0 : index
    %c0_11 = arith.constant 0 : index
    %12 = vector.load %arg8[%c0_10, %c0_11] : memref<64x64xf32, #tpu.memory_space<vmem>>, vector<64x64xf32>
    %13 = arith.truncf %12 : vector<64x64xf32> to vector<64x64xbf16>
    %cst_12 = arith.constant dense<0.000000e+00> : vector<8x64xf32>
    %14 = tpu.matmul %11, %13, %cst_12 {dimension_numbers = #tpu.dot_dimension_numbers<[1], [0], [0], [1], [0, 0, 1, 1], [], []>} : vector<8x64xbf16>, vector<64x64xbf16>, vector<8x64xf32> -> vector<8x64xf32>
    %15 = arith.truncf %6 : vector<8x64xf32> to vector<8x64xbf16>
    %c0_13 = arith.constant 0 : index
    %c0_14 = arith.constant 0 : index
    %16 = vector.load %arg9[%c0_13, %c0_14] : memref<64x64xf32, #tpu.memory_space<vmem>>, vector<64x64xf32>
    %17 = arith.truncf %16 : vector<64x64xf32> to vector<64x64xbf16>
    %cst_15 = arith.constant dense<0.000000e+00> : vector<8x64xf32>
    %18 = tpu.matmul %15, %17, %cst_15 {dimension_numbers = #tpu.dot_dimension_numbers<[1], [0], [0], [1], [0, 0, 1, 1], [], []>} : vector<8x64xbf16>, vector<64x64xbf16>, vector<8x64xf32> -> vector<8x64xf32>
    %19 = vector.shape_cast %10 : vector<64x64xf32> to vector<8x8x64xf32>
    %20 = vector.shape_cast %14 : vector<8x64xf32> to vector<8x1x64xf32>
    %21 = vector.broadcast %20 : vector<8x1x64xf32> to vector<8x8x64xf32>
    %22 = arith.addf %19, %21 : vector<8x8x64xf32>
    %23 = vector.shape_cast %18 : vector<8x64xf32> to vector<1x8x64xf32>
    %24 = vector.broadcast %23 : vector<1x8x64xf32> to vector<8x8x64xf32>
    %25 = arith.addf %22, %24 : vector<8x8x64xf32>
    %c0_16 = arith.constant 0 : index
    %c0_17 = arith.constant 0 : index
    %26 = vector.load %arg10[%c0_16, %c0_17] : memref<1x64xf32, #tpu.memory_space<vmem>>, vector<1x64xf32>
    %27 = vector.shape_cast %26 : vector<1x64xf32> to vector<1x1x64xf32>
    %28 = vector.broadcast %27 : vector<1x1x64xf32> to vector<8x8x64xf32>
    %29 = arith.addf %25, %28 : vector<8x8x64xf32>
    %cst_18 = arith.constant 0.000000e+00 : f32
    %30 = vector.broadcast %cst_18 : f32 to vector<8x8x64xf32>
    %31 = arith.maximumf %29, %30 : vector<8x8x64xf32>
    %32 = vector.shape_cast %31 : vector<8x8x64xf32> to vector<64x64xf32>
    %33 = arith.truncf %32 : vector<64x64xf32> to vector<64x64xbf16>
    %c0_19 = arith.constant 0 : index
    %c0_20 = arith.constant 0 : index
    %34 = vector.load %arg11[%c0_19, %c0_20] : memref<64x32xf32, #tpu.memory_space<vmem>>, vector<64x32xf32>
    %35 = arith.truncf %34 : vector<64x32xf32> to vector<64x32xbf16>
    %cst_21 = arith.constant dense<0.000000e+00> : vector<64x32xf32>
    %36 = tpu.matmul %33, %35, %cst_21 {dimension_numbers = #tpu.dot_dimension_numbers<[1], [0], [0], [1], [0, 0, 1, 1], [], []>} : vector<64x64xbf16>, vector<64x32xbf16>, vector<64x32xf32> -> vector<64x32xf32>
    %c0_22 = arith.constant 0 : index
    %c0_23 = arith.constant 0 : index
    %37 = vector.load %arg12[%c0_22, %c0_23] : memref<1x32xf32, #tpu.memory_space<vmem>>, vector<1x32xf32>
    %38 = vector.broadcast %37 : vector<1x32xf32> to vector<64x32xf32>
    %39 = arith.addf %36, %38 : vector<64x32xf32>
    %40 = vector.shape_cast %39 : vector<64x32xf32> to vector<8x8x32xf32>
    %c0_24 = arith.constant 0 : index
    %c0_25 = arith.constant 0 : index
    %c0_26 = arith.constant 0 : index
    %41 = vector.load %arg5[%c0_24, %c0_25, %c0_26] : memref<1x8x1xf32, #tpu.memory_space<vmem>>, vector<1x8x1xf32>
    %42 = vector.shape_cast %41 : vector<1x8x1xf32> to vector<8x1xf32>
    %43 = vector.shape_cast %42 : vector<8x1xf32> to vector<8x1x1xf32>
    %c0_27 = arith.constant 0 : index
    %c0_28 = arith.constant 0 : index
    %c0_29 = arith.constant 0 : index
    %44 = vector.load %arg6[%c0_27, %c0_28, %c0_29] : memref<1x8x1xf32, #tpu.memory_space<vmem>>, vector<1x8x1xf32>
    %45 = vector.shape_cast %44 : vector<1x8x1xf32> to vector<8x1xf32>
    %46 = vector.shape_cast %45 : vector<8x1xf32> to vector<1x8x1xf32>
    %47 = vector.broadcast %43 : vector<8x1x1xf32> to vector<8x8x1xf32>
    %48 = vector.broadcast %46 : vector<1x8x1xf32> to vector<8x8x1xf32>
    %49 = arith.mulf %47, %48 : vector<8x8x1xf32>
    %50 = vector.broadcast %49 : vector<8x8x1xf32> to vector<8x8x32xf32>
    %51 = arith.mulf %40, %50 : vector<8x8x32xf32>
    %cst_30 = arith.constant dense<0.000000e+00> : vector<8x32xf32>
    %52 = vector.multi_reduction <add>, %51, %cst_30 [1] : vector<8x8x32xf32> to vector<8x32xf32>
    %c0_31 = arith.constant 0 : index
    %c0_32 = arith.constant 0 : index
    %c0_33 = arith.constant 0 : index
    %53 = vector.load %arg16[%c0_31, %c0_32, %c0_33] : memref<1x8x32xf32, #tpu.memory_space<vmem>>, vector<1x8x32xf32>
    %54 = vector.shape_cast %53 : vector<1x8x32xf32> to vector<8x32xf32>
    %55 = vector.shape_cast %52 : vector<8x32xf32> to vector<1x8x32xf32>
    tpu.vector_store %arg16[%c0_31, %c0_32, %c0_33], %55 {strides = array<i32>} : memref<1x8x32xf32, #tpu.memory_space<vmem>>, vector<1x8x32xf32>,
    %56 = vector.shape_cast %51 : vector<8x8x32xf32> to vector<64x32xf32>
    %57 = arith.addf %2, %56 : vector<64x32xf32>
    %58 = arith.truncf %57 : vector<64x32xf32> to vector<64x32xbf16>
    %c0_34 = arith.constant 0 : index
    %c0_35 = arith.constant 0 : index
    %59 = vector.load %arg13[%c0_34, %c0_35] : memref<32x8xf32, #tpu.memory_space<vmem>>, vector<32x8xf32>
    %60 = arith.truncf %59 : vector<32x8xf32> to vector<32x8xbf16>
    %cst_36 = arith.constant dense<0.000000e+00> : vector<64x8xf32>
    %61 = tpu.matmul %58, %60, %cst_36 {dimension_numbers = #tpu.dot_dimension_numbers<[1], [0], [0], [1], [0, 0, 1, 1], [], []>} : vector<64x32xbf16>, vector<32x8xbf16>, vector<64x8xf32> -> vector<64x8xf32>
    %c0_37 = arith.constant 0 : index
    %c0_38 = arith.constant 0 : index
    %62 = vector.load %arg14[%c0_37, %c0_38] : memref<1x8xf32, #tpu.memory_space<vmem>>, vector<1x8xf32>
    %63 = vector.broadcast %62 : vector<1x8xf32> to vector<64x8xf32>
    %64 = arith.addf %61, %63 : vector<64x8xf32>
    %65 = arith.truncf %64 : vector<64x8xf32> to vector<64x8xbf16>
    %c0_39 = arith.constant 0 : index
    %c0_40 = arith.constant 0 : index
    %c0_41 = arith.constant 0 : index
    %66 = vector.load %arg15[%c0_39, %c0_40, %c0_41] : memref<1x64x8xbf16, #tpu.memory_space<vmem>>, vector<1x64x8xbf16>
    %67 = vector.shape_cast %66 : vector<1x64x8xbf16> to vector<64x8xbf16>
    %68 = vector.shape_cast %65 : vector<64x8xbf16> to vector<1x64x8xbf16>
    tpu.vector_store %arg15[%c0_39, %c0_40, %c0_41], %68 {strides = array<i32>} : memref<1x64x8xbf16, #tpu.memory_space<vmem>>, vector<1x64x8xbf16>,
    return
  }
  func.func @transform_0(%arg0: i32, %arg1: i32) -> (i32, i32, i32) {
    %c0_i32 = arith.constant 0 : i32
    %c0_i32_0 = arith.constant 0 : i32
    return %arg0, %arg1, %c0_i32 : i32, i32, i32
  }
  func.func @transform_1(%arg0: i32, %arg1: i32) -> (i32, i32, i32) {
    %c0_i32 = arith.constant 0 : i32
    %c0_i32_0 = arith.constant 0 : i32
    return %arg0, %arg1, %c0_i32 : i32, i32, i32
  }
  func.func @transform_2(%arg0: i32, %arg1: i32) -> (i32, i32, i32) {
    %c0_i32 = arith.constant 0 : i32
    %c0_i32_0 = arith.constant 0 : i32
    %c0_i32_1 = arith.constant 0 : i32
    return %arg0, %c0_i32, %c0_i32_0 : i32, i32, i32
  }
  func.func @transform_3(%arg0: i32, %arg1: i32) -> (i32, i32, i32) {
    %c0_i32 = arith.constant 0 : i32
    %c0_i32_0 = arith.constant 0 : i32
    return %arg0, %arg1, %c0_i32 : i32, i32, i32
  }
  func.func @transform_4(%arg0: i32, %arg1: i32) -> (i32, i32, i32) {
    %c0_i32 = arith.constant 0 : i32
    %c0_i32_0 = arith.constant 0 : i32
    %c0_i32_1 = arith.constant 0 : i32
    return %arg0, %c0_i32, %c0_i32_0 : i32, i32, i32
  }
  func.func @transform_5(%arg0: i32, %arg1: i32) -> (i32, i32) {
    %c0_i32 = arith.constant 0 : i32
    %c0_i32_0 = arith.constant 0 : i32
    %c0_i32_1 = arith.constant 0 : i32
    return %c0_i32, %c0_i32_0 : i32, i32
  }
  func.func @transform_6(%arg0: i32, %arg1: i32) -> (i32, i32) {
    %c0_i32 = arith.constant 0 : i32
    %c0_i32_0 = arith.constant 0 : i32
    %c0_i32_1 = arith.constant 0 : i32
    return %c0_i32, %c0_i32_0 : i32, i32
  }
  func.func @transform_7(%arg0: i32, %arg1: i32) -> (i32, i32) {
    %c0_i32 = arith.constant 0 : i32
    %c0_i32_0 = arith.constant 0 : i32
    %c0_i32_1 = arith.constant 0 : i32
    return %c0_i32, %c0_i32_0 : i32, i32
  }
  func.func @transform_8(%arg0: i32, %arg1: i32) -> (i32, i32) {
    %c0_i32 = arith.constant 0 : i32
    %c0_i32_0 = arith.constant 0 : i32
    %c0_i32_1 = arith.constant 0 : i32
    return %c0_i32, %c0_i32_0 : i32, i32
  }
  func.func @transform_9(%arg0: i32, %arg1: i32) -> (i32, i32) {
    %c0_i32 = arith.constant 0 : i32
    %c0_i32_0 = arith.constant 0 : i32
    %c0_i32_1 = arith.constant 0 : i32
    return %c0_i32, %c0_i32_0 : i32, i32
  }
  func.func @transform_10(%arg0: i32, %arg1: i32) -> (i32, i32) {
    %c0_i32 = arith.constant 0 : i32
    %c0_i32_0 = arith.constant 0 : i32
    %c0_i32_1 = arith.constant 0 : i32
    return %c0_i32, %c0_i32_0 : i32, i32
  }
  func.func @transform_11(%arg0: i32, %arg1: i32) -> (i32, i32) {
    %c0_i32 = arith.constant 0 : i32
    %c0_i32_0 = arith.constant 0 : i32
    %c0_i32_1 = arith.constant 0 : i32
    return %c0_i32, %c0_i32_0 : i32, i32
  }
  func.func @transform_12(%arg0: i32, %arg1: i32) -> (i32, i32) {
    %c0_i32 = arith.constant 0 : i32
    %c0_i32_0 = arith.constant 0 : i32
    %c0_i32_1 = arith.constant 0 : i32
    return %c0_i32, %c0_i32_0 : i32, i32
  }
  func.func @transform_13(%arg0: i32, %arg1: i32) -> (i32, i32, i32) {
    %c0_i32 = arith.constant 0 : i32
    %c0_i32_0 = arith.constant 0 : i32
    return %arg0, %arg1, %c0_i32 : i32, i32, i32
  }
  func.func @transform_14(%arg0: i32, %arg1: i32) -> (i32, i32, i32) {
    %c0_i32 = arith.constant 0 : i32
    %c0_i32_0 = arith.constant 0 : i32
    return %arg0, %arg1, %c0_i32 : i32, i32, i32
  }
}

</mosaic_0001>

<bundles_post_ra>
// kernel: dense_gnn_forward.10
= control target key start
LH: loop header
LB: loop body
LE: loop exit
PB: predicated region body
PF: predicated region fallthrough
CT: control target
= control target key end

     0   :  { %10 = vsyncpa [#allocation3], 0  ;;  %s340_s0 = inlined_call_operand.vmem [shape: f32[16,16], index: 0, kind: input, shape index: {}]   ;;  %s341_s1 = inlined_call_operand.hbm [shape: f32[16,64], index: 1, kind: input, shape index: {}]   ;;  %s342_s2 = inlined_call_operand.vmem [shape: f32[1,64], index: 2, kind: input, shape index: {}]   ;;  %s343_s3 = inlined_call_operand.vmem [shape: f32[64,64], index: 3, kind: input, shape index: {}]   ;;  %s344_s4 = inlined_call_operand.hbm [shape: f32[1,64], index: 4, kind: input, shape index: {}]   ;;  %s345_s5 = inlined_call_operand.vmem [shape: f32[16,64], index: 5, kind: output, shape index: {}]  }
   0x1   :  { %11 = vsyncpa [#allocation5], 0  ;;  %s259_s18 = smov [#allocation2]  }
   0x2   :  { %s19_s19 = sshll.u32 %s259_s18, 4  ;;  %s20_s19 = int_to_ptr.vmem [resolvable:$true] %s19_s19 }
   0x3   :  { %s223_s20 = scalar_lea.vmem %s20_s19, 256  ;;  %p228_p1 = scmp.lt.s32.totalorder %s20_s19, %s20_s19 }
   0x4   :  { %p224_p0 = scmp.ne.s32.totalorder %s20_s19, %s223_s20  ;;  %p229_p2 = scmp.lt.s32.totalorder %s223_s20, %s223_s20 }
   0x6   :  { %p230_p3 = por %p229_p2, %p228_p1 }
   0x8   :  { %p231_p4 = pnand %p230_p3, %p224_p0 }
   0xa   :  { %234 = shalt.err (!%p231_p4)
}
   0xb   :  { %s260_s21 = smov 128   ;;  %s261_s22 = smov 8  }
   0xc   :  { %25 = dma.hbm_to_vmem [thread:$0]  %s341_s1, 256, %s20_s19, [#allocation3], %s260_s21, %s260_s21, %s261_s22  }
   0xd   :  { %s262_s25 = smov [#allocation4]  }
   0xe   :  { %s36_s26 = sshll.u32 %s262_s25, 4  ;;  %s37_s26 = int_to_ptr.vmem [resolvable:$true] %s36_s26 }
   0xf   :  { %s243_s27 = scalar_lea.vmem %s37_s26, 16  ;;  %s247_s28 = scalar_lea.vmem %s37_s26, 32 }
  0x10   :  { %p244_p5 = scmp.ne.s32.totalorder %s37_s26, %s243_s27  ;;  %p248_p6 = scmp.lt.s32.totalorder %s37_s26, %s37_s26 }
  0x11   :  { %p249_p7 = scmp.lt.s32.totalorder %s247_s28, %s243_s27 }
  0x13   :  { %p250_p8 = por %p249_p7, %p248_p6 }
  0x15   :  { %p251_p9 = pnand %p250_p8, %p244_p5 }
  0x17   :  { %254 = shalt.err (!%p251_p9)
}
  0x18   :  { %39 = dma.hbm_to_vmem [thread:$0]  %s344_s4, 16, %s37_s26, [#allocation5]  }
  0x19   :  { %255 = dma.done.wait [#allocation3], 256  }
  0x1a   :  { %256 = vsyncadd [#allocation3], 4294967040 }
  0x1b   :  { %257 = dma.done.wait [#allocation5], 16  }
  0x1c   :  { %258 = vsyncadd [#allocation5], 4294967280  ;;  %v263_v0 = vmov 0.0   ;;  %vm264_vm0 = vmmov 0   ;;  %v50_v1 = vld [vmem:[#allocation2] sm:$0xff]  ;;  %v51_v2 = vld [vmem:[#allocation2 + $0x8] sm:$0xff] }
  0x1d   :  { %191 = vmatprep.subr.bf16.mxu0 %v263_v0  ;;  %193 = vmatprep.mubr.msk.bf16.mxu0 %vm264_vm0, %v263_v0  ;;  %v47_v3 = vld [vmem:[%s340_s0] sm:$0xff]  ;;  %v52_v4 = vpack.c.bf16 %v51_v2, %v50_v1  ;;  %v48_v5 = vld [vmem:[%s340_s0 + $0x8] sm:$0xff]  ;;  %v114_v6 = vld [vmem:[%s343_s3 + $0x30] sm:$0xff]  ;;  %vm60_vm1 = vcmask 130048   ;;  %vm127_vm2 = vcmask 523264  }
  0x1e   :  { %197 = vmatprep.subr.bf16.mxu1 %v263_v0  ;;  %205 = vmatprep.mubr.msk.bf16.mxu1 %vm264_vm0, %v263_v0  ;;  %v115_v7 = vld [vmem:[%s343_s3 + $0x38] sm:$0xff]  ;;  %v49_v8 = vpack.c.bf16 %v48_v5, %v47_v3  ;;  %v112_v10 = vld [vmem:[%s343_s3 + $0x20] sm:$0xff]  ;;  %v113_v11 = vld [vmem:[%s343_s3 + $0x28] sm:$0xff] }
  0x1f   :  { %v119_v9 = vpack.c.bf16 %v115_v7, %v114_v6  ;;  %192 = vmatpush3.bf16.msra.mxu0 %v52_v4  ;;  %v118_v12 = vpack.c.bf16 %v113_v11, %v112_v10  ;;  %v110_v13 = vld [vmem:[%s343_s3 + $0x10] sm:$0xff]  ;;  %v111_v14 = vld [vmem:[%s343_s3 + $0x18] sm:$0xff]  ;;  %v108_v16 = vld [vmem:[%s343_s3] sm:$0xff] }
  0x20   :  { %v117_v15 = vpack.c.bf16 %v111_v14, %v110_v13  ;;  %v109_v17 = vld [vmem:[%s343_s3 + $0x8] sm:$0xff]  ;;  %v180_v19 = vld [vmem:[%s342_s2] ss:$0 sm:$0xff]  ;;  %v182_v29 = vld [vmem:[#allocation4] ss:$0 sm:$0xff] }
  0x21   :  { %198 = vmatpush3.bf16.msra.mxu1 %v119_v9  ;;  %v116_v18 = vpack.c.bf16 %v109_v17, %v108_v16 }
  0x22   :  { %199 = vmatprep.subr.bf16.mxu1 %v263_v0  ;;  %194 = vmatmul.mubr.msk.bf16.vlgmr.msra.gmra.mxu0 %vm60_vm1, %v49_v8 }
  0x25   :  { %200 = vmatpush3.bf16.msra.mxu1 %v118_v12 }
  0x26   :  { %201 = vmatprep.subr.bf16.mxu1 %v263_v0 }
  0x29   :  { %202 = vmatpush3.bf16.msra.mxu1 %v117_v15 }
  0x2a   :  { %203 = vmatprep.subr.bf16.mxu1 %v263_v0 }
  0x2d   :  { %204 = vmatpush3.bf16.msra.mxu1 %v116_v18 }
  0xe2   :  { %v98_v20 = vpop.f32.mrf.mxu0 }
  0xe3   :  { %v99_v22 = vadd.f32 %v180_v19, %v98_v20 }
  0xe4   :  { %v195_v21 = vpop.f32.mrf.mxu0 }
  0xe5   :  { %v105_v26 = vmax.f32 %v99_v22, 0.0 }
  0xe6   :  { %v101_v23 = vpop.f32.mrf.mxu0 }
  0xe7   :  { %v102_v24 = vadd.f32 %v180_v19, %v101_v23 }
  0xe8   :  { %v196_v25 = vpop.f32.mrf.mxu0 }
  0xe9   :  { %v106_v27 = vmax.f32 %v102_v24, 0.0 }
  0xeb   :  { %v107_v28 = vpack.c.bf16 %v106_v27, %v105_v26 }
  0xed   :  { %206 = vmatmul.mubr.msk.bf16.vlgmr.msra.gmra.mxu1 %vm127_vm2, %v107_v28 }
 0x1ad   :  { %v165_v30 = vpop.f32.mrf.mxu1 }
 0x1ae   :  { %v166_v31 = vadd.f32 %v182_v29, %v165_v30 }
 0x1af   :  { %v207_v32 = vpop.f32.mrf.mxu1 }
 0x1b0   :  { %172 = vst.msk [vmem:[%s345_s5] sm:$0xff] %vm127_vm2, %v166_v31 }
 0x1b1   :  { %v168_v33 = vpop.f32.mrf.mxu1 }
 0x1b2   :  { %v169_v34 = vadd.f32 %v182_v29, %v168_v33 }
 0x1b3   :  { %v208_v35 = vpop.f32.mrf.mxu1 }
 0x1b4   :  { %173 = vst.msk [vmem:[%s345_s5 + $0x8] sm:$0xff] %vm127_vm2, %v169_v34 }
 0x1b5   :  { %178 = vsyncpa [#allocation3], 1 }
 0x1b6   :  { %179 = vsyncpa [#allocation5], 1 }

// kernel: dense_gnn_forward.11
= control target key start
LH: loop header
LB: loop body
LE: loop exit
PB: predicated region body
PF: predicated region fallthrough
CT: control target
= control target key end

     0   :  { %20 = vsyncpa [#allocation3], 0  ;;  %s2382_s0 = inlined_call_operand.vmem [shape: f32[2,64,8], index: 0, kind: input, shape index: {}]   ;;  %s2383_s1 = inlined_call_operand.vmem [shape: f32[2,8,64], index: 1, kind: input, shape index: {}, may-alias: {1,2}]   ;;  %s2384_s2 = inlined_call_operand.vmem [shape: f32[2,8,64], index: 2, kind: input, shape index: {}, may-alias: {1,2}]   ;;  %s2385_s3 = inlined_call_operand.vmem [shape: f32[2,8,1], index: 3, kind: input, shape index: {}, may-alias: {3,4}]   ;;  %s2386_s4 = inlined_call_operand.vmem [shape: f32[2,8,1], index: 4, kind: input, shape index: {}, may-alias: {3,4}]   ;;  %s2387_s5 = inlined_call_operand.vmem [shape: f32[8,32], index: 5, kind: input, shape index: {}]   ;;  %s2388_s6 = inlined_call_operand.vmem [shape: f32[1,32], index: 6, kind: input, shape index: {}]   ;;  %s2389_s7 = inlined_call_operand.hbm [shape: f32[32,64], index: 7, kind: input, shape index: {}]   ;;  %s2390_s8 = inlined_call_operand.vmem [shape: f32[64,64], index: 8, kind: input, shape index: {}]   ;;  %s2391_s9 = inlined_call_operand.hbm [shape: f32[64,64], index: 9, kind: input, shape index: {}]   ;;  %s2392_s10 = inlined_call_operand.vmem [shape: f32[1,64], index: 10, kind: input, shape index: {}]   ;;  %s2393_s11 = inlined_call_operand.vmem [shape: f32[64,32], index: 11, kind: input, shape index: {}]   ;;  %s2394_s12 = inlined_call_operand.vmem [shape: f32[1,32], index: 12, kind: input, shape index: {}]   ;;  %s2395_s13 = inlined_call_operand.vmem [shape: bf16[2,64,32], index: 13, kind: output, shape index: {0}]   ;;  %s2396_s14 = inlined_call_operand.vmem [shape: f32[2,8,32], index: 14, kind: output, shape index: {1}]  }
   0x1   :  { %21 = vsyncpa [#allocation5], 0  ;;  %s2031_s29 = smov 0   ;;  %s2033_s30 = smov 0  }
   0x2   :  { %s2035_s15 = smov 0  }
   0x3 LB: > { %s1663_s16 = sadd.s32 4294967295, %s1946_s15   ;;  %s39_s17 = sadd.s32 1, %s1942_s30  ;;  %s1946_s15 = sphi %s2035_s15, %s27_s15   ;;  %s1942_s30 = sphi %s2033_s30, %s2401_s30   ;;  %s1938_s29 = sphi %s2031_s29, %s2400_s29  }
   0x4   : > { %p41_p0 = scmp.ge.s32.totalorder %s39_s17, 2  ;;  %p1665_p1 = scmp.ge.s32.totalorder %s1946_s15, 1 }
   0x5   : > { %p404_p2 = scmp.lt.s32.totalorder %s1946_s15, 3  ;;  %p2056_p4 = scmp.eq.s32.totalorder %s1663_s16, 0 }
   0x6   : > { %s2403_s17 = smov (%p41_p0, %s39_s17), 0  ;;  %s1948_s20 = smov [#allocation2]  }
   0x7   : > { %p2052_p3 = pnand %p1665_p1, %p404_p2  ;;  %s422_s21 = sshll.u32 %s1948_s20, 4  ;;  %s423_s21 = int_to_ptr.vmem [resolvable:$true] %s422_s21 }
   0x8   : > { %s1949_s23 = smov [#allocation4]   ;;  %s1875_s25 = scalar_lea.vmem %s423_s21, 512 }
   0x9   : > { %p1818_p5 = pneg %p2052_p3  ;;  %s438_s24 = sshll.u32 %s1949_s23, 4  ;;  %s439_s24 = int_to_ptr.vmem [resolvable:$true] %s438_s24 }
   0xa   : > { %p1876_p8 = scmp.ne.s32.totalorder %s423_s21, %s1875_s25  ;;  %p1883_p11 = scmp.lt.s32.totalorder %s423_s21, %s423_s21 }
   0xb   : > { %p2064_p6 = pnand %p2056_p4, %p1818_p5  ;;  %p1884_p12 = scmp.lt.s32.totalorder %s1875_s25, %s1875_s25 }
   0xd   : > { %p1866_p7 = pneg %p2064_p6  ;;  %p1885_p13 = por %p1884_p12, %p1883_p11 }
   0xf   : > { %p1878_p9 = pnand %p1876_p8, %p1866_p7 }
  0x11   : > { %p1879_p10 = pneg %p1878_p9 }
  0x13   : > { %p1886_p0 = pnand %p1885_p13, %p1879_p10 }
  0x15   : > { %1889 = shalt.err (!%p1886_p0)
}
  0x16   : > { %s1950_s26 = smov 128   ;;  %s1951_s27 = smov 8  }
  0x17   : > { %1821 = dma.hbm_to_vmem [thread:$0]  (!%p2064_p6), %s2389_s7, 512, %s423_s21, [#allocation3], %s1950_s26, %s1950_s26, %s1951_s27  }
  0x18   : > { %s1901_s20 = scalar_lea.vmem %s439_s24, 1024  ;;  %p1909_p8 = scmp.lt.s32.totalorder %s439_s24, %s439_s24 }
  0x19   : > { %p1902_p1 = scmp.ne.s32.totalorder %s439_s24, %s1901_s20  ;;  %p1910_p9 = scmp.lt.s32.totalorder %s1901_s20, %s1901_s20 }
  0x1b   : > { %p1904_p2 = pnand %p1902_p1, %p1866_p7  ;;  %p1911_p11 = por %p1910_p9, %p1909_p8 }
  0x1d   : > { %p1905_p5 = pneg %p1904_p2 }
  0x1f   : > { %p1912_p10 = pnand %p1911_p11, %p1905_p5 }
  0x21   : > { %1915 = shalt.err (!%p1912_p10)
}
  0x22   : > { %1824 = dma.hbm_to_vmem [thread:$0]  (!%p2064_p6), %s2391_s9, 1024, %s439_s24, [#allocation5], %s1950_s26, %s1950_s26, %s1951_s27  }
  0x23   : > { %510 = sbr.rel (%p2052_p3) target bundleno = 704 (0x2c0), region = 72 }
  0x28   : > { %1929 = dma.done.wait (%p2056_p4), [#allocation3], 512  }
  0x29   : > { %1931 = vsyncadd (%p2056_p4), [#allocation3], 4294966784 }
  0x2a   : > { %1933 = dma.done.wait (%p2056_p4), [#allocation5], 1024  }
  0x2b   : > { %1935 = vsyncadd (%p2056_p4), [#allocation5], 4294966272  ;;  %p598_p7 = scmp.lt.s32.totalorder %s1938_s29, 1  ;;  %v1952_v0 = vmov 0.0   ;;  %v659_v1 = vld [vmem:[%s2387_s5] sm:$0xff]  ;;  %vm681_vm0 = vcmask 1043456  }
  0x2c   : > { %1769 = vmatprep.subr.bf16.mxu0 %v1952_v0  ;;  %vm668_vm1 = vcmask 64512   ;;  %v660_v4 = vpack.c.bf16 %v659_v1, %v659_v1  ;;  %v847_v12 = vld [vmem:[%s2390_s8 + $0x30] sm:$0xff]  ;;  %v848_v13 = vld [vmem:[%s2390_s8 + $0x38] sm:$0xff]  ;;  %v845_v14 = vld [vmem:[%s2390_s8 + $0x20] sm:$0xff]  ;;  %vm1953_vm2 = vmmov 0   ;;  %vm853_vm3 = vcmask 523264  }
  0x2d   : > { %s2405_s29 = smov (!%p598_p7, %s1938_s29), 1  ;;  %v852_v16 = vpack.c.bf16 %v848_v13, %v847_v12  ;;  %v846_v17 = vld [vmem:[%s2390_s8 + $0x28] sm:$0xff]  ;;  %v758_v18 = vld [vmem:[#allocation2 + $0x10] sm:$0xff]  ;;  %v759_v19 = vld [vmem:[#allocation2 + $0x18] sm:$0xff]  ;;  %1777 = vmatprep.mubr.msk.bf16.mxu0 %vm1953_vm2, %v1952_v0  ;;  %vm762_vm4 = vcmask 261120   ;;  %vm1450_vm5 = vcmask 257024  }
  0x2e   : > { %s1708_s18 = sshll.u32 %s2405_s29, 6  ;;  %1809 = vmatprep.subr.msk.bf16.mxu1 %vm681_vm0, %v660_v4  ;;  %v683_v10 = vsel %vm681_vm0, %v660_v4, 0  ;;  %v761_v20 = vpack.c.bf16 %v759_v19, %v758_v18  ;;  %v851_v21 = vpack.c.bf16 %v846_v17, %v845_v14  ;;  %v843_v22 = vld [vmem:[%s2390_s8 + $0x10] sm:$0xff]  ;;  %v844_v23 = vld [vmem:[%s2390_s8 + $0x18] sm:$0xff]  ;;  %v841_v28 = vld [vmem:[%s2390_s8] sm:$0xff]  ;;  %vm1394_vm6 = vcmask 1041409  }
  0x2f   : > { %s2105_s24 = scalar_lea.vmem %s2382_s0, %s1708_s18  ;;  %1748 = vmatpush3.bf16.msra.mxu1 %v683_v10  ;;  %1770 = vmatpush3.bf16.msra.mxu0 %v852_v16  ;;  %v850_v26 = vpack.c.bf16 %v844_v23, %v843_v22  ;;  %v842_v29 = vld [vmem:[%s2390_s8 + $0x8] sm:$0xff]  ;;  %v756_v33 = vld [vmem:[#allocation2] sm:$0xff]  ;;  %v904_v42 = vld [vmem:[#allocation4 + $0x30] sm:$0xff]  ;;  %v958_v10 = vlaneseq  ;;  %s1709_s18 = sshll.u32 %s2405_s29, 5  ;;  %vm1396_vm7 = vcmask 1042434   ;;  %vm1398_vm8 = vcmask 1043459  }
  0x30   : > { %v647_v2 = vld [vmem:[%s2105_s24] sm:$0xff]  ;;  %v648_v3 = vld [vmem:[%s2105_s24 + $0x8] sm:$0xff]  ;;  %v649_v6 = vld [vmem:[%s2105_s24 + $0x10] sm:$0xff]  ;;  %1771 = vmatprep.subr.bf16.mxu0 %v1952_v0  ;;  %1757 = vmatprep.subr.bf16.mxu1 %v761_v20  ;;  %v849_v30 = vpack.c.bf16 %v842_v29, %v841_v28  ;;  %vm1400_vm9 = vcmask 1044484   ;;  %vm1402_vm10 = vcmask 1045509   ;;  %vm1404_vm11 = vcmask 1046534  }
  0x31   : > { %v655_v5 = vpack.c.bf16 %v648_v3, %v647_v2  ;;  %v650_v7 = vld [vmem:[%s2105_s24 + $0x18] sm:$0xff]  ;;  %v651_v8 = vld [vmem:[%s2105_s24 + $0x20] sm:$0xff]  ;;  %v652_v9 = vld [vmem:[%s2105_s24 + $0x28] sm:$0xff]  ;;  %v959_v12 = vshrl.u32 %v958_v10, 7  ;;  %vm1406_vm12 = vcmask 1047559  }
  0x32   : > { %v656_v11 = vpack.c.bf16 %v650_v7, %v649_v6  ;;  %v657_v15 = vpack.c.bf16 %v652_v9, %v651_v8  ;;  %v653_v24 = vld [vmem:[%s2105_s24 + $0x30] sm:$0xff]  ;;  %v654_v25 = vld [vmem:[%s2105_s24 + $0x38] sm:$0xff]  ;;  %s2150_s24 = sshll.u32 %s2405_s29, 3  ;;  %v757_v34 = vld [vmem:[#allocation2 + $0x8] sm:$0xff]  ;;  %v1954_v8 = vmov 1966171168  }
  0x33   : > { %1749 = vmatprep.mubr.msk.bf16.mxu1 %vm668_vm1, %v655_v5  ;;  %1772 = vmatpush3.bf16.msra.mxu0 %v851_v21  ;;  %v658_v27 = vpack.c.bf16 %v654_v25, %v653_v24  ;;  %s613_s21 = scalar_lea.vmem %s2383_s1, %s2150_s24  ;;  %v760_v35 = vpack.c.bf16 %v757_v34, %v756_v33  ;;  %v1681_v39 = vld [vmem:[%s2388_s6] ss:$0 sm:$0xff]  ;;  %v905_v43 = vld [vmem:[#allocation4 + $0x38] sm:$0xff]  ;;  %v903_v53 = vld [vmem:[#allocation4 + $0x28] sm:$0xff]  ;;  %s617_s28 = scalar_lea.vmem %s2384_s2, %s2150_s24  ;;  %v956_v9 = vunpack.c.l.s4 %v1954_v8 }
  0x34   : > { %1750 = vmatmul.mubr.msk.bf16.vlgmr.msra.gmra.mxu1 %vm668_vm1, %v656_v11  ;;  %1773 = vmatprep.subr.bf16.mxu0 %v1952_v0  ;;  %v750_v31 = vld [vmem:[%s613_s21] sm:$0xff]  ;;  %v909_v49 = vpack.c.bf16 %v905_v43, %v904_v42  ;;  %v900_v58 = vld [vmem:[#allocation4 + $0x10] sm:$0xff]  ;;  %v901_v59 = vld [vmem:[#allocation4 + $0x18] sm:$0xff]  ;;  %s624_s26 = scalar_lea.vmem %s2385_s3, %s2150_s24  ;;  %s645_s19 = scalar_lea.vmem %s2396_s14, %s2150_s24 }
  0x35   : > { %1753 = vmatprep.mubr.msk.bf16.mxu1 %vm668_vm1, %v657_v15  ;;  %1758 = vmatpush3.bf16.msra.mxu1 %v761_v20  ;;  %v840_v32 = vpack.c.bf16 %v750_v31, %v750_v31  ;;  %v902_v52 = vld [vmem:[#allocation4 + $0x20] sm:$0xff]  ;;  %v907_v1 = vpack.c.bf16 %v901_v59, %v900_v58  ;;  %v899_v4 = vld [vmem:[#allocation4 + $0x8] sm:$0xff]  ;;  %v957_v11 = vunpack.c.0.s8 %v956_v9  ;;  %v2208_v20 = vsub.s32 0, %v959_v12  ;;  %v1092_v34 = vld [vmem:[%s2393_s11 + $0x30] sm:$0xff] }
  0x36   : > { %1759 = vmatprep.subr.bf16.mxu1 %v760_v35  ;;  %v908_v55 = vpack.c.bf16 %v903_v53, %v902_v52  ;;  %v898_v3 = vld [vmem:[#allocation4] sm:$0xff]  ;;  %v1091_v43 = vld [vmem:[%s2393_s11 + $0x28] sm:$0xff] }
  0x37   : > { %1774 = vmatpush3.bf16.msra.mxu0 %v850_v26  ;;  %v906_v5 = vpack.c.bf16 %v899_v4, %v898_v3  ;;  %v751_v6 = vld [vmem:[%s617_s28] sm:$0xff]  ;;  %v2201_v13 = vsub.s32 %v957_v11, %v959_v12  ;;  %v1087_v53 = vld [vmem:[%s2393_s11 + $0x8] sm:$0xff]  ;;  %s628_s28 = scalar_lea.vmem %s2386_s4, %s2150_s24 }
  0x38   : > { %1775 = vmatprep.subr.bf16.mxu0 %v1952_v0  ;;  %v897_v7 = vpack.c.bf16 %v751_v6, %v751_v6  ;;  %v1090_v42 = vld [vmem:[%s2393_s11 + $0x20] sm:$0xff] }
  0x39   : > { %1760 = vmatpush3.bf16.msra.mxu1 %v760_v35  ;;  %v1093_v35 = vld [vmem:[%s2393_s11 + $0x38] sm:$0xff]  ;;  %v1086_v52 = vld [vmem:[%s2393_s11] sm:$0xff] }
  0x3a   : > { %1781 = vmatprep.subr.bf16.mxu1 %v1952_v0  ;;  %v1233_v3 = vld [vmem:[%s628_s28] sm:$0xff] }
  0x3b   : > { %1776 = vmatpush3.bf16.msra.mxu0 %v849_v30 }
  0x3c   : > { %1754 = vmatmul.mubr.msk.bf16.gmra.mxu1 %vm668_vm1, %v658_v27 }
  0x3e   : > { %1778 = vmatmul.mubr.msk.bf16.vlgmr.msra.gmra.mxu0 %vm853_vm3, %v840_v32 }
  0xf4   : > { %v1751_v36 = vpop.f32.mrf.mxu1 }
  0xf5   : > { %v2169_v46 = vadd.f32 %v1751_v36, %v1681_v39 }
  0xf6   : > { %v719_v37 = vpop.f32.mrf.mxu1 }
  0xf7   : > { %v2165_v44 = vadd.f32 %v1681_v39, %v719_v37  ;;  %v1097_v37 = vpack.c.bf16 %v1093_v35, %v1092_v34 }
  0xf8   : > { %v1752_v38 = vpop.f32.mrf.mxu1 }
  0xf9   : > { %v2163_v40 = vadd.f32 %v1752_v38, %v1681_v39  ;;  %1793 = vmatprep.subr.bf16.mxu0 %v1097_v37 }
  0xfa   : > { %v722_v41 = vpop.f32.mrf.mxu1  ;;  %1794 = vmatpush3.bf16.msra.mxu0 %v1097_v37 }
  0xfb   : > { %v2167_v45 = vadd.f32 %v1681_v39, %v722_v41  ;;  %v753_v50 = vpack.c.bf16 %v2163_v40, %v2169_v46 }
  0xfc   : > { %v1755_v47 = vpop.f32.mrf.mxu1 }
  0xfd   : > { %v752_v48 = vpack.c.bf16 %v2167_v45, %v2165_v44  ;;  %v2184_v62 = vadd.f32 %v1755_v47, %v1681_v39  ;;  %v1096_v47 = vpack.c.bf16 %v1091_v43, %v1090_v42 }
  0xfe   : > { %v735_v51 = vpop.f32.mrf.mxu1  ;;  %v891_v14 = vpop.f32.mrf.mxu0 }
  0xff   : > { %1761 = vmatprep.mubr.msk.bf16.mxu1 %vm762_vm4, %v752_v48  ;;  %v2180_v60 = vadd.f32 %v1681_v39, %v735_v51  ;;  %v954_v15 = vcombine.high %v891_v14, %v891_v14  ;;  %v961_v16 = vrot.slane %v891_v14, %v2201_v13  ;;  %1795 = vmatprep.subr.bf16.mxu0 %v1096_v47 }
 0x100   : > { %v1756_v54 = vpop.f32.mrf.mxu1  ;;  %1762 = vmatmul.mubr.msk.bf16.vlgmr.msra.gmra.mxu1 %vm762_vm4, %v753_v50  ;;  %v1779_v17 = vpop.f32.mrf.mxu0  ;;  %1796 = vmatpush3.bf16.msra.mxu0 %v1096_v47  ;;  %v1089_v50 = vld [vmem:[%s2393_s11 + $0x18] sm:$0xff] }
 0x101   : > { %1782 = vmatpush3.bf16.msra.mxu1 %v909_v49  ;;  %v2177_v56 = vadd.f32 %v1756_v54, %v1681_v39  ;;  %v968_v18 = vrot.slane %v954_v15, %v2201_v13  ;;  %v969_v19 = vcombine.high %v961_v16, %v961_v16  ;;  %v1088_v49 = vld [vmem:[%s2393_s11 + $0x10] sm:$0xff]  ;;  %v1094_v54 = vpack.c.bf16 %v1087_v53, %v1086_v52 }
 0x102   : > { %v738_v57 = vpop.f32.mrf.mxu1  ;;  %1783 = vmatprep.subr.bf16.mxu1 %v1952_v0  ;;  %v894_v21 = vpop.f32.mrf.mxu0  ;;  %v1095_v51 = vpack.c.bf16 %v1089_v50, %v1088_v49 }
 0x103   : > { %v2182_v61 = vadd.f32 %v1681_v39, %v738_v57  ;;  %v755_v2 = vpack.c.bf16 %v2177_v56, %v2184_v62  ;;  %v2211_v22 = vrot.slane %v968_v18, %v2201_v13  ;;  %v2214_v23 = vrot.slane %v969_v19, %v2201_v13  ;;  %v1182_v57 = vld [vmem:[%s624_s26] sm:$0xff]  ;;  %s2330_s26 = scalar_lea.vmem %s2395_s13, %s1709_s18 }
 0x104   : > { %v1780_v25 = vpop.f32.mrf.mxu0  ;;  %v970_v29 = vcombine.high %v968_v18, %v968_v18  ;;  %1797 = vmatprep.subr.bf16.mxu0 %v1095_v51  ;;  %v1191_v58 = vrot.slane %v1182_v57, %v2201_v13  ;;  %v1184_v59 = vcombine.high %v1182_v57, %v1182_v57 }
 0x105   : > { %v754_v63 = vpack.c.bf16 %v2182_v61, %v2180_v60  ;;  %1784 = vmatpush3.bf16.msra.mxu1 %v908_v55  ;;  %v1001_v28 = vcombine.high %v2214_v23, %v2214_v23  ;;  %v1010_v31 = vrot.slane %v2214_v23, %v2208_v20  ;;  %v1000_v32 = vcombine.high %v2211_v22, %v2211_v22 }
 0x106   : > { %1785 = vmatprep.subr.bf16.mxu1 %v1952_v0  ;;  %v2242_v36 = vrot.slane %v970_v29, %v2201_v13  ;;  %v1022_v38 = vrot.slane %v2211_v22, %v2208_v20  ;;  %1798 = vmatpush3.bf16.msra.mxu0 %v1095_v51  ;;  %v1955_v55 = vmov 0  }
 0x107   : > { %1765 = vmatprep.mubr.msk.bf16.mxu1 %vm762_vm4, %v754_v63  ;;  %v2226_v30 = vrot.slane %v1001_v28, %v2208_v20  ;;  %v2233_v33 = vrot.slane %v1000_v32, %v2208_v20  ;;  %1799 = vmatprep.subr.bf16.mxu0 %v1094_v54  ;;  %v1207_v63 = vrot.slane %v1191_v58, %v2201_v13 }
 0x108   : > { %1766 = vmatmul.mubr.msk.bf16.gmra.mxu1 %vm762_vm4, %v755_v2  ;;  %v1002_v39 = vcombine.high %v2242_v36, %v2242_v36  ;;  %v1026_v48 = vrot.slane %v2242_v36, %v2208_v20  ;;  %1861 = vset.pattern.permute.xlu0 %v1955_v55  ;;  %v1198_v2 = vrot.slane %v1184_v59, %v2201_v13 }
 0x109   : > { %1786 = vmatpush3.bf16.msra.mxu1 %v907_v1  ;;  %1789 = vmatprep.mubr.msk.bf16.mxu1 %vm1953_vm2, %v1952_v0  ;;  %v1199_v1 = vcombine.high %v1191_v58, %v1191_v58  ;;  %v1237_v4 = vrot.slane %v1207_v63, %v2208_v20 }
 0x10a   : > { %1787 = vmatprep.subr.bf16.mxu1 %v1952_v0  ;;  %v2206_v0 = vrot.slane %v961_v16, %v2201_v13  ;;  %v2249_v41 = vrot.slane %v1002_v39, %v2208_v20  ;;  %1800 = vmatpush3.bf16.msra.mxu0 %v1094_v54  ;;  %v1200_v8 = vcombine.high %v1198_v2, %v1198_v2 }
 0x10b   : > { %1862 = vset.pattern.permute.xlu1 %v1955_v55  ;;  %v1221_v6 = vrot.slane %v1199_v1, %v2201_v13  ;;  %v1274_v9 = vmul.f32 %v1237_v4, %v1233_v3 }
 0x10c   : > { %v999_v24 = vcombine.high %v2206_v0, %v2206_v0  ;;  %v1006_v27 = vrot.slane %v2206_v0, %v2208_v20  ;;  %v1228_v15 = vrot.slane %v1200_v8, %v2201_v13 }
 0x10d   : > { %1788 = vmatpush3.bf16.msra.mxu1 %v906_v5  ;;  %v1229_v5 = vcombine.high %v1207_v63, %v1207_v63  ;;  %v1241_v11 = vrot.slane %v1221_v6, %v2208_v20  ;;  %v1231_v12 = vcombine.high %v1221_v6, %v1221_v6  ;;  %1284 = vperm.xlu0 %1861, %v1274_v9  }
 0x10e   : > { %v2219_v26 = vrot.slane %v999_v24, %v2208_v20  ;;  %v1257_v24 = vrot.slane %v1228_v15, %v2208_v20  ;;  %v1232_v25 = vcombine.high %v1228_v15, %v1228_v15 }
 0x10f   : > { %v1245_v10 = vrot.slane %v1229_v5, %v2208_v20  ;;  %v1275_v17 = vmul.f32 %v1241_v11, %v1233_v3  ;;  %v1249_v18 = vrot.slane %v1231_v12, %v2208_v20 }
 0x110   : > { %1790 = vmatmul.mubr.msk.bf16.vlgmr.msra.gmra.mxu1 %vm853_vm3, %v897_v7  ;;  %v1214_v7 = vrot.slane %v1198_v2, %v2201_v13  ;;  %v1279_v32 = vmul.f32 %v1257_v24, %v1233_v3  ;;  %v1265_v34 = vrot.slane %v1232_v25, %v2208_v20 }
 0x111   : > { %v1276_v16 = vmul.f32 %v1245_v10, %v1233_v3  ;;  %v1277_v21 = vmul.f32 %v1249_v18, %v1233_v3  ;;  %1289 = vperm.xlu0 %1861, %v1275_v17  }
 0x112   : > { %v1253_v14 = vrot.slane %v1214_v7, %v2208_v20  ;;  %v1230_v19 = vcombine.high %v1214_v7, %v1214_v7  ;;  %v1281_v35 = vmul.f32 %v1265_v34, %v1233_v3 }
 0x113   : > { %1294 = vperm.xlu1 %1862, %v1276_v16  }
 0x114   : > { %v1278_v28 = vmul.f32 %v1253_v14, %v1233_v3  ;;  %v1261_v29 = vrot.slane %v1230_v19, %v2208_v20 }
 0x116   : > { %1304 = vperm.xlu0 %1861, %v1278_v28   ;;  %v1280_v13 = vmul.f32 %v1261_v29, %v1233_v3  ;;  %v2319_v29 = vld [vmem:[%s2394_s12] ss:$0 sm:$0xff] }
 0x117   : > { %1299 = vperm.xlu1 %1862, %v1277_v21  }
 0x11a   : > { %1314 = vperm.xlu0 %1861, %v1280_v13  }
 0x11b   : > { %1309 = vperm.xlu1 %1862, %v1279_v32  }
 0x11f   : > { %1319 = vperm.xlu1 %1862, %v1281_v35  }
 0x188   : > { %v1285_v25 = vpop.permute.xlu0 %1284 }
 0x18c   : > { %v1290_v28 = vpop.permute.xlu0 %1289 }
 0x18e   : > { %v1295_v32 = vpop.permute.xlu1 %1294 }
 0x1c0   : > { %v1763_v37 = vpop.f32.mrf.mxu1 }
 0x1c1   : > { %v1045_v51 = vadd.f32 %v1763_v37, %v2219_v26 }
 0x1c2   : > { %v809_v39 = vpop.f32.mrf.mxu1 }
 0x1c3   : > { %v1043_v53 = vadd.f32 %v1006_v27, %v809_v39  ;;  %v1692_v27 = vld [vmem:[%s2392_s10] ss:$0 sm:$0xff] }
 0x1c4   : > { %v1764_v42 = vpop.f32.mrf.mxu1 }
 0x1c5   : > { %v1046_v54 = vadd.f32 %v1764_v42, %v2226_v30  ;;  %v1305_v42 = vpop.permute.xlu0 %1304 }
 0x1c6   : > { %v812_v43 = vpop.f32.mrf.mxu1 }
 0x1c7   : > { %v1044_v55 = vadd.f32 %v1010_v31, %v812_v43 }
 0x1c8   : > { %v1767_v47 = vpop.f32.mrf.mxu1 }
 0x1c9   : > { %v1049_v58 = vadd.f32 %v1767_v47, %v2233_v33 }
 0x1ca   : > { %v825_v49 = vpop.f32.mrf.mxu1 }
 0x1cb   : > { %v1047_v26 = vadd.f32 %v1022_v38, %v825_v49 }
 0x1cc   : > { %v1768_v50 = vpop.f32.mrf.mxu1 }
 0x1cd   : > { %v1050_v59 = vadd.f32 %v1768_v50, %v2249_v41 }
 0x1ce   : > { %v828_v52 = vpop.f32.mrf.mxu1 }
 0x1cf   : > { %v1048_v57 = vadd.f32 %v1026_v48, %v828_v52  ;;  %v1300_v52 = vpop.permute.xlu1 %1299 }
 0x1d0   : > { %v947_v0 = vpop.f32.mrf.mxu1 }
 0x1d1   : > { %v1051_v30 = vadd.f32 %v1043_v53, %v947_v0  ;;  %v1052_v23 = vadd.f32 %v1044_v55, %v947_v0  ;;  %v1053_v31 = vadd.f32 %v1045_v51, %v947_v0  ;;  %v1054_v63 = vadd.f32 %v1046_v54, %v947_v0 }
 0x1d2   : > { %v1791_v1 = vpop.f32.mrf.mxu1  ;;  %v1055_v36 = vadd.f32 %v1047_v26, %v947_v0  ;;  %v1056_v48 = vadd.f32 %v1048_v57, %v947_v0  ;;  %v1057_v2 = vadd.f32 %v1049_v58, %v947_v0  ;;  %v1058_v33 = vadd.f32 %v1050_v59, %v947_v0 }
 0x1d3   : > { %v1066_v3 = vadd.f32 %v1692_v27, %v1051_v30  ;;  %v1067_v4 = vadd.f32 %v1692_v27, %v1052_v23  ;;  %v1068_v20 = vadd.f32 %v1692_v27, %v1053_v31  ;;  %v1069_v22 = vadd.f32 %v1692_v27, %v1054_v63 }
 0x1d4   : > { %v950_v38 = vpop.f32.mrf.mxu1  ;;  %v1070_v41 = vadd.f32 %v1692_v27, %v1055_v36  ;;  %v1071_v5 = vadd.f32 %v1692_v27, %v1056_v48  ;;  %v1072_v6 = vadd.f32 %v1692_v27, %v1057_v2  ;;  %v1073_v7 = vadd.f32 %v1692_v27, %v1058_v33 }
 0x1d5   : > { %v1074_v8 = vmax.f32 %v1066_v3, 0.0  ;;  %v1075_v9 = vmax.f32 %v1067_v4, 0.0  ;;  %v1076_v10 = vmax.f32 %v1068_v20, 0.0  ;;  %v1077_v11 = vmax.f32 %v1069_v22, 0.0  ;;  %v1310_v22 = vpop.permute.xlu1 %1309 }
 0x1d6   : > { %v1792_v12 = vpop.f32.mrf.mxu1  ;;  %v1078_v14 = vmax.f32 %v1070_v41, 0.0  ;;  %v1079_v15 = vmax.f32 %v1071_v5, 0.0  ;;  %v1080_v16 = vmax.f32 %v1072_v6, 0.0  ;;  %v1081_v17 = vmax.f32 %v1073_v7, 0.0 }
 0x1d7   : > { %v1082_v18 = vpack.c.bf16 %v1075_v9, %v1074_v8  ;;  %v1083_v19 = vpack.c.bf16 %v1077_v11, %v1076_v10 }
 0x1d8   : > { %v1084_v21 = vpack.c.bf16 %v1079_v15, %v1078_v14  ;;  %v1085_v24 = vpack.c.bf16 %v1081_v17, %v1080_v16 }
 0x1d9   : > { %1801 = vmatprep.mubr.msk.bf16.mxu0 %vm853_vm3, %v1082_v18 }
 0x1da   : > { %1802 = vmatmul.mubr.msk.bf16.vlgmr.msra.gmra.mxu0 %vm853_vm3, %v1083_v19 }
 0x1db   : > { %1805 = vmatprep.mubr.msk.bf16.mxu0 %vm853_vm3, %v1084_v21 }
 0x1e2   : > { %1806 = vmatmul.mubr.msk.bf16.gmra.mxu0 %vm853_vm3, %v1085_v24 }
 0x29a   : > { %v1803_v34 = vpop.f32.mrf.mxu0 }
 0x29b   : > { %v1160_v13 = vadd.f32 %v1803_v34, %v2319_v29 }
 0x29c   : > { %v1151_v35 = vpop.f32.mrf.mxu0 }
 0x29d   : > { %v1324_v37 = vmul.f32 %v1295_v32, %v1160_v13  ;;  %v1152_v39 = vadd.f32 %v2319_v29, %v1151_v35 }
 0x29e   : > { %v1804_v43 = vpop.f32.mrf.mxu0 }
 0x29f   : > { %v1344_v47 = vsel %vm762_vm4, %v1324_v37, 0.0  ;;  %v1412_v49 = vadd.f32 %v1324_v37, %v2169_v46  ;;  %v1322_v50 = vmul.f32 %v1285_v25, %v1152_v39  ;;  %v1163_v51 = vadd.f32 %v1804_v43, %v2319_v29  ;;  %v1320_v25 = vpop.permute.xlu1 %1319 }
 0x2a0   : > { %v1345_v53 = vrot.slane %v1344_v47, 4  ;;  %v1154_v54 = vpop.f32.mrf.mxu0 }
 0x2a1   : > { %v1712_v55 = vpack.c.bf16 %v1412_v49, %v1412_v49  ;;  %v1330_v57 = vsel %vm762_vm4, %v1322_v50, 0.0  ;;  %v1410_v58 = vadd.f32 %v1322_v50, %v2165_v44  ;;  %v1325_v46 = vmul.f32 %v1300_v52, %v1163_v51  ;;  %v1315_v44 = vpop.permute.xlu0 %1314 }
 0x2a2   : > { %v1346_v26 = vadd.f32 %v1345_v53, %v1344_v47  ;;  %v1331_v59 = vrot.slane %v1330_v57, 4  ;;  %v1155_v0 = vadd.f32 %v2319_v29, %v1154_v54  ;;  %v1807_v27 = vpop.f32.mrf.mxu0 }
 0x2a3   : > { %1453 = vst.msk [vmem:[%s2330_s26 + $0x8] sm:$0xf] %vm1450_vm5, %v1712_v55  ;;  %v1710_v30 = vpack.c.bf16 %v1410_v58, %v1410_v58  ;;  %v1351_v23 = vsel %vm762_vm4, %v1325_v46, 0.0  ;;  %v1413_v31 = vadd.f32 %v1325_v46, %v2163_v40  ;;  %v1176_v63 = vadd.f32 %v1807_v27, %v2319_v29 }
 0x2a4   : > { %v1332_v1 = vadd.f32 %v1331_v59, %v1330_v57  ;;  %v1352_v36 = vrot.slane %v1351_v23, 4  ;;  %v1323_v48 = vmul.f32 %v1290_v28, %v1155_v0  ;;  %v1167_v2 = vpop.f32.mrf.mxu0  ;;  %v1347_v20 = vrot.slane %v1346_v26, 2 }
 0x2a5   : > { %1451 = vst.msk [vmem:[%s2330_s26] sm:$0xf] %vm1450_vm5, %v1710_v30  ;;  %v1713_v33 = vpack.c.bf16 %v1413_v31, %v1413_v31  ;;  %v1328_v3 = vmul.f32 %v1315_v44, %v1176_v63  ;;  %v1168_v4 = vadd.f32 %v2319_v29, %v1167_v2 }
 0x2a6   : > { %v1333_v38 = vrot.slane %v1332_v1, 2  ;;  %v1337_v41 = vsel %vm762_vm4, %v1323_v48, 0.0  ;;  %v1808_v40 = vpop.f32.mrf.mxu0  ;;  %v1411_v6 = vadd.f32 %v1323_v48, %v2167_v45  ;;  %v1353_v9 = vadd.f32 %v1352_v36, %v1351_v23 }
 0x2a7   : > { %1454 = vst.msk [vmem:[%s2330_s26 + $0xc] sm:$0xf] %vm1450_vm5, %v1713_v33  ;;  %v1338_v5 = vrot.slane %v1337_v41, 4  ;;  %v1372_v7 = vsel %vm762_vm4, %v1328_v3, 0.0  ;;  %v1416_v8 = vadd.f32 %v1328_v3, %v2184_v62  ;;  %v1326_v15 = vmul.f32 %v1305_v42, %v1168_v4 }
 0x2a8   : > { %v1373_v10 = vrot.slane %v1372_v7, 4  ;;  %v1711_v12 = vpack.c.bf16 %v1411_v6, %v1411_v6  ;;  %v1348_v16 = vadd.f32 %v1347_v20, %v1346_v26  ;;  %v1334_v17 = vadd.f32 %v1333_v38, %v1332_v1  ;;  %v1170_v18 = vpop.f32.mrf.mxu0 }
 0x2a9   : > { %v1339_v11 = vadd.f32 %v1338_v5, %v1337_v41  ;;  %v1716_v14 = vpack.c.bf16 %v1416_v8, %v1416_v8  ;;  %v1358_v45 = vsel %vm762_vm4, %v1326_v15, 0.0  ;;  %v1414_v21 = vadd.f32 %v1326_v15, %v2180_v60 }
 0x2aa   : > { %1452 = vst.msk [vmem:[%s2330_s26 + $0x4] sm:$0xf] %vm1450_vm5, %v1711_v12  ;;  %v1179_v62 = vadd.f32 %v1808_v40, %v2319_v29  ;;  %v1354_v24 = vrot.slane %v1353_v9, 2  ;;  %v1374_v28 = vadd.f32 %v1373_v10, %v1372_v7  ;;  %v1359_v32 = vrot.slane %v1358_v45, 4 }
 0x2ab   : > { %v1340_v19 = vrot.slane %v1339_v11, 2  ;;  %1457 = vst.msk [vmem:[%s2330_s26 + $0x18] sm:$0xf] %vm1450_vm5, %v1716_v14  ;;  %v1714_v13 = vpack.c.bf16 %v1414_v21, %v1414_v21  ;;  %v1171_v37 = vadd.f32 %v2319_v29, %v1170_v18  ;;  %v1349_v39 = vrot.slane %v1348_v16, 1 }
 0x2ac   : > { %v1329_v35 = vmul.f32 %v1320_v25, %v1179_v62  ;;  %v1335_v42 = vrot.slane %v1334_v17, 1  ;;  %v1360_v43 = vadd.f32 %v1359_v32, %v1358_v45  ;;  %v1355_v51 = vadd.f32 %v1354_v24, %v1353_v9 }
 0x2ad   : > { %v1341_v34 = vadd.f32 %v1340_v19, %v1339_v11  ;;  %1455 = vst.msk [vmem:[%s2330_s26 + $0x10] sm:$0xf] %vm1450_vm5, %v1714_v13  ;;  %v1327_v50 = vmul.f32 %v1310_v22, %v1171_v37  ;;  %v1375_v52 = vrot.slane %v1374_v28, 2  ;;  %v1350_v63 = vadd.f32 %v1349_v39, %v1348_v16 }
 0x2ae   : > { %v1379_v60 = vsel %vm762_vm4, %v1329_v35, 0.0  ;;  %v1417_v49 = vadd.f32 %v1329_v35, %v2177_v56  ;;  %v1361_v53 = vrot.slane %v1360_v43, 2  ;;  %v1336_v46 = vadd.f32 %v1335_v42, %v1334_v17 }
 0x2af   : > { %v1342_v47 = vrot.slane %v1341_v34, 1  ;;  %v1380_v54 = vrot.slane %v1379_v60, 4  ;;  %v1365_v29 = vsel %vm762_vm4, %v1327_v50, 0.0  ;;  %v1415_v58 = vadd.f32 %v1327_v50, %v2182_v61 }
 0x2b0   : > { %v1717_v57 = vpack.c.bf16 %v1417_v49, %v1417_v49  ;;  %v1362_v26 = vadd.f32 %v1361_v53, %v1360_v43  ;;  %v1366_v0 = vrot.slane %v1365_v29, 4  ;;  %v1356_v27 = vrot.slane %v1355_v51, 1 }
 0x2b1   : > { %v1343_v55 = vadd.f32 %v1342_v47, %v1341_v34  ;;  %v1381_v59 = vadd.f32 %v1380_v54, %v1379_v60  ;;  %v1715_v56 = vpack.c.bf16 %v1415_v58, %v1415_v58  ;;  %v1376_v1 = vadd.f32 %v1375_v52, %v1374_v28 }
 0x2b2   : > { %1458 = vst.msk [vmem:[%s2330_s26 + $0x1c] sm:$0xf] %vm1450_vm5, %v1717_v57  ;;  %v1367_v31 = vadd.f32 %v1366_v0, %v1365_v29  ;;  %v1363_v36 = vrot.slane %v1362_v26, 1  ;;  %v1357_v2 = vadd.f32 %v1356_v27, %v1355_v51 }
 0x2b3   : > { %v1395_v30 = vsel %vm1394_vm6, %v1343_v55, %v1336_v46  ;;  %v1382_v23 = vrot.slane %v1381_v59, 2  ;;  %1456 = vst.msk [vmem:[%s2330_s26 + $0x14] sm:$0xf] %vm1450_vm5, %v1715_v56  ;;  %v1377_v3 = vrot.slane %v1376_v1, 1 }
 0x2b4   : > { %v1368_v61 = vrot.slane %v1367_v31, 2  ;;  %v1397_v48 = vsel %vm1396_vm7, %v1350_v63, %v1395_v30  ;;  %v1364_v4 = vadd.f32 %v1363_v36, %v1362_v26 }
 0x2b5   : > { %v1383_v44 = vadd.f32 %v1382_v23, %v1381_v59  ;;  %v1399_v20 = vsel %vm1398_vm8, %v1357_v2, %v1397_v48  ;;  %v1378_v40 = vadd.f32 %v1377_v3, %v1376_v1 }
 0x2b6   : > { %v1369_v33 = vadd.f32 %v1368_v61, %v1367_v31  ;;  %v1401_v5 = vsel %vm1400_vm9, %v1364_v4, %v1399_v20 }
 0x2b7   : > { %v1384_v22 = vrot.slane %v1383_v44, 1 }
 0x2b8   : > { %v1370_v38 = vrot.slane %v1369_v33, 1 }
 0x2b9   : > { %v1385_v6 = vadd.f32 %v1384_v22, %v1383_v44 }
 0x2ba   : > { %v1371_v41 = vadd.f32 %v1370_v38, %v1369_v33 }
 0x2bc   : > { %v1403_v7 = vsel %vm1402_vm10, %v1371_v41, %v1401_v5 }
 0x2bd   : > { %v1405_v8 = vsel %vm1404_vm11, %v1378_v40, %v1403_v7 }
 0x2be   : > { %v1407_v9 = vsel %vm1406_vm12, %v1385_v6, %v1405_v8 }
 0x2bf   : > { %1409 = vst.msk [vmem:[%s645_s19] sm:$0xff] %vm762_vm4, %v1407_v9 }
 0x2c0 PF: > { %s27_s15 = sadd.s32 1, %s1946_s15   ;;  %s2400_s29 = smov %s1942_s30 }
 0x2c1   : > { %p24_p3 = scmp.ge.s32.totalorder %s27_s15, 4   ;;  %s2401_s30 = smov %s2403_s17 }
 0x2c3   :  { %26 = sbr.rel (!%p24_p3) target bundleno = 3 (0x3), region = 135 }
 0x2c8   :  { %1509 = vsyncpa [#allocation3], 1 }
 0x2c9   :  { %1511 = vsyncpa [#allocation3 + $0x1], 1 }
 0x2ca   :  { %1512 = vsyncpa [#allocation5], 1 }

// kernel: dense_gnn_forward.12
= control target key start
LH: loop header
LB: loop body
LE: loop exit
PB: predicated region body
PF: predicated region fallthrough
CT: control target
= control target key end

     0   :  { %v395_v0 = vmov 0.0   ;;  %vm396_vm0 = vmmov 0   ;;  %vm62_vm1 = vcmask 261120   ;;  %vm107_vm2 = vcmask 523264   ;;  %s629_s3 = inlined_call_operand.vmem [shape: f32[64,64], index: 3, kind: input, shape index: {}]   ;;  %s630_s4 = inlined_call_operand.vmem [shape: f32[32,64], index: 4, kind: input, shape index: {}]   ;;  %s631_s1 = inlined_call_operand.vmem [shape: f32[16,32], index: 1, kind: input, shape index: {}]   ;;  %s632_s0 = inlined_call_operand.vmem [shape: f32[16,64], index: 0, kind: input, shape index: {}]   ;;  %s633_s6 = inlined_call_operand.vmem [shape: f32[64,64], index: 6, kind: input, shape index: {}]   ;;  %s634_s2 = inlined_call_operand.vmem [shape: f32[16,1], index: 2, kind: input, shape index: {}]   ;;  %s635_s8 = inlined_call_operand.vmem [shape: f32[64,192], index: 8, kind: input, shape index: {}]   ;;  %s636_s5 = inlined_call_operand.vmem [shape: f32[1,64], index: 5, kind: input, shape index: {}]   ;;  %s637_s7 = inlined_call_operand.vmem [shape: f32[1,64], index: 7, kind: input, shape index: {}]   ;;  %s638_s10 = inlined_call_operand.vmem [shape: f32[16,64], index: 10, kind: output, shape index: {0}]   ;;  %s639_s9 = inlined_call_operand.vmem [shape: f32[1,192], index: 9, kind: input, shape index: {}]   ;;  %s640_s11 = inlined_call_operand.vmem [shape: f32[16,192], index: 11, kind: output, shape index: {1}]  }
   0x1   :  { %367 = vmatprep.subr.bf16.mxu1 %v395_v0  ;;  %v47_v1 = vld [vmem:[%s629_s3 + $0x30] sm:$0xff]  ;;  %v48_v2 = vld [vmem:[%s629_s3 + $0x38] sm:$0xff]  ;;  %359 = vmatprep.subr.bf16.mxu0 %v395_v0  ;;  %v45_v6 = vld [vmem:[%s629_s3 + $0x20] sm:$0xff]  ;;  %v397_v37 = vmov 0  }
   0x2   :  { %v58_v3 = vld [vmem:[%s630_s4 + $0x10] sm:$0xff]  ;;  %v52_v4 = vpack.c.bf16 %v48_v2, %v47_v1  ;;  %v59_v5 = vld [vmem:[%s630_s4 + $0x18] sm:$0xff]  ;;  %v46_v7 = vld [vmem:[%s629_s3 + $0x28] sm:$0xff]  ;;  %363 = vmatprep.mubr.msk.bf16.mxu0 %vm396_vm0, %v395_v0  ;;  %375 = vmatprep.mubr.msk.bf16.mxu1 %vm396_vm0, %v395_v0 }
   0x3   :  { %v61_v8 = vpack.c.bf16 %v59_v5, %v58_v3  ;;  %v56_v9 = vld [vmem:[%s630_s4] sm:$0xff]  ;;  %v57_v10 = vld [vmem:[%s630_s4 + $0x8] sm:$0xff]  ;;  %v51_v11 = vpack.c.bf16 %v46_v7, %v45_v6  ;;  %v43_v12 = vld [vmem:[%s629_s3 + $0x10] sm:$0xff]  ;;  %394 = vset.pattern.permute.xlu0 %v397_v37 }
   0x4   :  { %368 = vmatpush3.bf16.msra.mxu1 %v52_v4  ;;  %v60_v13 = vpack.c.bf16 %v57_v10, %v56_v9  ;;  %v44_v14 = vld [vmem:[%s629_s3 + $0x18] sm:$0xff]  ;;  %v53_v15 = vld [vmem:[%s631_s1] sm:$0xff]  ;;  %v54_v16 = vld [vmem:[%s631_s1 + $0x8] sm:$0xff] }
   0x5   :  { %360 = vmatpush3.bf16.msra.mxu0 %v61_v8  ;;  %369 = vmatprep.subr.bf16.mxu1 %v395_v0  ;;  %v50_v17 = vpack.c.bf16 %v44_v14, %v43_v12  ;;  %v55_v18 = vpack.c.bf16 %v54_v16, %v53_v15  ;;  %v41_v19 = vld [vmem:[%s629_s3] sm:$0xff]  ;;  %v42_v20 = vld [vmem:[%s629_s3 + $0x8] sm:$0xff]  ;;  %v170_v25 = vld [vmem:[%s633_s6 + $0x30] sm:$0xff] }
   0x6   :  { %361 = vmatprep.subr.bf16.mxu0 %v395_v0  ;;  %v49_v21 = vpack.c.bf16 %v42_v20, %v41_v19  ;;  %v505_v22 = vld [vmem:[%s632_s0] sm:$0xff]  ;;  %v510_v23 = vld [vmem:[%s632_s0 + $0x8] sm:$0xff]  ;;  %v171_v26 = vld [vmem:[%s633_s6 + $0x38] sm:$0xff] }
   0x7   :  { %v40_v24 = vpack.c.bf16 %v510_v23, %v505_v22  ;;  %v175_v27 = vpack.c.bf16 %v171_v26, %v170_v25  ;;  %v168_v28 = vld [vmem:[%s633_s6 + $0x20] sm:$0xff]  ;;  %v169_v29 = vld [vmem:[%s633_s6 + $0x28] sm:$0xff]  ;;  %v166_v31 = vld [vmem:[%s633_s6 + $0x10] sm:$0xff] }
   0x8   :  { %370 = vmatpush3.bf16.msra.mxu1 %v51_v11  ;;  %v174_v30 = vpack.c.bf16 %v169_v29, %v168_v28  ;;  %v167_v32 = vld [vmem:[%s633_s6 + $0x18] sm:$0xff]  ;;  %v164_v34 = vld [vmem:[%s633_s6] sm:$0xff]  ;;  %v165_v35 = vld [vmem:[%s633_s6 + $0x8] sm:$0xff] }
   0x9   :  { %362 = vmatpush3.bf16.msra.mxu0 %v60_v13  ;;  %371 = vmatprep.subr.bf16.mxu1 %v395_v0  ;;  %v173_v33 = vpack.c.bf16 %v167_v32, %v166_v31  ;;  %v172_v36 = vpack.c.bf16 %v165_v35, %v164_v34  ;;  %v227_v38 = vld [vmem:[%s634_s2] sm:$0xff]  ;;  %v259_v39 = vld [vmem:[%s635_s8 + $0x68] sm:$0xff]  ;;  %v261_v40 = vld [vmem:[%s635_s8 + $0x78] sm:$0xff] }
   0xa   :  { %379 = vmatprep.subr.bf16.mxu0 %v395_v0  ;;  %231 = vperm.xlu0 %394, %v227_v38   ;;  %v258_v41 = vld [vmem:[%s635_s8 + $0x60] sm:$0xff]  ;;  %v260_v42 = vld [vmem:[%s635_s8 + $0x70] sm:$0xff]  ;;  %v228_v43 = vld [vmem:[%s634_s2 + $0x8] sm:$0xff]  ;;  %v269_v44 = vpack.c.bf16 %v261_v40, %v259_v39 }
   0xb   :  { %v268_v45 = vpack.c.bf16 %v260_v42, %v258_v41  ;;  %v342_v52 = vld [vmem:[%s636_s5] ss:$0 sm:$0xff]  ;;  %v255_v62 = vld [vmem:[%s635_s8 + $0x48] sm:$0xff]  ;;  %v257_v63 = vld [vmem:[%s635_s8 + $0x58] sm:$0xff] }
   0xc   :  { %372 = vmatpush3.bf16.msra.mxu1 %v50_v17  ;;  %364 = vmatmul.mubr.msk.bf16.vlgmr.msra.gmra.mxu0 %vm62_vm1, %v55_v18  ;;  %v254_v1 = vld [vmem:[%s635_s8 + $0x40] sm:$0xff]  ;;  %v256_v2 = vld [vmem:[%s635_s8 + $0x50] sm:$0xff]  ;;  %v251_v4 = vld [vmem:[%s635_s8 + $0x28] sm:$0xff] }
   0xd   :  { %373 = vmatprep.subr.bf16.mxu1 %v395_v0  ;;  %387 = vmatprep.mubr.msk.bf16.mxu0 %vm396_vm0, %v395_v0  ;;  %v266_v3 = vpack.c.bf16 %v256_v2, %v254_v1  ;;  %v253_v5 = vld [vmem:[%s635_s8 + $0x38] sm:$0xff]  ;;  %v250_v7 = vld [vmem:[%s635_s8 + $0x20] sm:$0xff]  ;;  %v252_v8 = vld [vmem:[%s635_s8 + $0x30] sm:$0xff] }
   0xe   :  { %380 = vmatpush3.bf16.msra.mxu0 %v175_v27  ;;  %236 = vperm.xlu0 %394, %v228_v43   ;;  %v265_v6 = vpack.c.bf16 %v253_v5, %v251_v4  ;;  %v264_v9 = vpack.c.bf16 %v252_v8, %v250_v7  ;;  %v247_v10 = vld [vmem:[%s635_s8 + $0x8] sm:$0xff]  ;;  %v249_v11 = vld [vmem:[%s635_s8 + $0x18] sm:$0xff]  ;;  %v246_v13 = vld [vmem:[%s635_s8] sm:$0xff] }
   0xf   :  { %381 = vmatprep.subr.bf16.mxu0 %v395_v0  ;;  %v263_v12 = vpack.c.bf16 %v249_v11, %v247_v10  ;;  %v248_v14 = vld [vmem:[%s635_s8 + $0x10] sm:$0xff]  ;;  %v343_v16 = vld [vmem:[%s637_s7] ss:$0 sm:$0xff] }
  0x10   :  { %374 = vmatpush3.bf16.msra.mxu1 %v49_v21  ;;  %v262_v15 = vpack.c.bf16 %v248_v14, %v246_v13  ;;  %v270_v34 = vld [vmem:[%s639_s9] sm:$0x3] }
  0x11   :  { %293 = vmatprep.subr.bf16.mxu1 %v269_v44 }
  0x12   :  { %382 = vmatpush3.bf16.msra.mxu0 %v174_v30 }
  0x13   :  { %376 = vmatmul.mubr.msk.bf16.vlgmr.msra.gmra.mxu1 %vm107_vm2, %v40_v24  ;;  %383 = vmatprep.subr.bf16.mxu0 %v395_v0 }
  0x14   :  { %317 = vmatprep.mubr.bf16.mxu1 %v397_v37  ;;  %294 = vmatpush1.bf16.msra.mxu1 %v268_v45 }
  0x16   :  { %384 = vmatpush3.bf16.msra.mxu0 %v173_v33 }
  0x17   :  { %385 = vmatprep.subr.bf16.mxu0 %v395_v0  ;;  %v267_v0 = vpack.c.bf16 %v257_v63, %v255_v62 }
  0x19   :  { %295 = vmatprep.subr.bf16.mxu1 %v267_v0 }
  0x1a   :  { %386 = vmatpush3.bf16.msra.mxu0 %v172_v36  ;;  %296 = vmatpush1.bf16.msra.mxu1 %v266_v3 }
  0x1b   :  { %297 = vmatprep.subr.bf16.mxu1 %v265_v6 }
  0x1e   :  { %298 = vmatpush1.bf16.msra.mxu1 %v264_v9 }
  0x1f   :  { %299 = vmatprep.subr.bf16.mxu1 %v263_v12 }
  0x22   :  { %300 = vmatpush1.bf16.msra.mxu1 %v262_v15 }
  0x85   :  { %v232_v17 = vpop.permute.xlu0 %231 }
  0x89   :  { %v237_v27 = vpop.permute.xlu0 %236 }
  0xcc   :  { %v100_v46 = vpop.f32.mrf.mxu0 }
  0xce   :  { %v365_v47 = vpop.f32.mrf.mxu0 }
  0xd0   :  { %v103_v48 = vpop.f32.mrf.mxu0 }
  0xd2   :  { %v366_v49 = vpop.f32.mrf.mxu0 }
  0xd3   :  { %v145_v50 = vpop.f32.mrf.mxu1 }
  0xd4   :  { %v146_v51 = vadd.f32 %v145_v50, %v100_v46 }
  0xd5   :  { %v377_v53 = vpop.f32.mrf.mxu1 }
  0xd6   :  { %v159_v55 = vadd.f32 %v342_v52, %v146_v51 }
  0xd7   :  { %v148_v54 = vpop.f32.mrf.mxu1 }
  0xd8   :  { %v149_v56 = vadd.f32 %v148_v54, %v103_v48  ;;  %v161_v59 = vmax.f32 %v159_v55, 0.0 }
  0xd9   :  { %v378_v57 = vpop.f32.mrf.mxu1 }
  0xda   :  { %v160_v58 = vadd.f32 %v342_v52, %v149_v56 }
  0xdc   :  { %v162_v60 = vmax.f32 %v160_v58, 0.0 }
  0xde   :  { %v163_v61 = vpack.c.bf16 %v162_v60, %v161_v59 }
  0xe0   :  { %388 = vmatmul.mubr.msk.bf16.vlgmr.msra.gmra.mxu0 %vm107_vm2, %v163_v61 }
 0x1a0   :  { %v220_v18 = vpop.f32.mrf.mxu0 }
 0x1a1   :  { %v221_v19 = vadd.f32 %v343_v16, %v220_v18 }
 0x1a2   :  { %v389_v20 = vpop.f32.mrf.mxu0 }
 0x1a3   :  { %v239_v21 = vmul.f32 %v232_v17, %v221_v19 }
 0x1a4   :  { %v223_v24 = vpop.f32.mrf.mxu0 }
 0x1a5   :  { %v241_v25 = vadd.f32 %v239_v21, %v505_v22  ;;  %v224_v26 = vadd.f32 %v343_v16, %v223_v24  ;;  %v272_v22 = vlaneseq }
 0x1a6   :  { %v390_v28 = vpop.f32.mrf.mxu0 }
 0x1a7   :  { %243 = vst.msk [vmem:[%s638_s10] sm:$0xff] %vm107_vm2, %v241_v25  ;;  %v240_v29 = vmul.f32 %v237_v27, %v224_v26  ;;  %v273_v32 = vshrl.u32 %v272_v22, 7 }
 0x1a9   :  { %v242_v30 = vadd.f32 %v240_v29, %v510_v23  ;;  %v274_v33 = vsub.s32 0, %v273_v32  ;;  %v278_v35 = vsub.s32 1, %v273_v32 }
 0x1ab   :  { %244 = vst.msk [vmem:[%s638_s10 + $0x8] sm:$0xff] %vm107_vm2, %v242_v30  ;;  %v245_v31 = vpack.c.bf16 %v242_v30, %v241_v25  ;;  %v275_v36 = vrot.slane %v270_v34, %v274_v33  ;;  %v279_v37 = vrot.slane %v270_v34, %v278_v35 }
 0x1ad   :  { %345 = vmatmul.mubr.msk.bf16.vlgmr.msra.gmra.mxu1 %vm107_vm2, %v245_v31 }
 0x26d   :  { %v319_v38 = vpop.f32.mrf.mxu1 }
 0x26e   :  { %v320_v23 = vadd.f32 %v319_v38, %v275_v36 }
 0x26f   :  { %v321_v39 = vpop.f32.mrf.mxu1 }
 0x270   :  { %328 = vst [vmem:[%s640_s11] sm:$0xff] %v320_v23  ;;  %v322_v40 = vadd.f32 %v321_v39, %v279_v37 }
 0x271   :  { %v323_v41 = vpop.f32.mrf.mxu1 }
 0x272   :  { %329 = vst.msk [vmem:[%s640_s11 + $0x8] sm:$0xff] %vm107_vm2, %v322_v40  ;;  %v324_v42 = vadd.f32 %v323_v41, %v275_v36 }
 0x273   :  { %v325_v43 = vpop.f32.mrf.mxu1 }
 0x274   :  { %330 = vst [vmem:[%s640_s11 + $0x10] sm:$0xff] %v324_v42  ;;  %v326_v44 = vadd.f32 %v325_v43, %v279_v37 }
 0x276   :  { %331 = vst.msk [vmem:[%s640_s11 + $0x18] sm:$0xff] %vm107_vm2, %v326_v44 }

// kernel: dense_gnn_forward.14
= control target key start
LH: loop header
LB: loop body
LE: loop exit
PB: predicated region body
PF: predicated region fallthrough
CT: control target
= control target key end

     0   :  { %v173_v0 = vmov 0.0   ;;  %vm174_vm0 = vmmov 0   ;;  %vm46_vm1 = vcmask 523264   ;;  %s268_s2 = inlined_call_operand.vmem [shape: f32[64,64], index: 2, kind: input, shape index: {}]   ;;  %s269_s1 = inlined_call_operand.vmem [shape: f32[16,64], index: 1, kind: input, shape index: {}]   ;;  %s270_s3 = inlined_call_operand.vmem [shape: f32[1,64], index: 3, kind: input, shape index: {}]   ;;  %s271_s0 = inlined_call_operand.vmem [shape: f32[16,64], index: 0, kind: input, shape index: {}]   ;;  %s272_s4 = inlined_call_operand.vmem [shape: f32[1,64], index: 4, kind: input, shape index: {}]   ;;  %s273_s5 = inlined_call_operand.vmem [shape: f32[1,64], index: 5, kind: input, shape index: {}]   ;;  %s274_s6 = inlined_call_operand.vmem [shape: f32[16,64], index: 6, kind: output, shape index: {}]  }
   0x1   :  { %155 = vmatprep.subr.bf16.mxu0 %v173_v0  ;;  %v33_v1 = vld [vmem:[%s268_s2 + $0x30] sm:$0xff]  ;;  %v34_v2 = vld [vmem:[%s268_s2 + $0x38] sm:$0xff]  ;;  %v31_v3 = vld [vmem:[%s268_s2 + $0x20] sm:$0xff]  ;;  %163 = vmatprep.mubr.msk.bf16.mxu0 %vm174_vm0, %v173_v0 }
   0x2   :  { %v38_v4 = vpack.c.bf16 %v34_v2, %v33_v1  ;;  %v32_v5 = vld [vmem:[%s268_s2 + $0x28] sm:$0xff]  ;;  %v29_v7 = vld [vmem:[%s268_s2 + $0x10] sm:$0xff]  ;;  %v30_v8 = vld [vmem:[%s268_s2 + $0x18] sm:$0xff] }
   0x3   :  { %v37_v6 = vpack.c.bf16 %v32_v5, %v31_v3  ;;  %v36_v9 = vpack.c.bf16 %v30_v8, %v29_v7  ;;  %v27_v10 = vld [vmem:[%s268_s2] sm:$0xff]  ;;  %v28_v11 = vld [vmem:[%s268_s2 + $0x8] sm:$0xff] }
   0x4   :  { %156 = vmatpush3.bf16.msra.mxu0 %v38_v4  ;;  %v35_v12 = vpack.c.bf16 %v28_v11, %v27_v10  ;;  %v24_v13 = vld [vmem:[%s269_s1] sm:$0xff]  ;;  %v25_v14 = vld [vmem:[%s269_s1 + $0x8] sm:$0xff] }
   0x5   :  { %157 = vmatprep.subr.bf16.mxu0 %v173_v0  ;;  %v26_v15 = vpack.c.bf16 %v25_v14, %v24_v13  ;;  %v146_v16 = vld [vmem:[%s270_s3] ss:$0 sm:$0xff]  ;;  %v92_v23 = vld [vmem:[%s271_s0 + $0x8] sm:$0xff] }
   0x6   :  { %v91_v18 = vld [vmem:[%s271_s0] sm:$0xff] }
   0x7   :  { %v148_v46 = vld [vmem:[%s272_s4] ss:$0 sm:$0xff] }
   0x8   :  { %158 = vmatpush3.bf16.msra.mxu0 %v37_v6  ;;  %v149_v48 = vld [vmem:[%s273_s5] ss:$0 sm:$0xff] }
   0x9   :  { %159 = vmatprep.subr.bf16.mxu0 %v173_v0 }
   0xc   :  { %160 = vmatpush3.bf16.msra.mxu0 %v36_v9 }
   0xd   :  { %161 = vmatprep.subr.bf16.mxu0 %v173_v0 }
  0x10   :  { %162 = vmatpush3.bf16.msra.mxu0 %v35_v12 }
  0x13   :  { %164 = vmatmul.mubr.msk.bf16.vlgmr.msra.gmra.mxu0 %vm46_vm1, %v26_v15 }
  0xd3   :  { %v84_v17 = vpop.f32.mrf.mxu0 }
  0xd4   :  { %v85_v19 = vadd.f32 %v146_v16, %v84_v17 }
  0xd5   :  { %v165_v20 = vpop.f32.mrf.mxu0 }
  0xd6   :  { %v93_v21 = vadd.f32 %v91_v18, %v85_v19 }
  0xd7   :  { %v87_v22 = vpop.f32.mrf.mxu0 }
  0xd8   :  { %v88_v24 = vadd.f32 %v146_v16, %v87_v22  ;;  %v95_v25 = vsel %vm46_vm1, %v93_v21, 0.0 }
  0xd9   :  { %v166_v26 = vpop.f32.mrf.mxu0  ;;  %96 = vadd.xlane.f32.xlu0 %v95_v25 }
  0xda   :  { %v94_v27 = vadd.f32 %v92_v23, %v88_v24 }
  0xdc   :  { %v98_v28 = vsel %vm46_vm1, %v94_v27, 0.0 }
  0xdd   :  { %99 = vadd.xlane.f32.xlu0 %v98_v28 }
 0x162   :  { %v97_v29 = vpop.xlane.xlu0 %96 }
 0x163   :  { %v102_v30 = vmul.f32 0.015625, %v97_v29 }
 0x165   :  { %v104_v31 = vsub.f32 %v93_v21, %v102_v30 }
 0x166   :  { %v100_v32 = vpop.xlane.xlu0 %99 }
 0x167   :  { %v103_v33 = vmul.f32 0.015625, %v100_v32  ;;  %v106_v34 = vmul.f32 %v104_v31, %v104_v31 }
 0x169   :  { %v105_v35 = vsub.f32 %v94_v27, %v103_v33  ;;  %v108_v36 = vsel %vm46_vm1, %v106_v34, 0.0 }
 0x16a   :  { %109 = vadd.xlane.f32.xlu1 %v108_v36 }
 0x16b   :  { %v107_v37 = vmul.f32 %v105_v35, %v105_v35 }
 0x16d   :  { %v111_v38 = vsel %vm46_vm1, %v107_v37, 0.0 }
 0x16e   :  { %112 = vadd.xlane.f32.xlu1 %v111_v38 }
 0x1f3   :  { %v110_v39 = vpop.xlane.xlu1 %109 }
 0x1f4   :  { %v114_v40 = vmul.f32 0.015625, %v110_v39 }
 0x1f6   :  { %v116_v41 = vadd.f32 1e-05, %v114_v40 }
 0x1f7   :  { %v113_v42 = vpop.xlane.xlu1 %112 }
 0x1f8   :  { %169 = vrsqrt.f32 %v116_v41  ;;  %v115_v43 = vmul.f32 0.015625, %v113_v42 }
 0x1fa   :  { %v117_v44 = vadd.f32 1e-05, %v115_v43 }
 0x1fc   :  { %171 = vrsqrt.f32 %v117_v44 }
 0x205   :  { %v170_v45 = vpop.eup %169 }
 0x206   :  { %v120_v47 = vmul.f32 %v170_v45, %v104_v31 }
 0x208   :  { %v129_v49 = vmul.f32 %v148_v46, %v120_v47 }
 0x209   :  { %v172_v50 = vpop.eup %171 }
 0x20a   :  { %v138_v51 = vadd.f32 %v149_v48, %v129_v49  ;;  %v121_v52 = vmul.f32 %v172_v50, %v105_v35 }
 0x20c   :  { %140 = vst.msk [vmem:[%s274_s6] sm:$0xff] %vm46_vm1, %v138_v51  ;;  %v130_v53 = vmul.f32 %v148_v46, %v121_v52 }
 0x20e   :  { %v139_v54 = vadd.f32 %v149_v48, %v130_v53 }
 0x210   :  { %141 = vst.msk [vmem:[%s274_s6 + $0x8] sm:$0xff] %vm46_vm1, %v139_v54 }

// kernel: dense_gnn_forward.19
= control target key start
LH: loop header
LB: loop body
LE: loop exit
PB: predicated region body
PF: predicated region fallthrough
CT: control target
= control target key end

     0   :  { %v239_v3 = vmov 0.0   ;;  %vm240_vm0 = vmmov 0   ;;  %s339_s0 = inlined_call_operand.vmem [shape: f32[16,64], index: 0, kind: input, shape index: {}]   ;;  %s340_s1 = inlined_call_operand.vmem [shape: f32[64,64], index: 1, kind: input, shape index: {}]   ;;  %s341_s2 = inlined_call_operand.vmem [shape: f32[1,64], index: 2, kind: input, shape index: {}]   ;;  %s342_s3 = inlined_call_operand.vmem [shape: f32[64,16], index: 3, kind: input, shape index: {}]   ;;  %s343_s4 = inlined_call_operand.vmem [shape: f32[1,16], index: 4, kind: input, shape index: {}]   ;;  %s344_s5 = inlined_call_operand.hbm [shape: f32[16,16], index: 5, kind: output, shape index: {}]  }
   0x1   :  { %v31_v0 = vld [vmem:[%s340_s1 + $0x30] sm:$0xff]  ;;  %v32_v1 = vld [vmem:[%s340_s1 + $0x38] sm:$0xff]  ;;  %v29_v2 = vld [vmem:[%s340_s1 + $0x20] sm:$0xff]  ;;  %188 = vmatprep.subr.bf16.mxu0 %v239_v3  ;;  %196 = vmatprep.mubr.msk.bf16.mxu0 %vm240_vm0, %v239_v3 }
   0x2   :  { %v36_v4 = vpack.c.bf16 %v32_v1, %v31_v0  ;;  %v30_v5 = vld [vmem:[%s340_s1 + $0x28] sm:$0xff]  ;;  %200 = vmatprep.subr.bf16.mxu1 %v239_v3  ;;  %208 = vmatprep.mubr.msk.bf16.mxu1 %vm240_vm0, %v239_v3  ;;  %v98_v7 = vld [vmem:[%s342_s3 + $0x30] sm:$0xff]  ;;  %v99_v8 = vld [vmem:[%s342_s3 + $0x38] sm:$0xff] }
   0x3   :  { %v35_v6 = vpack.c.bf16 %v30_v5, %v29_v2  ;;  %v27_v9 = vld [vmem:[%s340_s1 + $0x10] sm:$0xff]  ;;  %v28_v10 = vld [vmem:[%s340_s1 + $0x18] sm:$0xff]  ;;  %v103_v11 = vpack.c.bf16 %v99_v8, %v98_v7 }
   0x4   :  { %189 = vmatpush3.bf16.msra.mxu0 %v36_v4 }
   0x5   :  { %190 = vmatprep.subr.bf16.mxu0 %v239_v3 }
   0x6   :  { %10 = vsyncpa [#allocation3], 0  ;;  %201 = vmatpush3.bf16.msra.mxu1 %v103_v11  ;;  %v34_v12 = vpack.c.bf16 %v28_v10, %v27_v9  ;;  %v25_v13 = vld [vmem:[%s340_s1] sm:$0xff]  ;;  %v26_v14 = vld [vmem:[%s340_s1 + $0x8] sm:$0xff]  ;;  %vm44_vm1 = vcmask 523264   ;;  %vm155_vm2 = vcmask 130048  }
   0x7   :  { %202 = vmatprep.subr.bf16.mxu1 %v239_v3  ;;  %v33_v15 = vpack.c.bf16 %v26_v14, %v25_v13  ;;  %v22_v16 = vld [vmem:[%s339_s0] sm:$0xff]  ;;  %v23_v17 = vld [vmem:[%s339_s0 + $0x8] sm:$0xff]  ;;  %v94_v22 = vld [vmem:[%s342_s3 + $0x10] sm:$0xff] }
   0x8   :  { %191 = vmatpush3.bf16.msra.mxu0 %v35_v6  ;;  %v24_v18 = vpack.c.bf16 %v23_v17, %v22_v16  ;;  %v96_v19 = vld [vmem:[%s342_s3 + $0x20] sm:$0xff]  ;;  %v97_v20 = vld [vmem:[%s342_s3 + $0x28] sm:$0xff]  ;;  %v95_v23 = vld [vmem:[%s342_s3 + $0x18] sm:$0xff] }
   0x9   :  { %192 = vmatprep.subr.bf16.mxu0 %v239_v3  ;;  %v102_v21 = vpack.c.bf16 %v97_v20, %v96_v19  ;;  %v101_v24 = vpack.c.bf16 %v95_v23, %v94_v22  ;;  %v92_v25 = vld [vmem:[%s342_s3] sm:$0xff]  ;;  %v93_v26 = vld [vmem:[%s342_s3 + $0x8] sm:$0xff]  ;;  %s241_s3 = smov [#allocation2]  }
   0xa   :  { %v100_v27 = vpack.c.bf16 %v93_v26, %v92_v25  ;;  %v174_v28 = vld [vmem:[%s341_s2] ss:$0 sm:$0xff]  ;;  %s163_s2 = sshll.u32 %s241_s3, 4  ;;  %s164_s2 = int_to_ptr.vmem [resolvable:$true] %s163_s2 }
   0xb   :  { %203 = vmatpush3.bf16.msra.mxu1 %v102_v21  ;;  %v176_v38 = vld [vmem:[%s343_s4] ss:$0 sm:$0xff]  ;;  %s217_s6 = scalar_lea.vmem %s164_s2, 256  ;;  %p222_p1 = scmp.lt.s32.totalorder %s164_s2, %s164_s2 }
   0xc   :  { %193 = vmatpush3.bf16.msra.mxu0 %v34_v12  ;;  %204 = vmatprep.subr.bf16.mxu1 %v239_v3  ;;  %p218_p0 = scmp.ne.s32.totalorder %s164_s2, %s217_s6  ;;  %p223_p2 = scmp.lt.s32.totalorder %s217_s6, %s217_s6 }
   0xd   :  { %194 = vmatprep.subr.bf16.mxu0 %v239_v3 }
   0xe   :  { %p224_p3 = por %p223_p2, %p222_p1 }
   0xf   :  { %205 = vmatpush3.bf16.msra.mxu1 %v101_v24 }
  0x10   :  { %195 = vmatpush3.bf16.msra.mxu0 %v33_v15  ;;  %206 = vmatprep.subr.bf16.mxu1 %v239_v3  ;;  %p225_p4 = pnand %p224_p3, %p218_p0 }
  0x13   :  { %197 = vmatmul.mubr.msk.bf16.vlgmr.msra.gmra.mxu0 %vm44_vm1, %v24_v18  ;;  %207 = vmatpush3.bf16.msra.mxu1 %v100_v27 }
  0xd3   :  { %v82_v29 = vpop.f32.mrf.mxu0 }
  0xd4   :  { %v83_v31 = vadd.f32 %v174_v28, %v82_v29 }
  0xd5   :  { %v198_v30 = vpop.f32.mrf.mxu0 }
  0xd6   :  { %v89_v35 = vmax.f32 %v83_v31, 0.0 }
  0xd7   :  { %v85_v32 = vpop.f32.mrf.mxu0 }
  0xd8   :  { %v86_v33 = vadd.f32 %v174_v28, %v85_v32 }
  0xd9   :  { %v199_v34 = vpop.f32.mrf.mxu0 }
  0xda   :  { %v90_v36 = vmax.f32 %v86_v33, 0.0 }
  0xdc   :  { %v91_v37 = vpack.c.bf16 %v90_v36, %v89_v35 }
  0xde   :  { %209 = vmatmul.mubr.msk.bf16.vlgmr.msra.gmra.mxu1 %vm44_vm1, %v91_v37 }
 0x19e   :  { %v148_v39 = vpop.f32.mrf.mxu1 }
 0x19f   :  { %v149_v40 = vadd.f32 %v176_v38, %v148_v39 }
 0x1a0   :  { %v210_v41 = vpop.f32.mrf.mxu1 }
 0x1a1   :  { %156 = vst.msk [vmem:[#allocation2] sm:$0xff] %vm155_vm2, %v149_v40 }
 0x1a2   :  { %v151_v42 = vpop.f32.mrf.mxu1 }
 0x1a3   :  { %v152_v43 = vadd.f32 %v176_v38, %v151_v42 }
 0x1a4   :  { %v211_v44 = vpop.f32.mrf.mxu1 }
 0x1a5   :  { %157 = vst.msk [vmem:[#allocation2 + $0x8] sm:$0xff] %vm155_vm2, %v152_v43 }
 0x1a6   :  { %228 = shalt.err (!%p225_p4)
}
 0x1a7   :  { %s242_s4 = smov 128   ;;  %s243_s7 = smov 8  }
 0x1a8   :  { %169 = dma.vmem_to_hbm [thread:$0]  %s164_s2, 256, %s344_s5, [#allocation3], %s242_s4, %s242_s4, %s243_s7  }
 0x1a9   :  { %237 = dma.done.wait [#allocation3], 256  }
 0x1aa   :  { %238 = vsyncadd [#allocation3], 4294967040 }
 0x1ab   :  { %173 = vsyncpa [#allocation3], 1 }

// kernel: dense_gnn_forward.15
= control target key start
LH: loop header
LB: loop body
LE: loop exit
PB: predicated region body
PF: predicated region fallthrough
CT: control target
= control target key end

     0   :  { %s1925_s29 = smov 0   ;;  %s1927_s30 = smov 0   ;;  %s2199_s0 = inlined_call_operand.vmem [shape: bf16[2,64,32], index: 0, kind: input, shape index: {}]   ;;  %s2200_s1 = inlined_call_operand.vmem [shape: f32[2,8,64], index: 1, kind: input, shape index: {}, may-alias: {1,2}]   ;;  %s2201_s2 = inlined_call_operand.vmem [shape: f32[2,8,64], index: 2, kind: input, shape index: {}, may-alias: {1,2}]   ;;  %s2202_s3 = inlined_call_operand.vmem [shape: f32[2,8,1], index: 3, kind: input, shape index: {}, may-alias: {3,4}]   ;;  %s2203_s4 = inlined_call_operand.vmem [shape: f32[2,8,1], index: 4, kind: input, shape index: {}, may-alias: {3,4}]   ;;  %s2204_s5 = inlined_call_operand.vmem [shape: f32[32,64], index: 5, kind: input, shape index: {}]   ;;  %s2205_s6 = inlined_call_operand.vmem [shape: f32[64,64], index: 6, kind: input, shape index: {}]   ;;  %s2206_s7 = inlined_call_operand.vmem [shape: f32[64,64], index: 7, kind: input, shape index: {}]   ;;  %s2207_s8 = inlined_call_operand.vmem [shape: f32[1,64], index: 8, kind: input, shape index: {}]   ;;  %s2208_s9 = inlined_call_operand.vmem [shape: f32[64,32], index: 9, kind: input, shape index: {}]   ;;  %s2209_s10 = inlined_call_operand.vmem [shape: f32[1,32], index: 10, kind: input, shape index: {}]   ;;  %s2210_s11 = inlined_call_operand.vmem [shape: f32[32,8], index: 11, kind: input, shape index: {}]   ;;  %s2211_s12 = inlined_call_operand.vmem [shape: f32[1,8], index: 12, kind: input, shape index: {}]   ;;  %s2212_s13 = inlined_call_operand.vmem [shape: bf16[2,64,8], index: 13, kind: output, shape index: {0}]   ;;  %s2213_s14 = inlined_call_operand.vmem [shape: f32[2,8,32], index: 14, kind: output, shape index: {1}]  }
   0x1   :  { %s1929_s15 = smov 0  }
   0x2 LB: > { %s37_s16 = sadd.s32 1, %s1840_s30  ;;  %p1638_p0 = scmp.ge.s32.totalorder %s1844_s15, 1  ;;  %s1844_s15 = sphi %s1929_s15, %s25_s15   ;;  %s1840_s30 = sphi %s1927_s30, %s2215_s30   ;;  %s1836_s29 = sphi %s1925_s29, %s2214_s29  }
   0x3   : > { %p39_p1 = scmp.ge.s32.totalorder %s37_s16, 2  ;;  %p484_p2 = scmp.lt.s32.totalorder %s1844_s15, 3 }
   0x5   : > { %s2217_s16 = smov (%p39_p1, %s37_s16), 0  ;;  %p485_p3 = pnand %p1638_p0, %p484_p2 }
   0x6   : > { %p568_p4 = scmp.lt.s32.totalorder (!%p485_p3), %s1836_s29, 1 }
   0x7   : > { %488 = sbr.rel (%p485_p3) target bundleno = 665 (0x299), region = 72 }
   0xc   : > { %v637_v0 = vld [vmem:[%s2204_s5 + $0x10] sm:$0xff]  ;;  %v638_v1 = vld [vmem:[%s2204_s5 + $0x18] sm:$0xff]  ;;  %v1846_v3 = vmov 0.0   ;;  %v635_v6 = vld [vmem:[%s2204_s5] sm:$0xff]  ;;  %s2219_s29 = smov (!%p568_p4, %s1836_s29), 1  ;;  %vm1847_vm0 = vmmov 0   ;;  %v857_v53 = vlaneseq }
   0xd   : > { %v746_v2 = vld [vmem:[%s2205_s6 + $0x30] sm:$0xff]  ;;  %1731 = vmatprep.subr.bf16.mxu1 %v1846_v3  ;;  %v640_v4 = vpack.c.bf16 %v638_v1, %v637_v0  ;;  %v747_v5 = vld [vmem:[%s2205_s6 + $0x38] sm:$0xff]  ;;  %v636_v7 = vld [vmem:[%s2204_s5 + $0x8] sm:$0xff]  ;;  %1739 = vmatprep.mubr.msk.bf16.mxu1 %vm1847_vm0, %v1846_v3  ;;  %s1679_s21 = sshll.u32 %s2219_s29, 5  ;;  %vm661_vm1 = vcmask 261120   ;;  %s1996_s22 = sshll.u32 %s2219_s29, 3 }
   0xe   : > { %v751_v8 = vpack.c.bf16 %v747_v5, %v746_v2  ;;  %v639_v9 = vpack.c.bf16 %v636_v7, %v635_v6  ;;  %v744_v10 = vld [vmem:[%s2205_s6 + $0x20] sm:$0xff]  ;;  %v745_v11 = vld [vmem:[%s2205_s6 + $0x28] sm:$0xff]  ;;  %v742_v13 = vld [vmem:[%s2205_s6 + $0x10] sm:$0xff]  ;;  %s575_s26 = scalar_lea.vmem %s2199_s0, %s1679_s21  ;;  %s583_s24 = scalar_lea.vmem %s2200_s1, %s1996_s22  ;;  %vm752_vm2 = vcmask 523264   ;;  %v1848_v51 = vmov 1966171168  }
   0xf   : > { %1719 = vmatprep.subr.bf16.mxu0 %v640_v4  ;;  %v750_v12 = vpack.c.bf16 %v745_v11, %v744_v10  ;;  %v743_v14 = vld [vmem:[%s2205_s6 + $0x18] sm:$0xff]  ;;  %v803_v15 = vld [vmem:[%s2206_s7 + $0x30] sm:$0xff]  ;;  %v1991_v17 = vld [vmem:[%s575_s26] sm:$0xff]   ;;  %s587_s25 = scalar_lea.vmem %s2201_s2, %s1996_s22  ;;  %v855_v52 = vunpack.c.l.s4 %v1848_v51  ;;  %v858_v55 = vshrl.u32 %v857_v53, 7  ;;  %v1849_v57 = vmov 0   ;;  %s598_s28 = scalar_lea.vmem %s2203_s4, %s1996_s22 }
  0x10   : > { %1732 = vmatpush3.bf16.msra.mxu1 %v751_v8  ;;  %1720 = vmatpush3.bf16.msra.mxu0 %v640_v4  ;;  %v804_v16 = vld [vmem:[%s2206_s7 + $0x38] sm:$0xff]  ;;  %v1993_v18 = vld [vmem:[%s575_s26 + $0x8] sm:$0xff]   ;;  %v1998_v19 = vld [vmem:[%s575_s26 + $0x10] sm:$0xff]   ;;  %v749_v20 = vpack.c.bf16 %v743_v14, %v742_v13  ;;  %vm1293_vm3 = vcmask 1041409   ;;  %vm1295_vm4 = vcmask 1042434   ;;  %vm1297_vm5 = vcmask 1043459   ;;  %s615_s20 = scalar_lea.vmem %s2213_s14, %s1996_s22 }
  0x11   : > { %1733 = vmatprep.subr.bf16.mxu1 %v1846_v3  ;;  %1721 = vmatprep.subr.bf16.mxu0 %v639_v9  ;;  %v808_v21 = vpack.c.bf16 %v804_v16, %v803_v15  ;;  %v740_v22 = vld [vmem:[%s2205_s6] sm:$0xff]  ;;  %v741_v23 = vld [vmem:[%s2205_s6 + $0x8] sm:$0xff]  ;;  %v2022_v29 = vld [vmem:[%s575_s26 + $0x18] sm:$0xff]   ;;  %v856_v54 = vunpack.c.0.s8 %v855_v52  ;;  %v2087_v61 = vsub.s32 0, %v858_v55  ;;  %vm1299_vm6 = vcmask 1044484  }
  0x12   : > { %1723 = vmatprep.mubr.msk.bf16.mxu0 %vm661_vm1, %v1991_v17  ;;  %v801_v24 = vld [vmem:[%s2206_s7 + $0x20] sm:$0xff]  ;;  %v802_v25 = vld [vmem:[%s2206_s7 + $0x28] sm:$0xff]  ;;  %v748_v26 = vpack.c.bf16 %v741_v23, %v740_v22  ;;  %v799_v30 = vld [vmem:[%s2206_s7 + $0x10] sm:$0xff]  ;;  %1811 = vset.pattern.permute.xlu0 %v1849_v57  ;;  %vm1301_vm7 = vcmask 1045509   ;;  %vm1303_vm8 = vcmask 1046534   ;;  %vm1305_vm9 = vcmask 1047559  }
  0x13   : > { %v807_v27 = vpack.c.bf16 %v802_v25, %v801_v24  ;;  %v633_v28 = vld [vmem:[%s583_s24] sm:$0xff]  ;;  %v800_v31 = vld [vmem:[%s2206_s7 + $0x18] sm:$0xff]  ;;  %v798_v35 = vld [vmem:[%s2206_s7 + $0x8] sm:$0xff]  ;;  %v2076_v56 = vsub.s32 %v856_v54, %v858_v55  ;;  %s594_s24 = scalar_lea.vmem %s2202_s3, %s1996_s22  ;;  %1812 = vset.pattern.permute.xlu1 %v1849_v57  ;;  %vm1443_vm10 = vcmask 60416  }
  0x14   : > { %1734 = vmatpush3.bf16.msra.mxu1 %v750_v12  ;;  %1722 = vmatpush3.bf16.msra.mxu0 %v639_v9  ;;  %v739_v32 = vpack.c.bf16 %v633_v28, %v633_v28  ;;  %v806_v33 = vpack.c.bf16 %v800_v31, %v799_v30  ;;  %v797_v34 = vld [vmem:[%s2206_s7] sm:$0xff]  ;;  %v991_v39 = vld [vmem:[%s2208_s9 + $0x30] sm:$0xff]  ;;  %v992_v40 = vld [vmem:[%s2208_s9 + $0x38] sm:$0xff] }
  0x15   : > { %1735 = vmatprep.subr.bf16.mxu1 %v1846_v3  ;;  %1743 = vmatprep.subr.bf16.mxu0 %v1846_v3  ;;  %v805_v36 = vpack.c.bf16 %v798_v35, %v797_v34  ;;  %v634_v37 = vld [vmem:[%s587_s25] sm:$0xff]  ;;  %v996_v41 = vpack.c.bf16 %v992_v40, %v991_v39  ;;  %v990_v43 = vld [vmem:[%s2208_s9 + $0x28] sm:$0xff]  ;;  %v987_v45 = vld [vmem:[%s2208_s9 + $0x10] sm:$0xff] }
  0x16   : > { %v796_v38 = vpack.c.bf16 %v634_v37, %v634_v37  ;;  %v989_v42 = vld [vmem:[%s2208_s9 + $0x20] sm:$0xff]  ;;  %v988_v46 = vld [vmem:[%s2208_s9 + $0x18] sm:$0xff]  ;;  %v986_v49 = vld [vmem:[%s2208_s9 + $0x8] sm:$0xff] }
  0x17   : > { %1724 = vmatmul.mubr.msk.bf16.vlgmr.msra.gmra.mxu0 %vm661_vm1, %v1993_v18  ;;  %v995_v44 = vpack.c.bf16 %v990_v43, %v989_v42  ;;  %v994_v47 = vpack.c.bf16 %v988_v46, %v987_v45  ;;  %v985_v48 = vld [vmem:[%s2208_s9] sm:$0xff] }
  0x18   : > { %1736 = vmatpush3.bf16.msra.mxu1 %v749_v20  ;;  %1744 = vmatpush3.bf16.msra.mxu0 %v808_v21  ;;  %v993_v50 = vpack.c.bf16 %v986_v49, %v985_v48  ;;  %v1081_v58 = vld [vmem:[%s594_s24] sm:$0xff] }
  0x19   : > { %1737 = vmatprep.subr.bf16.mxu1 %v1846_v3  ;;  %1745 = vmatprep.subr.bf16.mxu0 %v1846_v3  ;;  %v1090_v59 = vrot.slane %v1081_v58, %v2076_v56  ;;  %v1083_v60 = vcombine.high %v1081_v58, %v1081_v58  ;;  %v1132_v1 = vld [vmem:[%s598_s28] sm:$0xff]  ;;  %s2172_s28 = scalar_lea.vmem %s2212_s13, %s1679_s21 }
  0x1a   : > { %1727 = vmatprep.mubr.msk.bf16.mxu0 %vm661_vm1, %v1998_v19 }
  0x1b   : > { %v1106_v62 = vrot.slane %v1090_v59, %v2076_v56  ;;  %v1098_v63 = vcombine.high %v1090_v59, %v1090_v59  ;;  %v1097_v0 = vrot.slane %v1083_v60, %v2076_v56 }
  0x1c   : > { %1738 = vmatpush3.bf16.msra.mxu1 %v748_v26  ;;  %1746 = vmatpush3.bf16.msra.mxu0 %v807_v27 }
  0x1d   : > { %1747 = vmatprep.subr.bf16.mxu0 %v1846_v3  ;;  %1755 = vmatprep.subr.bf16.mxu1 %v996_v41  ;;  %v1136_v2 = vrot.slane %v1106_v62, %v2087_v61  ;;  %v1120_v4 = vrot.slane %v1098_v63, %v2076_v56  ;;  %v1113_v5 = vrot.slane %v1097_v0, %v2076_v56 }
  0x1e   : > { %v1099_v6 = vcombine.high %v1097_v0, %v1097_v0 }
  0x1f   : > { %1740 = vmatmul.mubr.msk.bf16.vlgmr.msra.gmra.mxu1 %vm752_vm2, %v739_v32  ;;  %1728 = vmatmul.mubr.msk.bf16.gmra.mxu0 %vm661_vm1, %v2022_v29  ;;  %v1173_v7 = vmul.f32 %v1136_v2, %v1132_v1  ;;  %v1140_v9 = vrot.slane %v1120_v4, %v2087_v61  ;;  %v1130_v10 = vcombine.high %v1120_v4, %v1120_v4  ;;  %v1658_v2 = vld [vmem:[%s2207_s8] ss:$0 sm:$0xff] }
  0x20   : > { %1748 = vmatpush3.bf16.msra.mxu0 %v806_v33  ;;  %1751 = vmatprep.mubr.msk.bf16.mxu0 %vm1847_vm0, %v1846_v3  ;;  %v1152_v11 = vrot.slane %v1113_v5, %v2087_v61  ;;  %v1127_v12 = vrot.slane %v1099_v6, %v2076_v56  ;;  %v1129_v16 = vcombine.high %v1113_v5, %v1113_v5 }
  0x21   : > { %1749 = vmatprep.subr.bf16.mxu0 %v1846_v3  ;;  %1756 = vmatpush3.bf16.msra.mxu1 %v996_v41  ;;  %v1128_v3 = vcombine.high %v1106_v62, %v1106_v62  ;;  %v1174_v14 = vmul.f32 %v1140_v9, %v1132_v1  ;;  %v1148_v15 = vrot.slane %v1130_v10, %v2087_v61 }
  0x22   : > { %1757 = vmatprep.subr.bf16.mxu1 %v995_v44  ;;  %1183 = vperm.xlu0 %1811, %v1173_v7   ;;  %v1156_v21 = vrot.slane %v1127_v12, %v2087_v61  ;;  %v1131_v22 = vcombine.high %v1127_v12, %v1127_v12  ;;  %v1177_v23 = vmul.f32 %v1152_v11, %v1132_v1 }
  0x23   : > { %v1144_v8 = vrot.slane %v1128_v3, %v2087_v61  ;;  %v1176_v20 = vmul.f32 %v1148_v15, %v1132_v1  ;;  %v1160_v24 = vrot.slane %v1129_v16, %v2087_v61 }
  0x24   : > { %1750 = vmatpush3.bf16.msra.mxu0 %v805_v36  ;;  %v1178_v25 = vmul.f32 %v1156_v21, %v1132_v1  ;;  %v1164_v26 = vrot.slane %v1131_v22, %v2087_v61 }
  0x25   : > { %1758 = vmatpush3.bf16.msra.mxu1 %v995_v44  ;;  %v1175_v13 = vmul.f32 %v1144_v8, %v1132_v1  ;;  %v1179_v27 = vmul.f32 %v1160_v24, %v1132_v1 }
  0x26   : > { %1759 = vmatprep.subr.bf16.mxu1 %v994_v47  ;;  %1188 = vperm.xlu0 %1811, %v1174_v14   ;;  %v1180_v28 = vmul.f32 %v1164_v26, %v1132_v1 }
  0x27   : > { %1752 = vmatmul.mubr.msk.bf16.vlgmr.msra.gmra.mxu0 %vm752_vm2, %v796_v38  ;;  %1193 = vperm.xlu1 %1812, %v1175_v13  }
  0x29   : > { %1760 = vmatpush3.bf16.msra.mxu1 %v994_v47 }
  0x2a   : > { %1761 = vmatprep.subr.bf16.mxu1 %v993_v50  ;;  %1203 = vperm.xlu0 %1811, %v1177_v23  }
  0x2b   : > { %1198 = vperm.xlu1 %1812, %v1176_v20  }
  0x2d   : > { %1762 = vmatpush3.bf16.msra.mxu1 %v993_v50 }
  0x2e   : > { %1213 = vperm.xlu0 %1811, %v1179_v27  }
  0x2f   : > { %1208 = vperm.xlu1 %1812, %v1178_v25  }
  0x33   : > { %1218 = vperm.xlu1 %1812, %v1180_v28  }
  0xd7   : > { %v1725_v30 = vpop.f32.mrf.mxu0 }
  0xd9   : > { %v708_v31 = vpop.f32.mrf.mxu0 }
  0xdb   : > { %v1726_v32 = vpop.f32.mrf.mxu0 }
  0xdd   : > { %v711_v33 = vpop.f32.mrf.mxu0 }
  0xdf   : > { %v790_v34 = vpop.f32.mrf.mxu1  ;;  %v1729_v35 = vpop.f32.mrf.mxu0 }
  0xe0   : > { %v853_v36 = vcombine.high %v790_v34, %v790_v34  ;;  %v860_v37 = vrot.slane %v790_v34, %v2076_v56 }
  0xe1   : > { %v1741_v38 = vpop.f32.mrf.mxu1  ;;  %v724_v39 = vpop.f32.mrf.mxu0 }
  0xe2   : > { %v867_v40 = vrot.slane %v853_v36, %v2076_v56  ;;  %v868_v41 = vcombine.high %v860_v37, %v860_v37  ;;  %v876_v42 = vrot.slane %v860_v37, %v2076_v56 }
  0xe3   : > { %v793_v43 = vpop.f32.mrf.mxu1  ;;  %v1730_v44 = vpop.f32.mrf.mxu0 }
  0xe4   : > { %v869_v45 = vcombine.high %v867_v40, %v867_v40  ;;  %v883_v46 = vrot.slane %v867_v40, %v2076_v56  ;;  %v890_v47 = vrot.slane %v868_v41, %v2076_v56  ;;  %v898_v48 = vcombine.high %v876_v42, %v876_v42 }
  0xe5   : > { %v905_v49 = vrot.slane %v876_v42, %v2087_v61  ;;  %v1742_v50 = vpop.f32.mrf.mxu1  ;;  %v727_v51 = vpop.f32.mrf.mxu0 }
  0xe6   : > { %v900_v52 = vcombine.high %v890_v47, %v890_v47  ;;  %v909_v53 = vrot.slane %v890_v47, %v2087_v61  ;;  %v913_v54 = vrot.slane %v898_v48, %v2087_v61  ;;  %v899_v55 = vcombine.high %v883_v46, %v883_v46  ;;  %v1321_v47 = vld [vmem:[%s2210_s11] sm:$0xff]  ;;  %v1322_v48 = vld [vmem:[%s2210_s11 + $0x8] sm:$0xff]  ;;  %v1184_v50 = vpop.permute.xlu0 %1183 }
  0xe7   : > { %v942_v57 = vadd.f32 %v905_v49, %v708_v31  ;;  %v921_v58 = vrot.slane %v883_v46, %v2087_v61  ;;  %v897_v59 = vrot.slane %v869_v45, %v2076_v56  ;;  %v846_v60 = vpop.f32.mrf.mxu0  ;;  %v1324_v45 = vld [vmem:[%s2210_s11 + $0x18] sm:$0xff]  ;;  %v1325_v49 = vpack.c.bf16 %v1322_v48, %v1321_v47 }
  0xe8   : > { %v917_v62 = vrot.slane %v900_v52, %v2087_v61  ;;  %v943_v63 = vadd.f32 %v909_v53, %v711_v33  ;;  %v944_v0 = vadd.f32 %v1725_v30, %v913_v54  ;;  %v929_v1 = vrot.slane %v899_v55, %v2087_v61  ;;  %v1659_v53 = vld [vmem:[%s2209_s10] ss:$0 sm:$0xff] }
  0xe9   : > { %v946_v3 = vadd.f32 %v921_v58, %v724_v39  ;;  %v901_v4 = vcombine.high %v897_v59, %v897_v59  ;;  %v925_v5 = vrot.slane %v897_v59, %v2087_v61  ;;  %v1753_v6 = vpop.f32.mrf.mxu0  ;;  %v950_v7 = vadd.f32 %v942_v57, %v846_v60 }
  0xea   : > { %v945_v8 = vadd.f32 %v1726_v32, %v917_v62  ;;  %v951_v9 = vadd.f32 %v943_v63, %v846_v60  ;;  %v952_v56 = vadd.f32 %v944_v0, %v846_v60  ;;  %v948_v15 = vadd.f32 %v1729_v35, %v929_v1  ;;  %v1189_v52 = vpop.permute.xlu0 %1188 }
  0xeb   : > { %v933_v10 = vrot.slane %v901_v4, %v2087_v61  ;;  %v947_v11 = vadd.f32 %v925_v5, %v727_v51  ;;  %v849_v12 = vpop.f32.mrf.mxu0  ;;  %v965_v13 = vadd.f32 %v1658_v2, %v950_v7  ;;  %v954_v14 = vadd.f32 %v946_v3, %v846_v60  ;;  %v1194_v51 = vpop.permute.xlu1 %1193 }
  0xec   : > { %v966_v16 = vadd.f32 %v1658_v2, %v951_v9  ;;  %v953_v20 = vadd.f32 %v945_v8, %v846_v60  ;;  %v967_v21 = vadd.f32 %v1658_v2, %v952_v56  ;;  %v956_v34 = vadd.f32 %v948_v15, %v846_v60 }
  0xed   : > { %v949_v22 = vadd.f32 %v1730_v44, %v933_v10  ;;  %v1754_v23 = vpop.f32.mrf.mxu0  ;;  %v973_v24 = vmax.f32 %v965_v13, 0.0  ;;  %v955_v25 = vadd.f32 %v947_v11, %v846_v60  ;;  %v969_v26 = vadd.f32 %v1658_v2, %v954_v14  ;;  %v1323_v44 = vld [vmem:[%s2210_s11 + $0x10] sm:$0xff] }
  0xee   : > { %v974_v27 = vmax.f32 %v966_v16, 0.0  ;;  %v968_v28 = vadd.f32 %v1658_v2, %v953_v20  ;;  %v975_v33 = vmax.f32 %v967_v21, 0.0  ;;  %v971_v40 = vadd.f32 %v1658_v2, %v956_v34  ;;  %v1204_v62 = vpop.permute.xlu0 %1203 }
  0xef   : > { %v970_v30 = vadd.f32 %v1658_v2, %v955_v25  ;;  %v957_v31 = vadd.f32 %v949_v22, %v846_v60  ;;  %v977_v36 = vmax.f32 %v969_v26, 0.0  ;;  %v1326_v46 = vpack.c.bf16 %v1324_v45, %v1323_v44  ;;  %v1199_v58 = vpop.permute.xlu1 %1198 }
  0xf0   : > { %v981_v32 = vpack.c.bf16 %v974_v27, %v973_v24  ;;  %v976_v61 = vmax.f32 %v968_v28, 0.0  ;;  %v979_v42 = vmax.f32 %v971_v40, 0.0  ;;  %v625_v4 = vunpack.c.l.bf16 %v1991_v17 }
  0xf1   : > { %v978_v37 = vmax.f32 %v970_v30, 0.0  ;;  %v972_v38 = vadd.f32 %v1658_v2, %v957_v31  ;;  %1771 = vmatprep.subr.bf16.mxu0 %v1326_v46  ;;  %v628_v2 = vunpack.c.h.bf16 %v1993_v18  ;;  %v627_v5 = vunpack.c.l.bf16 %v1993_v18 }
  0xf2   : > { %1763 = vmatprep.mubr.msk.bf16.mxu1 %vm752_vm2, %v981_v32  ;;  %v982_v35 = vpack.c.bf16 %v976_v61, %v975_v33  ;;  %1772 = vmatpush3.bf16.msra.mxu0 %v1326_v46  ;;  %v626_v8 = vunpack.c.h.bf16 %v1991_v17  ;;  %v631_v13 = vunpack.c.l.bf16 %v2022_v29  ;;  %v1214_v25 = vpop.permute.xlu0 %1213  ;;  %v632_v34 = vunpack.c.h.bf16 %v2022_v29 }
  0xf3   : > { %v983_v39 = vpack.c.bf16 %v978_v37, %v977_v36  ;;  %v980_v41 = vmax.f32 %v972_v38, 0.0  ;;  %1773 = vmatprep.subr.bf16.mxu0 %v1325_v49  ;;  %v1209_v15 = vpop.permute.xlu1 %1208  ;;  %v629_v29 = vunpack.c.l.bf16 %v1998_v19 }
  0xf4   : > { %1764 = vmatmul.mubr.msk.bf16.vlgmr.msra.gmra.mxu1 %vm752_vm2, %v982_v35 }
  0xf5   : > { %1767 = vmatprep.mubr.msk.bf16.mxu1 %vm752_vm2, %v983_v39  ;;  %v984_v43 = vpack.c.bf16 %v980_v41, %v979_v42 }
  0xf6   : > { %1774 = vmatpush3.bf16.msra.mxu0 %v1325_v49 }
  0xf7   : > { %v1219_v49 = vpop.permute.xlu1 %1218 }
  0xfc   : > { %1768 = vmatmul.mubr.msk.bf16.gmra.mxu1 %vm752_vm2, %v984_v43 }
 0x1b4   : > { %v1765_v54 = vpop.f32.mrf.mxu1 }
 0x1b5   : > { %v1059_v55 = vadd.f32 %v1765_v54, %v1659_v53 }
 0x1b6   : > { %v1050_v57 = vpop.f32.mrf.mxu1 }
 0x1b7   : > { %v1223_v59 = vmul.f32 %v1194_v51, %v1059_v55  ;;  %v1051_v60 = vadd.f32 %v1659_v53, %v1050_v57  ;;  %v630_v51 = vunpack.c.h.bf16 %v1998_v19 }
 0x1b8   : > { %v1766_v63 = vpop.f32.mrf.mxu1 }
 0x1b9   : > { %v1243_v0 = vsel %vm661_vm1, %v1223_v59, 0.0  ;;  %v1221_v1 = vmul.f32 %v1184_v50, %v1051_v60  ;;  %v1062_v3 = vadd.f32 %v1766_v63, %v1659_v53  ;;  %v1311_v23 = vadd.f32 %v1223_v59, %v627_v5 }
 0x1ba   : > { %v1244_v6 = vrot.slane %v1243_v0, 4  ;;  %v1053_v7 = vpop.f32.mrf.mxu1 }
 0x1bb   : > { %v1229_v9 = vsel %vm661_vm1, %v1221_v1, 0.0  ;;  %v1224_v56 = vmul.f32 %v1199_v58, %v1062_v3  ;;  %v1054_v10 = vadd.f32 %v1659_v53, %v1053_v7  ;;  %v1309_v27 = vadd.f32 %v1221_v1, %v625_v4 }
 0x1bc   : > { %v1245_v11 = vadd.f32 %v1244_v6, %v1243_v0  ;;  %v1230_v12 = vrot.slane %v1229_v9, 4  ;;  %v1769_v14 = vpop.f32.mrf.mxu1 }
 0x1bd   : > { %v1250_v16 = vsel %vm661_vm1, %v1224_v56, 0.0  ;;  %v1312_v20 = vadd.f32 %v1224_v56, %v628_v2  ;;  %v1222_v21 = vmul.f32 %v1189_v52, %v1054_v10  ;;  %v1075_v22 = vadd.f32 %v1769_v14, %v1659_v53 }
 0x1be   : > { %v1246_v18 = vrot.slane %v1245_v11, 2  ;;  %v1231_v24 = vadd.f32 %v1230_v12, %v1229_v9  ;;  %v1251_v17 = vrot.slane %v1250_v16, 4  ;;  %v1066_v26 = vpop.f32.mrf.mxu1 }
 0x1bf   : > { %v1236_v28 = vsel %vm661_vm1, %v1222_v21, 0.0  ;;  %v1310_v30 = vadd.f32 %v1222_v21, %v626_v8  ;;  %v1227_v31 = vmul.f32 %v1214_v25, %v1075_v22  ;;  %v1318_v37 = vpack.c.bf16 %v1312_v20, %v1311_v23 }
 0x1c0   : > { %v1232_v32 = vrot.slane %v1231_v24, 2  ;;  %v1252_v33 = vadd.f32 %v1251_v17, %v1250_v16  ;;  %v1237_v61 = vrot.slane %v1236_v28, 4  ;;  %v1770_v36 = vpop.f32.mrf.mxu1  ;;  %v1067_v39 = vadd.f32 %v1659_v53, %v1066_v26 }
 0x1c1   : > { %v1317_v35 = vpack.c.bf16 %v1310_v30, %v1309_v27  ;;  %v1271_v38 = vsel %vm661_vm1, %v1227_v31, 0.0  ;;  %v1247_v40 = vadd.f32 %v1246_v18, %v1245_v11  ;;  %v1078_v47 = vadd.f32 %v1770_v36, %v1659_v53 }
 0x1c2   : > { %v1233_v41 = vadd.f32 %v1232_v32, %v1231_v24  ;;  %v1253_v42 = vrot.slane %v1252_v33, 2  ;;  %v1238_v43 = vadd.f32 %v1237_v61, %v1236_v28  ;;  %v1069_v44 = vpop.f32.mrf.mxu1  ;;  %v1272_v45 = vrot.slane %v1271_v38, 4 }
 0x1c3   : > { %v1225_v46 = vmul.f32 %v1204_v62, %v1067_v39  ;;  %v1070_v48 = vadd.f32 %v1659_v53, %v1069_v44  ;;  %1775 = vmatprep.mubr.msk.bf16.mxu0 %vm661_vm1, %v1317_v35  ;;  %v1228_v57 = vmul.f32 %v1219_v49, %v1078_v47  ;;  %v1248_v58 = vrot.slane %v1247_v40, 1 }
 0x1c4   : > { %v1239_v50 = vrot.slane %v1238_v43, 2  ;;  %1776 = vmatmul.mubr.msk.bf16.vlgmr.msra.gmra.mxu0 %vm661_vm1, %v1318_v37  ;;  %v1234_v52 = vrot.slane %v1233_v41, 1  ;;  %v1273_v54 = vadd.f32 %v1272_v45, %v1271_v38  ;;  %v1315_v60 = vadd.f32 %v1227_v31, %v631_v13 }
 0x1c5   : > { %v1257_v55 = vsel %vm661_vm1, %v1225_v46, 0.0  ;;  %v1254_v62 = vadd.f32 %v1253_v42, %v1252_v33  ;;  %v1278_v63 = vsel %vm661_vm1, %v1228_v57, 0.0  ;;  %v1316_v0 = vadd.f32 %v1228_v57, %v632_v34 }
 0x1c6   : > { %v1240_v59 = vadd.f32 %v1239_v50, %v1238_v43  ;;  %v1258_v53 = vrot.slane %v1257_v55, 4  ;;  %v1226_v1 = vmul.f32 %v1209_v15, %v1070_v48  ;;  %v1313_v4 = vadd.f32 %v1225_v46, %v629_v29 }
 0x1c7   : > { %v1279_v19 = vrot.slane %v1278_v63, 4  ;;  %v1235_v5 = vadd.f32 %v1234_v52, %v1233_v41  ;;  %v1274_v6 = vrot.slane %v1273_v54, 2  ;;  %v1255_v12 = vrot.slane %v1254_v62, 1 }
 0x1c8   : > { %v1241_v2 = vrot.slane %v1240_v59, 1  ;;  %v1259_v3 = vadd.f32 %v1258_v53, %v1257_v55  ;;  %v1264_v7 = vsel %vm661_vm1, %v1226_v1, 0.0  ;;  %v1314_v8 = vadd.f32 %v1226_v1, %v630_v51 }
 0x1c9   : > { %v1280_v10 = vadd.f32 %v1279_v19, %v1278_v63  ;;  %v1265_v11 = vrot.slane %v1264_v7, 4  ;;  %v1320_v13 = vpack.c.bf16 %v1316_v0, %v1315_v60  ;;  %v1249_v22 = vadd.f32 %v1248_v58, %v1247_v40  ;;  %v1664_v40 = vld [vmem:[%s2211_s12] ss:$0 sm:$0xff] }
 0x1ca   : > { %v1242_v9 = vadd.f32 %v1241_v2, %v1240_v59  ;;  %v1260_v56 = vrot.slane %v1259_v3, 2  ;;  %v1319_v14 = vpack.c.bf16 %v1314_v8, %v1313_v4  ;;  %v1275_v18 = vadd.f32 %v1274_v6, %v1273_v54 }
 0x1cb   : > { %v1281_v20 = vrot.slane %v1280_v10, 2  ;;  %v1266_v21 = vadd.f32 %v1265_v11, %v1264_v7  ;;  %v1256_v26 = vadd.f32 %v1255_v12, %v1254_v62 }
 0x1cc   : > { %v1294_v16 = vsel %vm1293_vm3, %v1242_v9, %v1235_v5  ;;  %v1261_v15 = vadd.f32 %v1260_v56, %v1259_v3  ;;  %1779 = vmatprep.mubr.msk.bf16.mxu0 %vm661_vm1, %v1319_v14  ;;  %v1276_v28 = vrot.slane %v1275_v18, 1 }
 0x1cd   : > { %v1282_v24 = vadd.f32 %v1281_v20, %v1280_v10  ;;  %v1267_v25 = vrot.slane %v1266_v21, 2  ;;  %1780 = vmatmul.mubr.msk.bf16.gmra.mxu0 %vm661_vm1, %v1320_v13  ;;  %v1296_v17 = vsel %vm1295_vm4, %v1249_v22, %v1294_v16 }
 0x1ce   : > { %v1262_v23 = vrot.slane %v1261_v15, 1  ;;  %v1298_v31 = vsel %vm1297_vm5, %v1256_v26, %v1296_v17  ;;  %v1277_v34 = vadd.f32 %v1276_v28, %v1275_v18 }
 0x1cf   : > { %v1268_v27 = vadd.f32 %v1267_v25, %v1266_v21  ;;  %v1283_v32 = vrot.slane %v1282_v24, 1 }
 0x1d0   : > { %v1263_v30 = vadd.f32 %v1262_v23, %v1261_v15 }
 0x1d1   : > { %v1269_v33 = vrot.slane %v1268_v27, 1  ;;  %v1284_v37 = vadd.f32 %v1283_v32, %v1282_v24 }
 0x1d2   : > { %v1300_v36 = vsel %vm1299_vm6, %v1263_v30, %v1298_v31 }
 0x1d3   : > { %v1270_v61 = vadd.f32 %v1269_v33, %v1268_v27 }
 0x1d5   : > { %v1302_v35 = vsel %vm1301_vm7, %v1270_v61, %v1300_v36 }
 0x1d6   : > { %v1304_v38 = vsel %vm1303_vm8, %v1277_v34, %v1302_v35 }
 0x1d7   : > { %v1306_v39 = vsel %vm1305_vm9, %v1284_v37, %v1304_v38 }
 0x1d8   : > { %1308 = vst.msk [vmem:[%s615_s20] sm:$0xff] %vm661_vm1, %v1306_v39 }
 0x284   : > { %v1777_v41 = vpop.f32.mrf.mxu0 }
 0x285   : > { %v1389_v42 = vadd.f32 %v1777_v41, %v1664_v40 }
 0x286   : > { %v1380_v43 = vpop.f32.mrf.mxu0 }
 0x287   : > { %v1683_v44 = vpack.c.bf16 %v1389_v42, %v1389_v42  ;;  %v1381_v45 = vadd.f32 %v1664_v40, %v1380_v43 }
 0x288   : > { %v1778_v46 = vpop.f32.mrf.mxu0 }
 0x289   : > { %1446 = vst.msk [vmem:[%s2172_s28 + $0x8] sm:$0xf] %vm1443_vm10, %v1683_v44  ;;  %v1681_v47 = vpack.c.bf16 %v1381_v45, %v1381_v45  ;;  %v1392_v48 = vadd.f32 %v1778_v46, %v1664_v40 }
 0x28a   : > { %v1383_v49 = vpop.f32.mrf.mxu0 }
 0x28b   : > { %1444 = vst.msk [vmem:[%s2172_s28] sm:$0xf] %vm1443_vm10, %v1681_v47  ;;  %v1684_v50 = vpack.c.bf16 %v1392_v48, %v1392_v48  ;;  %v1384_v29 = vadd.f32 %v1664_v40, %v1383_v49 }
 0x28d   : > { %1447 = vst.msk [vmem:[%s2172_s28 + $0xc] sm:$0xf] %vm1443_vm10, %v1684_v50  ;;  %v1682_v51 = vpack.c.bf16 %v1384_v29, %v1384_v29  ;;  %v1781_v52 = vpop.f32.mrf.mxu0 }
 0x28e   : > { %v1405_v54 = vadd.f32 %v1781_v52, %v1664_v40 }
 0x28f   : > { %1445 = vst.msk [vmem:[%s2172_s28 + $0x4] sm:$0xf] %vm1443_vm10, %v1682_v51  ;;  %v1396_v55 = vpop.f32.mrf.mxu0 }
 0x290   : > { %v1687_v57 = vpack.c.bf16 %v1405_v54, %v1405_v54  ;;  %v1397_v58 = vadd.f32 %v1664_v40, %v1396_v55 }
 0x291   : > { %v1782_v59 = vpop.f32.mrf.mxu0 }
 0x292   : > { %1450 = vst.msk [vmem:[%s2172_s28 + $0x18] sm:$0xf] %vm1443_vm10, %v1687_v57  ;;  %v1685_v60 = vpack.c.bf16 %v1397_v58, %v1397_v58  ;;  %v1408_v53 = vadd.f32 %v1782_v59, %v1664_v40 }
 0x293   : > { %v1399_v62 = vpop.f32.mrf.mxu0 }
 0x294   : > { %1448 = vst.msk [vmem:[%s2172_s28 + $0x10] sm:$0xf] %vm1443_vm10, %v1685_v60  ;;  %v1688_v63 = vpack.c.bf16 %v1408_v53, %v1408_v53  ;;  %v1400_v0 = vadd.f32 %v1664_v40, %v1399_v62 }
 0x296   : > { %1451 = vst.msk [vmem:[%s2172_s28 + $0x1c] sm:$0xf] %vm1443_vm10, %v1688_v63  ;;  %v1686_v1 = vpack.c.bf16 %v1400_v0, %v1400_v0 }
 0x298   : > { %1449 = vst.msk [vmem:[%s2172_s28 + $0x14] sm:$0xf] %vm1443_vm10, %v1686_v1 }
 0x299 PF: > { %s25_s15 = sadd.s32 1, %s1844_s15   ;;  %s2214_s29 = smov %s1840_s30 }
 0x29a   : > { %p22_p5 = scmp.ge.s32.totalorder %s25_s15, 4   ;;  %s2215_s30 = smov %s2217_s16 }
 0x29c   :  { %24 = sbr.rel (!%p22_p5) target bundleno = 2 (0x2), region = 126 }

// kernel: dense_gnn_forward.13
= control target key start
LH: loop header
LB: loop body
LE: loop exit
PB: predicated region body
PF: predicated region fallthrough
CT: control target
= control target key end

     0   :  { %s2578_s15 = smov 0   ;;  %s3099_s0 = inlined_call_operand.vmem [shape: f32[2,16,8,4], index: 0, kind: input, shape index: {}]   ;;  %s3100_s1 = inlined_call_operand.vmem [shape: f32[2,16,8,4], index: 1, kind: input, shape index: {}]   ;;  %s3101_s2 = inlined_call_operand.vmem [shape: f32[2,16,8,4], index: 2, kind: input, shape index: {}]   ;;  %s3102_s3 = inlined_call_operand.vmem [shape: f32[2,1,8], index: 3, kind: input, shape index: {}]   ;;  %s3103_s4 = inlined_call_operand.vmem [shape: f32[2,16,8,4], index: 4, kind: output, shape index: {}]  }
   0x1 LB: > { %s2160_s16 = sadd.s32 4294967295, %s2548_s15   ;;  %p2164_p0 = scmp.ge.s32.totalorder %s2548_s15, 1  ;;  %s2548_s15 = sphi %s2578_s15, %s14_s15  }
   0x2   : > { %p190_p1 = scmp.lt.s32.totalorder %s2548_s15, 3 }
   0x4   : > { %p191_p2 = pnand %p2164_p0, %p190_p1 }
   0x5   : > { %p229_p3 = scmp.lt.s32.totalorder (!%p191_p2), %s2160_s16, 1 }
   0x6   : > { %194 = sbr.rel (%p191_p2) target bundleno = 794 (0x31a), region = 36 }
   0xb   : > { %v2550_v0 = vmov 0.0   ;;  %s3105_s16 = smov (!%p229_p3, %s2160_s16), 1  ;;  %vm2551_vm0 = vmmov 0   ;;  %vm350_vm1 = vcmask 31744   ;;  %vm1126_vm4 = vcmask 64512  }
   0xc   : > { %2275 = vmatprep.subr.bf16.mxu0 %v2550_v0  ;;  %2281 = vmatprep.subr.bf16.mxu1 %v2550_v0  ;;  %s2595_s17 = sshll.u32 %s3105_s16, 7  ;;  %s246_s26 = scalar_lea.vmem %s3102_s3, %s3105_s16  ;;  %vm1322_vm5 = vcmask 1043456  }
   0xd   : > { %2277 = vmatprep.mubr.msk.bf16.mxu0 %vm2551_vm0, %v2550_v0  ;;  %2283 = vmatprep.mubr.msk.bf16.mxu1 %vm2551_vm0, %v2550_v0  ;;  %s2601_s20 = scalar_lea.vmem %s3100_s1, %s2595_s17  ;;  %s2609_s23 = scalar_lea.vmem %s3099_s0, %s2595_s17 }
   0xe   : > { %v285_v1 = vld [vmem:[%s2601_s20] sm:$0xff]  ;;  %v286_v2 = vld [vmem:[%s2601_s20 + $0x8] sm:$0xff]  ;;  %v287_v5 = vld [vmem:[%s2601_s20 + $0x10] sm:$0xff]  ;;  %s2864_s29 = scalar_lea.vmem %s3101_s2, %s2595_s17  ;;  %s3062_s6 = scalar_lea.vmem %s3103_s4, %s2595_s17 }
   0xf   : > { %v301_v3 = vpack.c.bf16 %v285_v1, %v285_v1  ;;  %v302_v4 = vpack.c.bf16 %v286_v2, %v286_v2  ;;  %v288_v6 = vld [vmem:[%s2601_s20 + $0x18] sm:$0xff]  ;;  %v253_v9 = vld [vmem:[%s2609_s23] sm:$0xff]  ;;  %v254_v10 = vld [vmem:[%s2609_s23 + $0x8] sm:$0xff]  ;;  %v303_v11 = vpack.c.bf16 %v287_v5, %v287_v5 }
  0x10   : > { %v304_v12 = vpack.c.bf16 %v288_v6, %v288_v6  ;;  %v269_v13 = vpack.c.bf16 %v253_v9, %v253_v9  ;;  %v270_v14 = vpack.c.bf16 %v254_v10, %v254_v10  ;;  %v289_v17 = vld [vmem:[%s2601_s20 + $0x20] sm:$0xff]  ;;  %v290_v18 = vld [vmem:[%s2601_s20 + $0x28] sm:$0xff]  ;;  %v255_v19 = vld [vmem:[%s2609_s23 + $0x10] sm:$0xff] }
  0x11   : > { %v355_v7 = vsel %vm350_vm1, %v301_v3, 0  ;;  %v401_v8 = vsel %vm350_vm1, %v302_v4, 0  ;;  %v447_v15 = vsel %vm350_vm1, %v303_v11, 0  ;;  %v256_v20 = vld [vmem:[%s2609_s23 + $0x18] sm:$0xff]  ;;  %v305_v21 = vpack.c.bf16 %v289_v17, %v289_v17  ;;  %v291_v27 = vld [vmem:[%s2601_s20 + $0x30] sm:$0xff]  ;;  %v257_v29 = vld [vmem:[%s2609_s23 + $0x20] sm:$0xff] }
  0x12   : > { %2276 = vmatpush3.bf16.xpose.msra.mxu0 %v355_v7  ;;  %2282 = vmatpush3.bf16.xpose.msra.mxu1 %v401_v8  ;;  %v493_v16 = vsel %vm350_vm1, %v304_v12, 0  ;;  %v306_v22 = vpack.c.bf16 %v290_v18, %v290_v18  ;;  %v271_v23 = vpack.c.bf16 %v255_v19, %v255_v19  ;;  %v272_v24 = vpack.c.bf16 %v256_v20, %v256_v20  ;;  %v292_v28 = vld [vmem:[%s2601_s20 + $0x38] sm:$0xff]  ;;  %v258_v30 = vld [vmem:[%s2609_s23 + $0x28] sm:$0xff]  ;;  %v293_v37 = vld [vmem:[%s2601_s20 + $0x40] sm:$0xff] }
  0x13   : > { %2287 = vmatprep.subr.bf16.mxu0 %v2550_v0  ;;  %2293 = vmatprep.subr.bf16.mxu1 %v2550_v0  ;;  %v539_v25 = vsel %vm350_vm1, %v305_v21, 0  ;;  %v307_v31 = vpack.c.bf16 %v291_v27, %v291_v27  ;;  %v308_v32 = vpack.c.bf16 %v292_v28, %v292_v28  ;;  %v273_v33 = vpack.c.bf16 %v257_v29, %v257_v29  ;;  %v294_v38 = vld [vmem:[%s2601_s20 + $0x48] sm:$0xff]  ;;  %v259_v39 = vld [vmem:[%s2609_s23 + $0x30] sm:$0xff]  ;;  %v260_v40 = vld [vmem:[%s2609_s23 + $0x38] sm:$0xff] }
  0x14   : > { %v585_v26 = vsel %vm350_vm1, %v306_v22, 0  ;;  %v274_v34 = vpack.c.bf16 %v258_v30, %v258_v30  ;;  %v309_v41 = vpack.c.bf16 %v293_v37, %v293_v37  ;;  %v310_v42 = vpack.c.bf16 %v294_v38, %v294_v38  ;;  %v295_v47 = vld [vmem:[%s2601_s20 + $0x50] sm:$0xff]  ;;  %v296_v48 = vld [vmem:[%s2601_s20 + $0x58] sm:$0xff]  ;;  %v261_v49 = vld [vmem:[%s2609_s23 + $0x40] sm:$0xff] }
  0x15   : > { %v631_v35 = vsel %vm350_vm1, %v307_v31, 0  ;;  %v677_v36 = vsel %vm350_vm1, %v308_v32, 0  ;;  %v275_v43 = vpack.c.bf16 %v259_v39, %v259_v39  ;;  %v276_v44 = vpack.c.bf16 %v260_v40, %v260_v40  ;;  %v262_v50 = vld [vmem:[%s2609_s23 + $0x48] sm:$0xff]  ;;  %v297_v57 = vld [vmem:[%s2601_s20 + $0x60] sm:$0xff]  ;;  %v263_v59 = vld [vmem:[%s2609_s23 + $0x50] sm:$0xff] }
  0x16   : > { %v723_v45 = vsel %vm350_vm1, %v309_v41, 0  ;;  %v769_v46 = vsel %vm350_vm1, %v310_v42, 0  ;;  %v311_v51 = vpack.c.bf16 %v295_v47, %v295_v47  ;;  %v312_v52 = vpack.c.bf16 %v296_v48, %v296_v48  ;;  %v298_v58 = vld [vmem:[%s2601_s20 + $0x68] sm:$0xff]  ;;  %v264_v60 = vld [vmem:[%s2609_s23 + $0x58] sm:$0xff]  ;;  %v299_v4 = vld [vmem:[%s2601_s20 + $0x70] sm:$0xff] }
  0x17   : > { %v277_v53 = vpack.c.bf16 %v261_v49, %v261_v49  ;;  %v278_v54 = vpack.c.bf16 %v262_v50, %v262_v50  ;;  %v313_v61 = vpack.c.bf16 %v297_v57, %v297_v57  ;;  %v314_v62 = vpack.c.bf16 %v298_v58, %v298_v58  ;;  %v300_v5 = vld [vmem:[%s2601_s20 + $0x78] sm:$0xff]  ;;  %v265_v6 = vld [vmem:[%s2609_s23 + $0x60] sm:$0xff]  ;;  %v266_v7 = vld [vmem:[%s2609_s23 + $0x68] sm:$0xff] }
  0x18   : > { %v815_v55 = vsel %vm350_vm1, %v311_v51, 0  ;;  %v861_v56 = vsel %vm350_vm1, %v312_v52, 0  ;;  %v279_v63 = vpack.c.bf16 %v263_v59, %v263_v59  ;;  %v280_v1 = vpack.c.bf16 %v264_v60, %v264_v60  ;;  %v349_v19 = vld [vmem:[%s246_s26] sm:$0x1] }
  0x19   : > { %2278 = vmatmul.mubr.msk.bf16.vlgmr.msra.gmra.mxu0 %vm350_vm1, %v269_v13  ;;  %2284 = vmatmul.mubr.msk.bf16.vlgmr.msra.gmra.mxu1 %vm350_vm1, %v270_v14  ;;  %v907_v2 = vsel %vm350_vm1, %v313_v61, 0  ;;  %v953_v3 = vsel %vm350_vm1, %v314_v62, 0  ;;  %v315_v8 = vpack.c.bf16 %v299_v4, %v299_v4  ;;  %v316_v9 = vpack.c.bf16 %v300_v5, %v300_v5  ;;  %v267_v14 = vld [vmem:[%s2609_s23 + $0x70] sm:$0xff] }
  0x1a   : > { %2288 = vmatpush3.bf16.xpose.msra.mxu0 %v447_v15  ;;  %2294 = vmatpush3.bf16.xpose.msra.mxu1 %v493_v16  ;;  %v281_v10 = vpack.c.bf16 %v265_v6, %v265_v6  ;;  %v282_v11 = vpack.c.bf16 %v266_v7, %v266_v7  ;;  %v268_v15 = vld [vmem:[%s2609_s23 + $0x78] sm:$0xff]  ;;  %v283_v16 = vpack.c.bf16 %v267_v14, %v267_v14  ;;  %v1105_v18 = vlaneseq }
  0x1b   : > { %2289 = vmatprep.mubr.msk.bf16.mxu0 %vm2551_vm0, %v2550_v0  ;;  %2295 = vmatprep.mubr.msk.bf16.mxu1 %vm2551_vm0, %v2550_v0  ;;  %v999_v12 = vsel %vm350_vm1, %v315_v8, 0  ;;  %v1045_v13 = vsel %vm350_vm1, %v316_v9, 0  ;;  %v284_v17 = vpack.c.bf16 %v268_v15, %v268_v15  ;;  %vm1103_vm2 = vcmp.gt.f32.partialorder %v349_v19, 0.5 }
  0x1c   : > { %2299 = vmatprep.subr.bf16.mxu0 %v2550_v0  ;;  %2305 = vmatprep.subr.bf16.mxu1 %v2550_v0  ;;  %v1106_v20 = vshrl.u32 %v1105_v18, 7  ;;  %v2552_v22 = vmov 0  }
  0x1e   : > { %v1107_v21 = vsub.s32 0, %v1106_v20 }
  0x21   : > { %2290 = vmatmul.mubr.msk.bf16.vlgmr.msra.gmra.mxu0 %vm350_vm1, %v271_v23  ;;  %2296 = vmatmul.mubr.msk.bf16.vlgmr.msra.gmra.mxu1 %vm350_vm1, %v272_v24  ;;  %v1104_v23 = vsel %vm1103_vm2, 1, %v2552_v22 }
  0x22   : > { %2300 = vmatpush3.bf16.xpose.msra.mxu0 %v539_v25  ;;  %2306 = vmatpush3.bf16.xpose.msra.mxu1 %v585_v26  ;;  %v2725_v24 = vrot.slane %v1104_v23, %v1107_v21 }
  0x23   : > { %2301 = vmatprep.mubr.msk.bf16.mxu0 %vm2551_vm0, %v2550_v0  ;;  %2307 = vmatprep.mubr.msk.bf16.mxu1 %vm2551_vm0, %v2550_v0 }
  0x24   : > { %2311 = vmatprep.subr.bf16.mxu0 %v2550_v0  ;;  %2317 = vmatprep.subr.bf16.mxu1 %v2550_v0  ;;  %vm1109_vm3 = vcmp.eq.s32.totalorder %v2725_v24, 1 }
  0x29   : > { %2302 = vmatmul.mubr.msk.bf16.vlgmr.msra.gmra.mxu0 %vm350_vm1, %v273_v33  ;;  %2308 = vmatmul.mubr.msk.bf16.vlgmr.msra.gmra.mxu1 %vm350_vm1, %v274_v34 }
  0x2a   : > { %2312 = vmatpush3.bf16.xpose.msra.mxu0 %v631_v35  ;;  %2318 = vmatpush3.bf16.xpose.msra.mxu1 %v677_v36 }
  0x2b   : > { %2313 = vmatprep.mubr.msk.bf16.mxu0 %vm2551_vm0, %v2550_v0  ;;  %2319 = vmatprep.mubr.msk.bf16.mxu1 %vm2551_vm0, %v2550_v0 }
  0x2c   : > { %2323 = vmatprep.subr.bf16.mxu0 %v2550_v0  ;;  %2329 = vmatprep.subr.bf16.mxu1 %v2550_v0 }
  0x31   : > { %2314 = vmatmul.mubr.msk.bf16.vlgmr.msra.gmra.mxu0 %vm350_vm1, %v275_v43  ;;  %2320 = vmatmul.mubr.msk.bf16.vlgmr.msra.gmra.mxu1 %vm350_vm1, %v276_v44 }
  0x32   : > { %2324 = vmatpush3.bf16.xpose.msra.mxu0 %v723_v45  ;;  %2330 = vmatpush3.bf16.xpose.msra.mxu1 %v769_v46 }
  0x33   : > { %2325 = vmatprep.mubr.msk.bf16.mxu0 %vm2551_vm0, %v2550_v0  ;;  %2331 = vmatprep.mubr.msk.bf16.mxu1 %vm2551_vm0, %v2550_v0 }
  0x34   : > { %2335 = vmatprep.subr.bf16.mxu0 %v2550_v0  ;;  %2341 = vmatprep.subr.bf16.mxu1 %v2550_v0 }
  0x39   : > { %2326 = vmatmul.mubr.msk.bf16.vlgmr.msra.gmra.mxu0 %vm350_vm1, %v277_v53  ;;  %2332 = vmatmul.mubr.msk.bf16.vlgmr.msra.gmra.mxu1 %vm350_vm1, %v278_v54 }
  0x3a   : > { %2336 = vmatpush3.bf16.xpose.msra.mxu0 %v815_v55  ;;  %2342 = vmatpush3.bf16.xpose.msra.mxu1 %v861_v56 }
  0x3b   : > { %2337 = vmatprep.mubr.msk.bf16.mxu0 %vm2551_vm0, %v2550_v0  ;;  %2343 = vmatprep.mubr.msk.bf16.mxu1 %vm2551_vm0, %v2550_v0 }
  0x3c   : > { %2347 = vmatprep.subr.bf16.mxu0 %v2550_v0  ;;  %2353 = vmatprep.subr.bf16.mxu1 %v2550_v0 }
  0x41   : > { %2338 = vmatmul.mubr.msk.bf16.vlgmr.msra.gmra.mxu0 %vm350_vm1, %v279_v63  ;;  %2344 = vmatmul.mubr.msk.bf16.vlgmr.msra.gmra.mxu1 %vm350_vm1, %v280_v1 }
  0x42   : > { %2348 = vmatpush3.bf16.xpose.msra.mxu0 %v907_v2  ;;  %2354 = vmatpush3.bf16.xpose.msra.mxu1 %v953_v3 }
  0x43   : > { %2349 = vmatprep.mubr.msk.bf16.mxu0 %vm2551_vm0, %v2550_v0  ;;  %2355 = vmatprep.mubr.msk.bf16.mxu1 %vm2551_vm0, %v2550_v0 }
  0x44   : > { %2359 = vmatprep.subr.bf16.mxu0 %v2550_v0  ;;  %2365 = vmatprep.subr.bf16.mxu1 %v2550_v0 }
  0x49   : > { %2350 = vmatmul.mubr.msk.bf16.vlgmr.msra.gmra.mxu0 %vm350_vm1, %v281_v10  ;;  %2356 = vmatmul.mubr.msk.bf16.vlgmr.msra.gmra.mxu1 %vm350_vm1, %v282_v11 }
  0x4a   : > { %2360 = vmatpush3.bf16.xpose.msra.mxu0 %v999_v12  ;;  %2366 = vmatpush3.bf16.xpose.msra.mxu1 %v1045_v13 }
  0x4b   : > { %2361 = vmatprep.mubr.msk.bf16.mxu0 %vm2551_vm0, %v2550_v0  ;;  %2367 = vmatprep.mubr.msk.bf16.mxu1 %vm2551_vm0, %v2550_v0 }
  0x4c   : > { %2371 = vmatprep.subr.bf16.mxu0 %v2550_v0  ;;  %2377 = vmatprep.subr.bf16.mxu1 %v2550_v0 }
  0x51   : > { %2362 = vmatmul.mubr.msk.bf16.vlgmr.msra.gmra.mxu0 %vm350_vm1, %v283_v16  ;;  %2368 = vmatmul.mubr.msk.bf16.vlgmr.msra.gmra.mxu1 %vm350_vm1, %v284_v17 }
  0x52   : > { %2373 = vmatprep.mubr.msk.bf16.mxu0 %vm2551_vm0, %v2550_v0  ;;  %2379 = vmatprep.mubr.msk.bf16.mxu1 %vm2551_vm0, %v2550_v0 }
  0xd9   : > { %v391_v25 = vpop.f32.mrf.mxu0  ;;  %v437_v26 = vpop.f32.mrf.mxu1 }
  0xda   : > { %v1087_v27 = vmul.f32 0.5, %v391_v25  ;;  %v1088_v28 = vmul.f32 0.5, %v437_v26 }
  0xdb   : > { %v2279_v29 = vpop.f32.mrf.mxu0  ;;  %v2285_v30 = vpop.f32.mrf.mxu1 }
  0xdc   : > { %v2730_v31 = vsel %vm1109_vm3, %v1087_v27, -1e+30  ;;  %v2734_v32 = vsel %vm1109_vm3, %v1088_v28, -1e+30 }
  0xdd   : > { %v394_v33 = vpop.f32.mrf.mxu0  ;;  %v440_v34 = vpop.f32.mrf.mxu1  ;;  %v1127_v35 = vsel %vm1126_vm4, %v2730_v31, -inf  ;;  %v1130_v38 = vsel %vm1126_vm4, %v2734_v32, -inf }
  0xde   : > { %1128 = vmax.xlane.f32.xlu0 %v1127_v35 }
  0xdf   : > { %v2280_v36 = vpop.f32.mrf.mxu0  ;;  %v2286_v37 = vpop.f32.mrf.mxu1 }
  0xe1   : > { %v483_v39 = vpop.f32.mrf.mxu0  ;;  %v529_v40 = vpop.f32.mrf.mxu1 }
  0xe2   : > { %v1089_v41 = vmul.f32 0.5, %v483_v39  ;;  %v1090_v42 = vmul.f32 0.5, %v529_v40  ;;  %1131 = vmax.xlane.f32.xlu0 %v1130_v38 }
  0xe3   : > { %v2291_v43 = vpop.f32.mrf.mxu0  ;;  %v2297_v44 = vpop.f32.mrf.mxu1 }
  0xe4   : > { %v2742_v45 = vsel %vm1109_vm3, %v1089_v41, -1e+30  ;;  %v2746_v46 = vsel %vm1109_vm3, %v1090_v42, -1e+30 }
  0xe5   : > { %v486_v47 = vpop.f32.mrf.mxu0  ;;  %v532_v48 = vpop.f32.mrf.mxu1  ;;  %v1133_v49 = vsel %vm1126_vm4, %v2742_v45, -inf  ;;  %v1136_v52 = vsel %vm1126_vm4, %v2746_v46, -inf }
  0xe6   : > { %1134 = vmax.xlane.f32.xlu1 %v1133_v49 }
  0xe7   : > { %v2292_v50 = vpop.f32.mrf.mxu0  ;;  %v2298_v51 = vpop.f32.mrf.mxu1 }
  0xe9   : > { %v575_v53 = vpop.f32.mrf.mxu0  ;;  %v621_v54 = vpop.f32.mrf.mxu1 }
  0xea   : > { %v1091_v55 = vmul.f32 0.5, %v575_v53  ;;  %v1092_v56 = vmul.f32 0.5, %v621_v54  ;;  %1137 = vmax.xlane.f32.xlu1 %v1136_v52 }
  0xeb   : > { %v2303_v57 = vpop.f32.mrf.mxu0  ;;  %v2309_v58 = vpop.f32.mrf.mxu1 }
  0xec   : > { %v2754_v59 = vsel %vm1109_vm3, %v1092_v56, -1e+30  ;;  %v2758_v60 = vsel %vm1109_vm3, %v1091_v55, -1e+30 }
  0xed   : > { %v578_v61 = vpop.f32.mrf.mxu0  ;;  %v624_v62 = vpop.f32.mrf.mxu1  ;;  %v1142_v63 = vsel %vm1126_vm4, %v2754_v59, -inf  ;;  %v1139_v1 = vsel %vm1126_vm4, %v2758_v60, -inf }
  0xee   : > { %1143 = vmax.xlane.f32.xlu1 %v1142_v63  ;;  %1140 = vmax.xlane.f32.xlu0 %v1139_v1 }
  0xef   : > { %v2304_v2 = vpop.f32.mrf.mxu0  ;;  %v2310_v3 = vpop.f32.mrf.mxu1 }
  0xf1   : > { %v667_v4 = vpop.f32.mrf.mxu0  ;;  %v713_v5 = vpop.f32.mrf.mxu1 }
  0xf2   : > { %v1093_v6 = vmul.f32 0.5, %v667_v4  ;;  %v1094_v7 = vmul.f32 0.5, %v713_v5 }
  0xf3   : > { %v2315_v8 = vpop.f32.mrf.mxu0  ;;  %v2321_v9 = vpop.f32.mrf.mxu1 }
  0xf4   : > { %v2766_v10 = vsel %vm1109_vm3, %v1094_v7, -1e+30  ;;  %v2770_v11 = vsel %vm1109_vm3, %v1093_v6, -1e+30 }
  0xf5   : > { %v670_v12 = vpop.f32.mrf.mxu0  ;;  %v716_v13 = vpop.f32.mrf.mxu1  ;;  %v1148_v14 = vsel %vm1126_vm4, %v2766_v10, -inf  ;;  %v1145_v15 = vsel %vm1126_vm4, %v2770_v11, -inf }
  0xf6   : > { %1149 = vmax.xlane.f32.xlu1 %v1148_v14  ;;  %1146 = vmax.xlane.f32.xlu0 %v1145_v15 }
  0xf7   : > { %v2316_v16 = vpop.f32.mrf.mxu0  ;;  %v2322_v17 = vpop.f32.mrf.mxu1 }
  0xf9   : > { %v759_v18 = vpop.f32.mrf.mxu0  ;;  %v805_v19 = vpop.f32.mrf.mxu1 }
  0xfa   : > { %v1095_v20 = vmul.f32 0.5, %v759_v18  ;;  %v1096_v21 = vmul.f32 0.5, %v805_v19 }
  0xfb   : > { %v2327_v22 = vpop.f32.mrf.mxu0  ;;  %v2333_v23 = vpop.f32.mrf.mxu1 }
  0xfc   : > { %v2778_v25 = vsel %vm1109_vm3, %v1096_v21, -1e+30  ;;  %v2782_v26 = vsel %vm1109_vm3, %v1095_v20, -1e+30 }
  0xfd   : > { %v762_v27 = vpop.f32.mrf.mxu0  ;;  %v808_v28 = vpop.f32.mrf.mxu1  ;;  %v1154_v29 = vsel %vm1126_vm4, %v2778_v25, -inf  ;;  %v1151_v30 = vsel %vm1126_vm4, %v2782_v26, -inf }
  0xfe   : > { %1155 = vmax.xlane.f32.xlu1 %v1154_v29  ;;  %1152 = vmax.xlane.f32.xlu0 %v1151_v30 }
  0xff   : > { %v2328_v33 = vpop.f32.mrf.mxu0  ;;  %v2334_v34 = vpop.f32.mrf.mxu1 }
 0x101   : > { %v851_v35 = vpop.f32.mrf.mxu0  ;;  %v897_v36 = vpop.f32.mrf.mxu1 }
 0x102   : > { %v1097_v37 = vmul.f32 0.5, %v851_v35  ;;  %v1098_v38 = vmul.f32 0.5, %v897_v36 }
 0x103   : > { %v2339_v39 = vpop.f32.mrf.mxu0  ;;  %v2345_v40 = vpop.f32.mrf.mxu1 }
 0x104   : > { %v2790_v41 = vsel %vm1109_vm3, %v1098_v38, -1e+30  ;;  %v2794_v42 = vsel %vm1109_vm3, %v1097_v37, -1e+30 }
 0x105   : > { %v854_v43 = vpop.f32.mrf.mxu0  ;;  %v900_v44 = vpop.f32.mrf.mxu1  ;;  %v1160_v47 = vsel %vm1126_vm4, %v2790_v41, -inf  ;;  %v1157_v48 = vsel %vm1126_vm4, %v2794_v42, -inf }
 0x106   : > { %1161 = vmax.xlane.f32.xlu1 %v1160_v47  ;;  %1158 = vmax.xlane.f32.xlu0 %v1157_v48 }
 0x107   : > { %v2340_v49 = vpop.f32.mrf.mxu0  ;;  %v2346_v50 = vpop.f32.mrf.mxu1 }
 0x109   : > { %v943_v51 = vpop.f32.mrf.mxu0  ;;  %v989_v52 = vpop.f32.mrf.mxu1 }
 0x10a   : > { %v1099_v53 = vmul.f32 0.5, %v943_v51  ;;  %v1100_v54 = vmul.f32 0.5, %v989_v52 }
 0x10b   : > { %v2351_v55 = vpop.f32.mrf.mxu0  ;;  %v2357_v56 = vpop.f32.mrf.mxu1 }
 0x10c   : > { %v2802_v57 = vsel %vm1109_vm3, %v1100_v54, -1e+30  ;;  %v2806_v58 = vsel %vm1109_vm3, %v1099_v53, -1e+30 }
 0x10d   : > { %v946_v61 = vpop.f32.mrf.mxu0  ;;  %v992_v62 = vpop.f32.mrf.mxu1  ;;  %v1166_v63 = vsel %vm1126_vm4, %v2802_v57, -inf  ;;  %v1163_v1 = vsel %vm1126_vm4, %v2806_v58, -inf }
 0x10e   : > { %1167 = vmax.xlane.f32.xlu1 %v1166_v63  ;;  %1164 = vmax.xlane.f32.xlu0 %v1163_v1 }
 0x10f   : > { %v2352_v2 = vpop.f32.mrf.mxu0  ;;  %v2358_v3 = vpop.f32.mrf.mxu1 }
 0x111   : > { %v1035_v4 = vpop.f32.mrf.mxu0  ;;  %v1081_v5 = vpop.f32.mrf.mxu1 }
 0x112   : > { %v1101_v6 = vmul.f32 0.5, %v1035_v4  ;;  %v1102_v7 = vmul.f32 0.5, %v1081_v5 }
 0x113   : > { %v2363_v8 = vpop.f32.mrf.mxu0  ;;  %v2369_v9 = vpop.f32.mrf.mxu1 }
 0x114   : > { %v2814_v12 = vsel %vm1109_vm3, %v1102_v7, -1e+30  ;;  %v2818_v13 = vsel %vm1109_vm3, %v1101_v6, -1e+30  ;;  %v317_v6 = vld [vmem:[%s2864_s29] sm:$0xff]  ;;  %v318_v7 = vld [vmem:[%s2864_s29 + $0x8] sm:$0xff] }
 0x115   : > { %v1038_v14 = vpop.f32.mrf.mxu0  ;;  %v1084_v15 = vpop.f32.mrf.mxu1  ;;  %v1172_v16 = vsel %vm1126_vm4, %v2814_v12, -inf  ;;  %v1169_v17 = vsel %vm1126_vm4, %v2818_v13, -inf }
 0x116   : > { %1173 = vmax.xlane.f32.xlu1 %v1172_v16  ;;  %1170 = vmax.xlane.f32.xlu0 %v1169_v17  ;;  %v334_v16 = vpack.c.bf16 %v318_v7, %v318_v7 }
 0x117   : > { %v2364_v18 = vpop.f32.mrf.mxu0  ;;  %v2370_v19 = vpop.f32.mrf.mxu1 }
 0x118   : > { %v1370_v18 = vsel %vm1322_vm5, %v334_v16, 0  ;;  %v327_v16 = vld [vmem:[%s2864_s29 + $0x50] sm:$0xff] }
 0x119   : > { %2378 = vmatpush3.bf16.msra.mxu1 %v1370_v18  ;;  %v328_v18 = vld [vmem:[%s2864_s29 + $0x58] sm:$0xff] }
 0x11a   : > { %2389 = vmatprep.subr.bf16.mxu1 %v2550_v0 }
 0x167   : > { %v1129_v20 = vpop.xlane.xlu0 %1128 }
 0x168   : > { %v1175_v21 = vsub.f32 %v2730_v31, %v1129_v20 }
 0x16a   : > { %v1191_v22 = vmul.f32 1.442695, %v1175_v21 }
 0x16b   : > { %v1132_v23 = vpop.xlane.xlu0 %1131 }
 0x16c   : > { %2478 = vpow2.f32 %v1191_v22  ;;  %v1176_v24 = vsub.f32 %v2734_v32, %v1132_v23 }
 0x16e   : > { %v1193_v27 = vmul.f32 1.442695, %v1176_v24  ;;  %v319_v24 = vld [vmem:[%s2864_s29 + $0x10] sm:$0xff] }
 0x16f   : > { %v1135_v28 = vpop.xlane.xlu1 %1134 }
 0x170   : > { %2480 = vpow2.f32 %v1193_v27  ;;  %v1177_v29 = vsub.f32 %v2742_v45, %v1135_v28 }
 0x172   : > { %v1195_v30 = vmul.f32 1.442695, %v1177_v29 }
 0x173   : > { %v1138_v33 = vpop.xlane.xlu1 %1137 }
 0x174   : > { %2482 = vpow2.f32 %v1195_v30  ;;  %v1178_v34 = vsub.f32 %v2746_v46, %v1138_v33  ;;  %v335_v33 = vpack.c.bf16 %v319_v24, %v319_v24 }
 0x176   : > { %v1197_v35 = vmul.f32 1.442695, %v1178_v34 }
 0x177   : > { %v1144_v36 = vpop.xlane.xlu1 %1143  ;;  %v1141_v37 = vpop.xlane.xlu0 %1140 }
 0x178   : > { %2484 = vpow2.f32 %v1197_v35  ;;  %v1180_v31 = vsub.f32 %v2754_v59, %v1144_v36  ;;  %v1179_v38 = vsub.f32 %v2758_v60, %v1141_v37  ;;  %v320_v35 = vld [vmem:[%s2864_s29 + $0x18] sm:$0xff] }
 0x179   : > { %v2830_v39 = vpop.eup %2478 }
 0x17a   : > { %v1201_v32 = vmul.f32 1.442695, %v1180_v31  ;;  %v1199_v40 = vmul.f32 1.442695, %v1179_v38  ;;  %v1223_v45 = vsel %vm1126_vm4, %v2830_v39, 0.0 }
 0x17b   : > { %1224 = vadd.xlane.f32.xlu0 %v1223_v45  ;;  %v321_v45 = vld [vmem:[%s2864_s29 + $0x20] sm:$0xff] }
 0x17c   : > { %2486 = vpow2.f32 %v1201_v32 }
 0x17d   : > { %v2834_v43 = vpop.eup %2480  ;;  %2488 = vpow2.f32 %v1199_v40 }
 0x17e   : > { %v1226_v46 = vsel %vm1126_vm4, %v2834_v43, 0.0 }
 0x17f   : > { %1227 = vadd.xlane.f32.xlu1 %v1226_v46  ;;  %v1150_v44 = vpop.xlane.xlu1 %1149  ;;  %v1147_v59 = vpop.xlane.xlu0 %1146 }
 0x180   : > { %v1182_v60 = vsub.f32 %v2766_v10, %v1150_v44  ;;  %v1181_v47 = vsub.f32 %v2770_v11, %v1147_v59 }
 0x181   : > { %v2840_v48 = vpop.eup %2482 }
 0x182   : > { %v1205_v49 = vmul.f32 1.442695, %v1182_v60  ;;  %v1203_v50 = vmul.f32 1.442695, %v1181_v47  ;;  %v1229_v51 = vsel %vm1126_vm4, %v2840_v48, 0.0  ;;  %v337_v47 = vpack.c.bf16 %v321_v45, %v321_v45 }
 0x183   : > { %1230 = vadd.xlane.f32.xlu0 %v1229_v51 }
 0x184   : > { %2490 = vpow2.f32 %v1205_v49 }
 0x185   : > { %v2844_v52 = vpop.eup %2484  ;;  %2492 = vpow2.f32 %v1203_v50  ;;  %v2911_v50 = vsel %vm1322_vm5, %v337_v47, 0 }
 0x186   : > { %v1232_v53 = vsel %vm1126_vm4, %v2844_v52, 0.0 }
 0x187   : > { %1233 = vadd.xlane.f32.xlu1 %v1232_v53  ;;  %v1156_v54 = vpop.xlane.xlu1 %1155  ;;  %v1153_v10 = vpop.xlane.xlu0 %1152 }
 0x188   : > { %v1184_v11 = vsub.f32 %v2778_v25, %v1156_v54  ;;  %v1183_v55 = vsub.f32 %v2782_v26, %v1153_v10  ;;  %v323_v54 = vld [vmem:[%s2864_s29 + $0x30] sm:$0xff] }
 0x189   : > { %v2850_v56 = vpop.eup %2486 }
 0x18a   : > { %v2852_v61 = vpop.eup %2488  ;;  %v1209_v62 = vmul.f32 1.442695, %v1184_v11  ;;  %v1207_v63 = vmul.f32 1.442695, %v1183_v55  ;;  %v1238_v1 = vsel %vm1126_vm4, %v2850_v56, 0.0  ;;  %v339_v55 = vpack.c.bf16 %v323_v54, %v323_v54 }
 0x18b   : > { %1239 = vadd.xlane.f32.xlu1 %v1238_v1  ;;  %v1235_v2 = vsel %vm1126_vm4, %v2852_v61, 0.0 }
 0x18c   : > { %2494 = vpow2.f32 %v1209_v62  ;;  %1236 = vadd.xlane.f32.xlu0 %v1235_v2  ;;  %v2927_v2 = vsel %vm1322_vm5, %v339_v55, 0 }
 0x18d   : > { %2496 = vpow2.f32 %v1207_v63  ;;  %v324_v63 = vld [vmem:[%s2864_s29 + $0x38] sm:$0xff] }
 0x18e   : > { %v340_v1 = vpack.c.bf16 %v324_v63, %v324_v63 }
 0x18f   : > { %v1162_v25 = vpop.xlane.xlu1 %1161  ;;  %v1159_v3 = vpop.xlane.xlu0 %1158 }
 0x190   : > { %v1186_v26 = vsub.f32 %v2790_v41, %v1162_v25  ;;  %v1185_v4 = vsub.f32 %v2794_v42, %v1159_v3  ;;  %v333_v42 = vpack.c.bf16 %v317_v6, %v317_v6  ;;  %v2930_v25 = vsel %vm1322_vm5, %v340_v1, 0 }
 0x191   : > { %v2866_v5 = vpop.eup %2490 }
 0x192   : > { %v2870_v8 = vpop.eup %2492  ;;  %v1213_v9 = vmul.f32 1.442695, %v1186_v26  ;;  %v1211_v14 = vmul.f32 1.442695, %v1185_v4  ;;  %v1244_v41 = vsel %vm1126_vm4, %v2866_v5, 0.0  ;;  %v1324_v17 = vsel %vm1322_vm5, %v333_v42, 0 }
 0x193   : > { %1245 = vadd.xlane.f32.xlu1 %v1244_v41  ;;  %v1241_v15 = vsel %vm1126_vm4, %v2870_v8, 0.0  ;;  %2372 = vmatpush3.bf16.msra.mxu0 %v1324_v17  ;;  %v325_v26 = vld [vmem:[%s2864_s29 + $0x40] sm:$0xff]  ;;  %v343_v17 = vpack.c.bf16 %v327_v16, %v327_v16 }
 0x194   : > { %2498 = vpow2.f32 %v1213_v9  ;;  %1242 = vadd.xlane.f32.xlu0 %v1241_v15  ;;  %2383 = vmatprep.subr.bf16.mxu0 %v2550_v0  ;;  %v341_v7 = vpack.c.bf16 %v325_v26, %v325_v26 }
 0x195   : > { %2500 = vpow2.f32 %v1211_v14  ;;  %v326_v14 = vld [vmem:[%s2864_s29 + $0x48] sm:$0xff] }
 0x196   : > { %v342_v41 = vpack.c.bf16 %v326_v14, %v326_v14  ;;  %v2943_v42 = vsel %vm1322_vm5, %v341_v7, 0 }
 0x197   : > { %v1168_v19 = vpop.xlane.xlu1 %1167  ;;  %v1165_v20 = vpop.xlane.xlu0 %1164 }
 0x198   : > { %v1188_v21 = vsub.f32 %v2802_v57, %v1168_v19  ;;  %v1187_v22 = vsub.f32 %v2806_v58, %v1165_v20  ;;  %v336_v57 = vpack.c.bf16 %v320_v35, %v320_v35  ;;  %v2893_v58 = vsel %vm1322_vm5, %v335_v33, 0 }
 0x199   : > { %v2882_v23 = vpop.eup %2494  ;;  %v2946_v15 = vsel %vm1322_vm5, %v342_v41, 0  ;;  %v344_v19 = vpack.c.bf16 %v328_v18, %v328_v18  ;;  %v2951_v20 = vsel %vm1322_vm5, %v343_v17, 0 }
 0x19a   : > { %v2885_v27 = vpop.eup %2496  ;;  %v1217_v28 = vmul.f32 1.442695, %v1188_v21  ;;  %v1215_v29 = vmul.f32 1.442695, %v1187_v22  ;;  %v1250_v30 = vsel %vm1126_vm4, %v2882_v23, 0.0  ;;  %v2896_v36 = vsel %vm1322_vm5, %v336_v57, 0 }
 0x19b   : > { %1251 = vadd.xlane.f32.xlu1 %v1250_v30  ;;  %v1247_v34 = vsel %vm1126_vm4, %v2885_v27, 0.0  ;;  %v2954_v21 = vsel %vm1322_vm5, %v344_v19, 0  ;;  %v329_v22 = vld [vmem:[%s2864_s29 + $0x60] sm:$0xff]  ;;  %v332_v57 = vld [vmem:[%s2864_s29 + $0x78] sm:$0xff] }
 0x19c   : > { %2502 = vpow2.f32 %v1217_v28  ;;  %1248 = vadd.xlane.f32.xlu0 %v1247_v34  ;;  %v345_v24 = vpack.c.bf16 %v329_v22, %v329_v22  ;;  %v330_v28 = vld [vmem:[%s2864_s29 + $0x68] sm:$0xff]  ;;  %v331_v34 = vld [vmem:[%s2864_s29 + $0x70] sm:$0xff] }
 0x19d   : > { %2504 = vpow2.f32 %v1215_v29  ;;  %v346_v30 = vpack.c.bf16 %v330_v28, %v330_v28  ;;  %v347_v35 = vpack.c.bf16 %v331_v34, %v331_v34 }
 0x19e   : > { %v2959_v29 = vsel %vm1322_vm5, %v345_v24, 0 }
 0x19f   : > { %v1174_v37 = vpop.xlane.xlu1 %1173  ;;  %v1171_v31 = vpop.xlane.xlu0 %1170  ;;  %v2962_v33 = vsel %vm1322_vm5, %v346_v30, 0 }
 0x1a0   : > { %v1190_v38 = vsub.f32 %v2814_v12, %v1174_v37  ;;  %v1189_v32 = vsub.f32 %v2818_v13, %v1171_v31  ;;  %v322_v12 = vld [vmem:[%s2864_s29 + $0x28] sm:$0xff]  ;;  %v2967_v37 = vsel %vm1322_vm5, %v347_v35, 0  ;;  %v348_v31 = vpack.c.bf16 %v332_v57, %v332_v57 }
 0x1a1   : > { %v2900_v40 = vpop.eup %2498  ;;  %v338_v13 = vpack.c.bf16 %v322_v12, %v322_v12 }
 0x1a2   : > { %v2903_v46 = vpop.eup %2500  ;;  %v1221_v44 = vmul.f32 1.442695, %v1190_v38  ;;  %v1219_v59 = vmul.f32 1.442695, %v1189_v32  ;;  %v1256_v60 = vsel %vm1126_vm4, %v2900_v40, 0.0  ;;  %v2970_v38 = vsel %vm1322_vm5, %v348_v31, 0 }
 0x1a3   : > { %1257 = vadd.xlane.f32.xlu1 %v1256_v60  ;;  %v1253_v49 = vsel %vm1126_vm4, %v2903_v46, 0.0  ;;  %v2914_v51 = vsel %vm1322_vm5, %v338_v13, 0 }
 0x1a4   : > { %2506 = vpow2.f32 %v1221_v44  ;;  %1254 = vadd.xlane.f32.xlu0 %v1253_v49 }
 0x1a5   : > { %2508 = vpow2.f32 %v1219_v59 }
 0x1a9   : > { %v2916_v53 = vpop.eup %2502 }
 0x1aa   : > { %v2919_v10 = vpop.eup %2504  ;;  %v1262_v11 = vsel %vm1126_vm4, %v2916_v53, 0.0 }
 0x1ab   : > { %1263 = vadd.xlane.f32.xlu1 %v1262_v11  ;;  %v1259_v62 = vsel %vm1126_vm4, %v2919_v10, 0.0 }
 0x1ac   : > { %1260 = vadd.xlane.f32.xlu0 %v1259_v62 }
 0x1b1   : > { %v2932_v3 = vpop.eup %2506 }
 0x1b2   : > { %v2935_v4 = vpop.eup %2508  ;;  %v1268_v6 = vsel %vm1126_vm4, %v2932_v3, 0.0 }
 0x1b3   : > { %1269 = vadd.xlane.f32.xlu1 %v1268_v6  ;;  %v1265_v9 = vsel %vm1126_vm4, %v2935_v4, 0.0 }
 0x1b4   : > { %1266 = vadd.xlane.f32.xlu0 %v1265_v9 }
 0x204   : > { %v1225_v32 = vpop.xlane.xlu0 %1224 }
 0x205   : > { %2510 = vrcp.f32 %v1225_v32 }
 0x208   : > { %v1228_v45 = vpop.xlane.xlu1 %1227 }
 0x209   : > { %2512 = vrcp.f32 %v1228_v45 }
 0x20c   : > { %v1231_v44 = vpop.xlane.xlu0 %1230 }
 0x20d   : > { %2514 = vrcp.f32 %v1231_v44 }
 0x210   : > { %v1234_v59 = vpop.xlane.xlu1 %1233 }
 0x211   : > { %2516 = vrcp.f32 %v1234_v59 }
 0x212   : > { %v2511_v60 = vpop.eup %2510 }
 0x213   : > { %v1287_v47 = vmul.f32 %v2511_v60, %v2830_v39 }
 0x214   : > { %v1240_v49 = vpop.xlane.xlu1 %1239 }
 0x215   : > { %2518 = vrcp.f32 %v1240_v49  ;;  %v1237_v12 = vpop.xlane.xlu0 %1236  ;;  %v1303_v13 = vpack.c.bf16 %v1287_v47, %v1287_v47 }
 0x216   : > { %v2513_v54 = vpop.eup %2512  ;;  %2520 = vrcp.f32 %v1237_v12 }
 0x217   : > { %2374 = vmatmul.mubr.msk.bf16.vlgmr.msra.gmra.mxu0 %vm1126_vm4, %v1303_v13  ;;  %v1288_v11 = vmul.f32 %v2513_v54, %v2834_v43 }
 0x218   : > { %2384 = vmatpush3.bf16.msra.mxu0 %v2893_v58  ;;  %2385 = vmatprep.mubr.msk.bf16.mxu0 %vm2551_vm0, %v2550_v0 }
 0x219   : > { %v1304_v55 = vpack.c.bf16 %v1288_v11, %v1288_v11  ;;  %2395 = vmatprep.subr.bf16.mxu0 %v2550_v0 }
 0x21a   : > { %v2515_v62 = vpop.eup %2514 }
 0x21b   : > { %2380 = vmatmul.mubr.msk.bf16.vlgmr.msra.gmra.mxu1 %vm1126_vm4, %v1304_v55  ;;  %v1289_v39 = vmul.f32 %v2515_v62, %v2840_v48 }
 0x21c   : > { %2390 = vmatpush3.bf16.msra.mxu1 %v2896_v36  ;;  %v1246_v63 = vpop.xlane.xlu1 %1245  ;;  %2391 = vmatprep.mubr.msk.bf16.mxu1 %vm2551_vm0, %v2550_v0 }
 0x21d   : > { %2522 = vrcp.f32 %v1246_v63  ;;  %v1243_v43 = vpop.xlane.xlu0 %1242  ;;  %v1305_v58 = vpack.c.bf16 %v1289_v39, %v1289_v39  ;;  %2401 = vmatprep.subr.bf16.mxu1 %v2550_v0 }
 0x21e   : > { %v2517_v1 = vpop.eup %2516  ;;  %2524 = vrcp.f32 %v1243_v43 }
 0x21f   : > { %2386 = vmatmul.mubr.msk.bf16.vlgmr.msra.gmra.mxu0 %vm1126_vm4, %v1305_v58  ;;  %v1290_v26 = vmul.f32 %v2517_v1, %v2844_v52 }
 0x220   : > { %2396 = vmatpush3.bf16.msra.mxu0 %v2911_v50  ;;  %2397 = vmatprep.mubr.msk.bf16.mxu0 %vm2551_vm0, %v2550_v0 }
 0x221   : > { %v1306_v48 = vpack.c.bf16 %v1290_v26, %v1290_v26  ;;  %2407 = vmatprep.subr.bf16.mxu0 %v2550_v0 }
 0x222   : > { %v2519_v36 = vpop.eup %2518 }
 0x223   : > { %v2521_v6 = vpop.eup %2520  ;;  %2392 = vmatmul.mubr.msk.bf16.vlgmr.msra.gmra.mxu1 %vm1126_vm4, %v1306_v48  ;;  %v1292_v50 = vmul.f32 %v2519_v36, %v2850_v56 }
 0x224   : > { %2402 = vmatpush3.bf16.msra.mxu1 %v2914_v51  ;;  %v1252_v7 = vpop.xlane.xlu1 %1251  ;;  %v1291_v9 = vmul.f32 %v2521_v6, %v2852_v61  ;;  %2403 = vmatprep.mubr.msk.bf16.mxu1 %vm2551_vm0, %v2550_v0 }
 0x225   : > { %2526 = vrcp.f32 %v1252_v7  ;;  %v1249_v52 = vpop.xlane.xlu0 %1248  ;;  %2413 = vmatprep.subr.bf16.mxu1 %v2550_v0  ;;  %v1308_v41 = vpack.c.bf16 %v1292_v50, %v1292_v50 }
 0x226   : > { %2528 = vrcp.f32 %v1249_v52  ;;  %v1307_v14 = vpack.c.bf16 %v1291_v9, %v1291_v9 }
 0x228   : > { %2398 = vmatmul.mubr.msk.bf16.vlgmr.msra.gmra.mxu0 %vm1126_vm4, %v1307_v14 }
 0x229   : > { %2408 = vmatpush3.bf16.msra.mxu0 %v2927_v2  ;;  %2409 = vmatprep.mubr.msk.bf16.mxu0 %vm2551_vm0, %v2550_v0 }
 0x22a   : > { %v2523_v61 = vpop.eup %2522  ;;  %2419 = vmatprep.subr.bf16.mxu0 %v2550_v0 }
 0x22b   : > { %v2525_v51 = vpop.eup %2524  ;;  %2404 = vmatmul.mubr.msk.bf16.vlgmr.msra.gmra.mxu1 %vm1126_vm4, %v1308_v41  ;;  %v1294_v2 = vmul.f32 %v2523_v61, %v2866_v5 }
 0x22c   : > { %2414 = vmatpush3.bf16.msra.mxu1 %v2930_v25  ;;  %v1258_v56 = vpop.xlane.xlu1 %1257  ;;  %v1293_v16 = vmul.f32 %v2525_v51, %v2870_v8  ;;  %2415 = vmatprep.mubr.msk.bf16.mxu1 %vm2551_vm0, %v2550_v0 }
 0x22d   : > { %2530 = vrcp.f32 %v1258_v56  ;;  %v1255_v17 = vpop.xlane.xlu0 %1254  ;;  %2425 = vmatprep.subr.bf16.mxu1 %v2550_v0  ;;  %v1310_v19 = vpack.c.bf16 %v1294_v2, %v1294_v2 }
 0x22e   : > { %2532 = vrcp.f32 %v1255_v17  ;;  %v1309_v18 = vpack.c.bf16 %v1293_v16, %v1293_v16 }
 0x230   : > { %2410 = vmatmul.mubr.msk.bf16.vlgmr.msra.gmra.mxu0 %vm1126_vm4, %v1309_v18 }
 0x231   : > { %2420 = vmatpush3.bf16.msra.mxu0 %v2943_v42  ;;  %2421 = vmatprep.mubr.msk.bf16.mxu0 %vm2551_vm0, %v2550_v0 }
 0x232   : > { %v2527_v8 = vpop.eup %2526  ;;  %2431 = vmatprep.subr.bf16.mxu0 %v2550_v0 }
 0x233   : > { %v2529_v25 = vpop.eup %2528  ;;  %2416 = vmatmul.mubr.msk.bf16.vlgmr.msra.gmra.mxu1 %vm1126_vm4, %v1310_v19  ;;  %v1296_v42 = vmul.f32 %v2527_v8, %v2882_v23 }
 0x234   : > { %2426 = vmatpush3.bf16.msra.mxu1 %v2946_v15  ;;  %v1264_v5 = vpop.xlane.xlu1 %1263  ;;  %v1295_v22 = vmul.f32 %v2529_v25, %v2885_v27  ;;  %2427 = vmatprep.mubr.msk.bf16.mxu1 %vm2551_vm0, %v2550_v0 }
 0x235   : > { %2534 = vrcp.f32 %v1264_v5  ;;  %v1261_v24 = vpop.xlane.xlu0 %1260  ;;  %2437 = vmatprep.subr.bf16.mxu1 %v2550_v0  ;;  %v1312_v30 = vpack.c.bf16 %v1296_v42, %v1296_v42 }
 0x236   : > { %2536 = vrcp.f32 %v1261_v24  ;;  %v1311_v28 = vpack.c.bf16 %v1295_v22, %v1295_v22 }
 0x238   : > { %2422 = vmatmul.mubr.msk.bf16.vlgmr.msra.gmra.mxu0 %vm1126_vm4, %v1311_v28 }
 0x239   : > { %2432 = vmatpush3.bf16.msra.mxu0 %v2951_v20  ;;  %2433 = vmatprep.mubr.msk.bf16.mxu0 %vm2551_vm0, %v2550_v0 }
 0x23a   : > { %v2531_v27 = vpop.eup %2530  ;;  %2443 = vmatprep.subr.bf16.mxu0 %v2550_v0 }
 0x23b   : > { %v2533_v15 = vpop.eup %2532  ;;  %2428 = vmatmul.mubr.msk.bf16.vlgmr.msra.gmra.mxu1 %vm1126_vm4, %v1312_v30  ;;  %v1298_v20 = vmul.f32 %v2531_v27, %v2900_v40 }
 0x23c   : > { %2438 = vmatpush3.bf16.msra.mxu1 %v2954_v21  ;;  %v1270_v23 = vpop.xlane.xlu1 %1269  ;;  %v1297_v34 = vmul.f32 %v2533_v15, %v2903_v46  ;;  %2439 = vmatprep.mubr.msk.bf16.mxu1 %vm2551_vm0, %v2550_v0 }
 0x23d   : > { %2538 = vrcp.f32 %v1270_v23  ;;  %v1267_v35 = vpop.xlane.xlu0 %1266  ;;  %2449 = vmatprep.subr.bf16.mxu1 %v2550_v0  ;;  %v1314_v31 = vpack.c.bf16 %v1298_v20, %v1298_v20 }
 0x23e   : > { %2540 = vrcp.f32 %v1267_v35  ;;  %v1313_v57 = vpack.c.bf16 %v1297_v34, %v1297_v34 }
 0x240   : > { %2434 = vmatmul.mubr.msk.bf16.vlgmr.msra.gmra.mxu0 %vm1126_vm4, %v1313_v57 }
 0x241   : > { %2444 = vmatpush3.bf16.msra.mxu0 %v2959_v29  ;;  %2445 = vmatprep.mubr.msk.bf16.mxu0 %vm2551_vm0, %v2550_v0 }
 0x242   : > { %v2535_v46 = vpop.eup %2534  ;;  %2455 = vmatprep.subr.bf16.mxu0 %v2550_v0 }
 0x243   : > { %v2537_v21 = vpop.eup %2536  ;;  %2440 = vmatmul.mubr.msk.bf16.vlgmr.msra.gmra.mxu1 %vm1126_vm4, %v1314_v31  ;;  %v1300_v32 = vmul.f32 %v2535_v46, %v2916_v53 }
 0x244   : > { %2450 = vmatpush3.bf16.msra.mxu1 %v2962_v33  ;;  %v1299_v40 = vmul.f32 %v2537_v21, %v2919_v10  ;;  %2451 = vmatprep.mubr.msk.bf16.mxu1 %vm2551_vm0, %v2550_v0 }
 0x245   : > { %2461 = vmatprep.subr.bf16.mxu1 %v2550_v0  ;;  %v1316_v45 = vpack.c.bf16 %v1300_v32, %v1300_v32 }
 0x246   : > { %v1315_v29 = vpack.c.bf16 %v1299_v40, %v1299_v40 }
 0x248   : > { %2446 = vmatmul.mubr.msk.bf16.vlgmr.msra.gmra.mxu0 %vm1126_vm4, %v1315_v29 }
 0x249   : > { %2456 = vmatpush3.bf16.msra.mxu0 %v2967_v37  ;;  %2457 = vmatprep.mubr.msk.bf16.mxu0 %vm2551_vm0, %v2550_v0 }
 0x24a   : > { %v2539_v33 = vpop.eup %2538 }
 0x24b   : > { %v2541_v44 = vpop.eup %2540  ;;  %2452 = vmatmul.mubr.msk.bf16.vlgmr.msra.gmra.mxu1 %vm1126_vm4, %v1316_v45  ;;  %v1302_v10 = vmul.f32 %v2539_v33, %v2932_v3 }
 0x24c   : > { %2462 = vmatpush3.bf16.msra.mxu1 %v2970_v38  ;;  %v1301_v53 = vmul.f32 %v2541_v44, %v2935_v4  ;;  %2463 = vmatprep.mubr.msk.bf16.mxu1 %vm2551_vm0, %v2550_v0 }
 0x24d   : > { %v1318_v37 = vpack.c.bf16 %v1302_v10, %v1302_v10 }
 0x24e   : > { %v1317_v59 = vpack.c.bf16 %v1301_v53, %v1301_v53 }
 0x250   : > { %2458 = vmatmul.mubr.msk.bf16.vlgmr.msra.gmra.mxu0 %vm1126_vm4, %v1317_v59 }
 0x253   : > { %2464 = vmatmul.mubr.msk.bf16.vlgmr.msra.gmra.mxu1 %vm1126_vm4, %v1318_v37 }
 0x2d7   : > { %v1360_v4 = vpop.f32.mrf.mxu0 }
 0x2d8   : > { %2056 = vst.msk [vmem:[%s3062_s6] sm:$0xff] %vm350_vm1, %v1360_v4 }
 0x2d9   : > { %v2375_v0 = vpop.f32.mrf.mxu0 }
 0x2db   : > { %v1363_v3 = vpop.f32.mrf.mxu0  ;;  %v1406_v38 = vpop.f32.mrf.mxu1 }
 0x2dc   : > { %2057 = vst.msk [vmem:[%s3062_s6 + $0x8] sm:$0xff] %vm350_vm1, %v1406_v38 }
 0x2dd   : > { %v2376_v60 = vpop.f32.mrf.mxu0  ;;  %v2381_v47 = vpop.f32.mrf.mxu1 }
 0x2df   : > { %v1409_v49 = vpop.f32.mrf.mxu1  ;;  %v1452_v12 = vpop.f32.mrf.mxu0 }
 0x2e0   : > { %2058 = vst.msk [vmem:[%s3062_s6 + $0x10] sm:$0xff] %vm350_vm1, %v1452_v12 }
 0x2e1   : > { %v2382_v13 = vpop.f32.mrf.mxu1  ;;  %v2387_v54 = vpop.f32.mrf.mxu0 }
 0x2e3   : > { %v1455_v11 = vpop.f32.mrf.mxu0  ;;  %v1498_v55 = vpop.f32.mrf.mxu1 }
 0x2e4   : > { %2059 = vst.msk [vmem:[%s3062_s6 + $0x18] sm:$0xff] %vm350_vm1, %v1498_v55 }
 0x2e5   : > { %v2388_v62 = vpop.f32.mrf.mxu0  ;;  %v2393_v39 = vpop.f32.mrf.mxu1 }
 0x2e7   : > { %v1501_v63 = vpop.f32.mrf.mxu1 }
 0x2e8   : > { %v1544_v43 = vpop.f32.mrf.mxu0 }
 0x2e9   : > { %2060 = vst.msk [vmem:[%s3062_s6 + $0x20] sm:$0xff] %vm350_vm1, %v1544_v43  ;;  %v2394_v58 = vpop.f32.mrf.mxu1 }
 0x2ea   : > { %v2399_v1 = vpop.f32.mrf.mxu0 }
 0x2eb   : > { %v1590_v26 = vpop.f32.mrf.mxu1 }
 0x2ec   : > { %v1547_v48 = vpop.f32.mrf.mxu0  ;;  %2061 = vst.msk [vmem:[%s3062_s6 + $0x28] sm:$0xff] %vm350_vm1, %v1590_v26 }
 0x2ed   : > { %v2405_v36 = vpop.f32.mrf.mxu1 }
 0x2ee   : > { %v2400_v6 = vpop.f32.mrf.mxu0 }
 0x2ef   : > { %v1593_v7 = vpop.f32.mrf.mxu1 }
 0x2f0   : > { %v1636_v9 = vpop.f32.mrf.mxu0 }
 0x2f1   : > { %2062 = vst.msk [vmem:[%s3062_s6 + $0x30] sm:$0xff] %vm350_vm1, %v1636_v9  ;;  %v2406_v52 = vpop.f32.mrf.mxu1 }
 0x2f2   : > { %v2411_v50 = vpop.f32.mrf.mxu0 }
 0x2f3   : > { %v1682_v14 = vpop.f32.mrf.mxu1 }
 0x2f4   : > { %v1639_v41 = vpop.f32.mrf.mxu0  ;;  %2063 = vst.msk [vmem:[%s3062_s6 + $0x38] sm:$0xff] %vm350_vm1, %v1682_v14 }
 0x2f5   : > { %v2417_v61 = vpop.f32.mrf.mxu1 }
 0x2f6   : > { %v2412_v51 = vpop.f32.mrf.mxu0 }
 0x2f7   : > { %v1685_v56 = vpop.f32.mrf.mxu1 }
 0x2f8   : > { %v1728_v16 = vpop.f32.mrf.mxu0 }
 0x2f9   : > { %2064 = vst.msk [vmem:[%s3062_s6 + $0x40] sm:$0xff] %vm350_vm1, %v1728_v16  ;;  %v2418_v17 = vpop.f32.mrf.mxu1 }
 0x2fa   : > { %v2423_v2 = vpop.f32.mrf.mxu0 }
 0x2fb   : > { %v1774_v18 = vpop.f32.mrf.mxu1 }
 0x2fc   : > { %v1731_v19 = vpop.f32.mrf.mxu0  ;;  %2065 = vst.msk [vmem:[%s3062_s6 + $0x48] sm:$0xff] %vm350_vm1, %v1774_v18 }
 0x2fd   : > { %v2429_v8 = vpop.f32.mrf.mxu1 }
 0x2fe   : > { %v2424_v25 = vpop.f32.mrf.mxu0 }
 0x2ff   : > { %v1777_v5 = vpop.f32.mrf.mxu1 }
 0x300   : > { %v1820_v22 = vpop.f32.mrf.mxu0 }
 0x301   : > { %2066 = vst.msk [vmem:[%s3062_s6 + $0x50] sm:$0xff] %vm350_vm1, %v1820_v22  ;;  %v2430_v24 = vpop.f32.mrf.mxu1 }
 0x302   : > { %v2435_v42 = vpop.f32.mrf.mxu0 }
 0x303   : > { %v1866_v28 = vpop.f32.mrf.mxu1 }
 0x304   : > { %v1823_v30 = vpop.f32.mrf.mxu0  ;;  %2067 = vst.msk [vmem:[%s3062_s6 + $0x58] sm:$0xff] %vm350_vm1, %v1866_v28 }
 0x305   : > { %v2441_v27 = vpop.f32.mrf.mxu1 }
 0x306   : > { %v2436_v15 = vpop.f32.mrf.mxu0 }
 0x307   : > { %v1869_v23 = vpop.f32.mrf.mxu1 }
 0x308   : > { %v1912_v34 = vpop.f32.mrf.mxu0 }
 0x309   : > { %2068 = vst.msk [vmem:[%s3062_s6 + $0x60] sm:$0xff] %vm350_vm1, %v1912_v34  ;;  %v2442_v35 = vpop.f32.mrf.mxu1 }
 0x30a   : > { %v2447_v20 = vpop.f32.mrf.mxu0 }
 0x30b   : > { %v1958_v57 = vpop.f32.mrf.mxu1 }
 0x30c   : > { %v1915_v31 = vpop.f32.mrf.mxu0  ;;  %2069 = vst.msk [vmem:[%s3062_s6 + $0x68] sm:$0xff] %vm350_vm1, %v1958_v57 }
 0x30d   : > { %v2453_v46 = vpop.f32.mrf.mxu1 }
 0x30e   : > { %v2448_v21 = vpop.f32.mrf.mxu0 }
 0x30f   : > { %v1961_v40 = vpop.f32.mrf.mxu1 }
 0x310   : > { %v2004_v32 = vpop.f32.mrf.mxu0 }
 0x311   : > { %2070 = vst.msk [vmem:[%s3062_s6 + $0x70] sm:$0xff] %vm350_vm1, %v2004_v32  ;;  %v2454_v29 = vpop.f32.mrf.mxu1 }
 0x312   : > { %v2459_v45 = vpop.f32.mrf.mxu0 }
 0x313   : > { %v2050_v33 = vpop.f32.mrf.mxu1 }
 0x314   : > { %v2007_v44 = vpop.f32.mrf.mxu0  ;;  %2071 = vst.msk [vmem:[%s3062_s6 + $0x78] sm:$0xff] %vm350_vm1, %v2050_v33 }
 0x315   : > { %v2465_v53 = vpop.f32.mrf.mxu1 }
 0x316   : > { %v2460_v10 = vpop.f32.mrf.mxu0 }
 0x317   : > { %v2053_v59 = vpop.f32.mrf.mxu1 }
 0x319   : > { %v2466_v37 = vpop.f32.mrf.mxu1 }
 0x31a PF: > { %s14_s15 = sadd.s32 1, %s2548_s15  }
 0x31b   : > { %p11_p4 = scmp.ge.s32.totalorder %s14_s15, 4  }
 0x31d   :  { %13 = sbr.rel (!%p11_p4) target bundleno = 1 (0x1), region = 75 }

</bundles_post_ra>
